<compile_context>
chip_gen: v7x
topology: tpu7x:2x2x1
jax: 0.10.0
libtpu: 0.0.40
codegen_flags: <defaults>
</compile_context>

<pallas_src>
import functools

import jax
import jax.numpy as jnp
import numpy as np
from jax.experimental import pallas as pl
from jax.experimental.pallas import tpu as pltpu

MATMUL_DTYPE = jnp.bfloat16   # MXU operand dtype; accumulation & elementwise stay f32
LN_EPS = 1e-5


# ------------------------------ kernel helpers -------------------------------


def _split_heads(x, nhead, head_dim):
    # (T, D) -> (nhead, T, head_dim); head h owns columns [h*hd, (h+1)*hd).
    t = x.shape[0]
    return x.reshape(t, nhead, head_dim).transpose(1, 0, 2)


def _mha_core(q, k, v, bias, wo, bo, *, nhead, head_dim):
    """Scaled dot-product attention + output projection for one batch element.

    q: (Tq, D) f32, k/v: (Tk, D) f32, bias: additive, broadcastable to (Tq, Tk),
    wo: (D, D) MATMUL_DTYPE, bo: (1, D) f32.  Returns (Tq, D) f32.
    """
    tq = q.shape[0]
    qh = _split_heads(q, nhead, head_dim).astype(MATMUL_DTYPE)
    kh = _split_heads(k, nhead, head_dim).astype(MATMUL_DTYPE)
    vh = _split_heads(v, nhead, head_dim).astype(MATMUL_DTYPE)

    scale = 1.0 / (head_dim ** 0.5)
    s = jnp.einsum('hqe,hke->hqk', qh, kh,
                   preferred_element_type=jnp.float32) * scale
    s = s + bias[None]                                   # broadcast over heads

    # TODO(synk): for production Tk, tile over Tk with an online (flash-style)
    # softmax instead of materializing the full (h, Tq, Tk) score slab.
    s = s - jnp.max(s, axis=-1, keepdims=True)           # stable softmax (f32)
    p = jnp.exp(s)
    p = p * pl.reciprocal(jnp.sum(p, axis=-1, keepdims=True), approx=True)

    oh = jnp.einsum('hqk,hke->hqe', p.astype(MATMUL_DTYPE), vh,
                    preferred_element_type=jnp.float32)  # (h, Tq, hd)
    # Merge heads back to (Tq, D) and apply the original (D, D) out-projection
    # in a single lane-dense MXU call.
    o2 = oh.transpose(1, 0, 2).reshape(tq, nhead * head_dim)
    return jnp.dot(o2.astype(MATMUL_DTYPE), wo,
                   preferred_element_type=jnp.float32) + bo


def _add_layernorm(x, res, g, b):
    y = x + res
    mean = jnp.mean(y, axis=-1, keepdims=True)
    var = jnp.mean(y * y, axis=-1, keepdims=True) - mean * mean
    var = jnp.maximum(var, 0.0)          # guard E[y^2]-E[y]^2 cancellation
    return (y - mean) * jax.lax.rsqrt(var + LN_EPS) * g + b


# ------------------------------- fused kernel --------------------------------


def _decoder_layer_kernel(
        tgt_ref, mem_ref, tgt_mask_ref, tgt_kp_ref, mem_kp_ref,
        sa_wqkv, sa_bqkv, sa_wo, sa_bo,
        ca_wq, ca_bq, ca_wkv, ca_bkv, ca_wo, ca_bo,
        ln1_g, ln1_b, ln2_g, ln2_b, ln3_g, ln3_b,
        w1, b1, w2, b2,
        o_ref, *, nhead, head_dim):
    d = nhead * head_dim
    tgt = tgt_ref[0]                                     # (T, D) f32
    mem = mem_ref[0]                                     # (S, D) f32

    # ---- self-attention: fused QKV (T,D)x(D,3D); causal + key-padding bias ----
    qkv = jnp.dot(tgt.astype(MATMUL_DTYPE), sa_wqkv[...],
                  preferred_element_type=jnp.float32) + sa_bqkv[...]
    self_bias = tgt_mask_ref[...] + tgt_kp_ref[0]        # (T,T) + (1,T) -> (T,T)
    a = _mha_core(qkv[:, :d], qkv[:, d:2 * d], qkv[:, 2 * d:], self_bias,
                  sa_wo[...], sa_bo[...], nhead=nhead, head_dim=head_dim)
    x = _add_layernorm(a, tgt, ln1_g[...], ln1_b[...])   # dropout1 = identity

    # ---- cross-attention: Q from x, fused K|V (S,D)x(D,2D) from memory ----
    q = jnp.dot(x.astype(MATMUL_DTYPE), ca_wq[...],
                preferred_element_type=jnp.float32) + ca_bq[...]
    kv = jnp.dot(mem.astype(MATMUL_DTYPE), ca_wkv[...],
                 preferred_element_type=jnp.float32) + ca_bkv[...]
    cross_bias = mem_kp_ref[0]                           # (1, S), bcast over rows
    a = _mha_core(q, kv[:, :d], kv[:, d:], cross_bias,
                  ca_wo[...], ca_bo[...], nhead=nhead, head_dim=head_dim)
    x = _add_layernorm(a, x, ln2_g[...], ln2_b[...])     # dropout2 = identity

    # ---- feed-forward: Linear -> ReLU -> Linear ----
    # TODO(synk): for large dff on v7x (64 MiB VMEM), tile over F with an extra
    # "arbitrary" grid axis instead of keeping w1/w2 fully resident.
    h = jnp.dot(x.astype(MATMUL_DTYPE), w1[...],
                preferred_element_type=jnp.float32) + b1[...]
    h = jnp.maximum(h, 0.0)                              # ReLU; dropout3 = identity
    f = jnp.dot(h.astype(MATMUL_DTYPE), w2[...],
                preferred_element_type=jnp.float32) + b2[...]
    x = _add_layernorm(f, x, ln3_g[...], ln3_b[...])     # dropout4 = identity

    o_ref[0] = x


# --------------------------------- wrapper -----------------------------------


def decoder_layer_forward(params, tgt, memory, tgt_mask,
                          memory_key_padding_mask, tgt_key_padding_mask, *,
                          nhead, single_buffer_weights=True):
    B, T, D = tgt.shape
    S = memory.shape[1]
    hd = D // nhead
    F = params["w1"].shape[1]
    wdt = MATMUL_DTYPE
    zeros_d = jnp.zeros((D,), jnp.float32)

    sa, ca = params["self_attn"], params["cross_attn"]
    # Fused weight slabs, prepared once outside the kernel (K linear has no bias).
    weight_args = [
        jnp.concatenate([sa["wq"], sa["wk"], sa["wv"]], axis=1).astype(wdt),  # (D,3D)
        jnp.concatenate([sa["bq"], zeros_d, sa["bv"]]).reshape(1, 3 * D),     # (1,3D)
        sa["wo"].astype(wdt), sa["bo"].reshape(1, D),
        ca["wq"].astype(wdt), ca["bq"].reshape(1, D),
        jnp.concatenate([ca["wk"], ca["wv"]], axis=1).astype(wdt),            # (D,2D)
        jnp.concatenate([zeros_d, ca["bv"]]).reshape(1, 2 * D),               # (1,2D)
        ca["wo"].astype(wdt), ca["bo"].reshape(1, D),
        params["ln1_g"].reshape(1, D), params["ln1_b"].reshape(1, D),
        params["ln2_g"].reshape(1, D), params["ln2_b"].reshape(1, D),
        params["ln3_g"].reshape(1, D), params["ln3_b"].reshape(1, D),
        params["w1"].astype(wdt), params["b1"].reshape(1, F),
        params["w2"].astype(wdt), params["b2"].reshape(1, D),
    ]

    def weight_spec(arr):
        # Grid-invariant full-array block; single-buffer (the index_map never
        # changes across the grid, so a 2nd pipeline buffer is wasted VMEM).
        kwargs = {"pipeline_mode": pl.Buffered(1)} if single_buffer_weights else {}
        n = arr.ndim
        return pl.BlockSpec(arr.shape, lambda b, _n=n: (0,) * _n, **kwargs)

    weight_specs = [weight_spec(a) for a in weight_args]

    tgt_kp = tgt_key_padding_mask.reshape(B, 1, T)
    mem_kp = memory_key_padding_mask.reshape(B, 1, S)

    # Scoped-VMEM budget: resident weights + double-buffered activation blocks,
    # with generous headroom for in-kernel intermediates; clamped to 64 MiB so
    # it is valid on v7x as well as v5e/v6e.
    weight_bytes = sum(int(a.size) * a.dtype.itemsize for a in weight_args)
    act_bytes = 4 * (2 * T * D + S * D + T * T + T + S) * 2
    vmem_limit = int(min(max(6 * (weight_bytes + act_bytes), 32 << 20), 64 << 20))

    kern = functools.partial(_decoder_layer_kernel, nhead=nhead, head_dim=hd)
    return pl.pallas_call(
        kern,
        out_shape=jax.ShapeDtypeStruct((B, T, D), jnp.float32),
        grid=(B,),
        in_specs=[
            pl.BlockSpec((1, T, D), lambda b: (b, 0, 0)),        # tgt
            pl.BlockSpec((1, S, D), lambda b: (b, 0, 0)),        # memory
            pl.BlockSpec((T, T), lambda b: (0, 0)),              # causal/additive mask
            pl.BlockSpec((1, 1, T), lambda b: (b, 0, 0)),        # tgt key-padding bias
            pl.BlockSpec((1, 1, S), lambda b: (b, 0, 0)),        # mem key-padding bias
        ] + weight_specs,
        out_specs=pl.BlockSpec((1, T, D), lambda b: (b, 0, 0)),
        compiler_params=pltpu.CompilerParams(
            dimension_semantics=("parallel",),
            vmem_limit_bytes=vmem_limit),
    )(tgt, memory, tgt_mask, tgt_kp, mem_kp, *weight_args)


# ------------------------------- param init ----------------------------------


def _linear(key, fan_in, fan_out, bias=True):
    kw, kb = jax.random.split(key)
    bound = 1.0 / np.sqrt(fan_in)
    w = jax.random.uniform(kw, (fan_in, fan_out), jnp.float32, -bound, bound)
    if not bias:
        return w, None
    b = jax.random.uniform(kb, (fan_out,), jnp.float32, -bound, bound)
    return w, b


def _mha_params(key, d_model):
    ks = jax.random.split(key, 4)
    wq, bq = _linear(ks[0], d_model, d_model)
    wk, _ = _linear(ks[1], d_model, d_model, bias=False)   # k_linear has bias=False
    wv, bv = _linear(ks[2], d_model, d_model)
    wo, bo = _linear(ks[3], d_model, d_model)
    return dict(wq=wq, bq=bq, wk=wk, wv=wv, bv=bv, wo=wo, bo=bo)


def init_decoder_layer_params(key, d_model, dff):
    ks = jax.random.split(key, 4)
    w1, b1 = _linear(ks[2], d_model, dff)
    w2, b2 = _linear(ks[3], dff, d_model)
    ones = jnp.ones((d_model,), jnp.float32)
    zeros = jnp.zeros((d_model,), jnp.float32)
    return dict(self_attn=_mha_params(ks[0], d_model),
                cross_attn=_mha_params(ks[1], d_model),
                ln1_g=ones, ln1_b=zeros, ln2_g=ones, ln2_b=zeros,
                ln3_g=ones, ln3_b=zeros,
                w1=w1, b1=b1, w2=w2, b2=b2)


# ---------------------------- pure-JAX reference ------------------------------


def _reference_forward(params, tgt, memory, tgt_mask, mem_kp, tgt_kp, *, nhead):
    def mha(p, q, k, v, kp_mask, causal):
        B, Tq, D = q.shape
        Tk = k.shape[1]
        hd = D // nhead
        qh = (q @ p["wq"] + p["bq"]).reshape(B, Tq, nhead, hd).transpose(0, 2, 1, 3)
        kh = (k @ p["wk"]).reshape(B, Tk, nhead, hd).transpose(0, 2, 1, 3)
        vh = (v @ p["wv"] + p["bv"]).reshape(B, Tk, nhead, hd).transpose(0, 2, 1, 3)
        s = (qh @ kh.transpose(0, 1, 3, 2)) / (hd ** 0.5)
        if kp_mask is not None:
            s = s + kp_mask[:, None, None, :]
        if causal is not None:
            s = s + causal[None, None]
        pr = jax.nn.softmax(s, axis=-1)
        o = (pr @ vh).transpose(0, 2, 1, 3).reshape(B, Tq, D)
        return o @ p["wo"] + p["bo"]

    def ln(x, g, b):
        m = x.mean(-1, keepdims=True)
        v = ((x - m) ** 2).mean(-1, keepdims=True)
        return (x - m) / jnp.sqrt(v + LN_EPS) * g + b

    x = ln(tgt + mha(params["self_attn"], tgt, tgt, tgt, tgt_kp, tgt_mask),
           params["ln1_g"], params["ln1_b"])
    x = ln(x + mha(params["cross_attn"], x, memory, memory, mem_kp, None),
           params["ln2_g"], params["ln2_b"])
    h = jnp.maximum(x @ params["w1"] + params["b1"], 0.0)
    x = ln(x + (h @ params["w2"] + params["b2"]),
           params["ln3_g"], params["ln3_b"])
    return x


# ----------------------------------- main -------------------------------------


if __name__ == "__main__":
    d_model, nhead, dff = 128, 4, 256        # lane-dense last dim (>=128)
    B, T, S = 2, 8, 16                       # batch, tgt len, memory len

    key = jax.random.PRNGKey(0)
    k_p, k_tgt, k_mem = jax.random.split(key, 3)

    params = init_decoder_layer_params(k_p, d_model, dff)
    tgt = jax.random.normal(k_tgt, (B, T, d_model), jnp.float32)
    memory = jax.random.normal(k_mem, (B, S, d_model), jnp.float32)

    NEG = -1e9  # additive "-inf" kept finite so softmax stays NaN-free
    tgt_mask = jnp.where(jnp.tril(jnp.ones((T, T), jnp.float32)) > 0, 0.0, NEG)
    mem_kp = jnp.zeros((B, S), jnp.float32).at[1, S - 3:].set(NEG)
    tgt_kp = jnp.zeros((B, T), jnp.float32).at[1, T - 2:].set(NEG)

    def run(single_buffer_weights):
        fwd = jax.jit(functools.partial(decoder_layer_forward, nhead=nhead,
                                        single_buffer_weights=single_buffer_weights))
        out = fwd(params, tgt, memory, tgt_mask, mem_kp, tgt_kp)
        return jax.block_until_ready(out)

    try:
        out = run(True)
    except Exception:
        # Graceful fallback if this JAX build rejects pl.Buffered(1) on a
        # top-level pallas_call input; default double-buffering is tiny here.
        out = run(False)

    assert out.shape == (B, T, d_model) and out.dtype == jnp.float32
    assert bool(jnp.all(jnp.isfinite(out)))

    # Cross-check against the pure-JAX f32 reference. bf16 MXU operands plus the
    # approximate softmax reciprocal are not bit-exact -> generous tolerance.
    ref = _reference_forward(params, tgt, memory, tgt_mask, mem_kp, tgt_kp,
                             nhead=nhead)
    assert float(jnp.max(jnp.abs(out - ref))) < 0.25

    print("KERNEL_OK")
</pallas_src>

<mosaic_0001>
module attributes {stable_mosaic.version = 11 : i64} {
  func.func @_decoder_layer_kernel(%arg0: i32, %arg1: memref<1x8x128xf32, #tpu.memory_space<vmem>>, %arg2: memref<1x16x128xf32, #tpu.memory_space<vmem>>, %arg3: memref<8x8xf32, #tpu.memory_space<vmem>>, %arg4: memref<1x1x8xf32, #tpu.memory_space<vmem>>, %arg5: memref<1x1x16xf32, #tpu.memory_space<vmem>>, %arg6: memref<128x384xbf16, #tpu.memory_space<vmem>>, %arg7: memref<1x384xf32, #tpu.memory_space<vmem>>, %arg8: memref<128x128xbf16, #tpu.memory_space<vmem>>, %arg9: memref<1x128xf32, #tpu.memory_space<vmem>>, %arg10: memref<128x128xbf16, #tpu.memory_space<vmem>>, %arg11: memref<1x128xf32, #tpu.memory_space<vmem>>, %arg12: memref<128x256xbf16, #tpu.memory_space<vmem>>, %arg13: memref<1x256xf32, #tpu.memory_space<vmem>>, %arg14: memref<128x128xbf16, #tpu.memory_space<vmem>>, %arg15: memref<1x128xf32, #tpu.memory_space<vmem>>, %arg16: memref<1x128xf32, #tpu.memory_space<vmem>>, %arg17: memref<1x128xf32, #tpu.memory_space<vmem>>, %arg18: memref<1x128xf32, #tpu.memory_space<vmem>>, %arg19: memref<1x128xf32, #tpu.memory_space<vmem>>, %arg20: memref<1x128xf32, #tpu.memory_space<vmem>>, %arg21: memref<1x128xf32, #tpu.memory_space<vmem>>, %arg22: memref<128x256xbf16, #tpu.memory_space<vmem>>, %arg23: memref<1x256xf32, #tpu.memory_space<vmem>>, %arg24: memref<256x128xbf16, #tpu.memory_space<vmem>>, %arg25: memref<1x128xf32, #tpu.memory_space<vmem>>, %arg26: memref<1x8x128xf32, #tpu.memory_space<vmem>>) attributes {dimension_semantics = [#tpu.dimension_semantics<parallel>], iteration_bounds = array<i64: 2>, scalar_prefetch = 0 : i64, scratch_operands = 0 : i64, tpu.core_type = #tpu.core_type<tc>, window_params = [{transform_indices = @transform_0, window_bounds = array<i64: 1, 8, 128>}, {transform_indices = @transform_1, window_bounds = array<i64: 1, 16, 128>}, {pipeline_mode = #tpu.pipeline_mode<synchronous>, transform_indices = @transform_2, window_bounds = array<i64: 8, 8>}, {transform_indices = @transform_3, window_bounds = array<i64: 1, 1, 8>}, {transform_indices = @transform_4, window_bounds = array<i64: 1, 1, 16>}, {pipeline_mode = #tpu.pipeline_mode<synchronous>, transform_indices = @transform_5, window_bounds = array<i64: 128, 384>}, {pipeline_mode = #tpu.pipeline_mode<synchronous>, transform_indices = @transform_6, window_bounds = array<i64: 1, 384>}, {pipeline_mode = #tpu.pipeline_mode<synchronous>, transform_indices = @transform_7, window_bounds = array<i64: 128, 128>}, {pipeline_mode = #tpu.pipeline_mode<synchronous>, transform_indices = @transform_8, window_bounds = array<i64: 1, 128>}, {pipeline_mode = #tpu.pipeline_mode<synchronous>, transform_indices = @transform_9, window_bounds = array<i64: 128, 128>}, {pipeline_mode = #tpu.pipeline_mode<synchronous>, transform_indices = @transform_10, window_bounds = array<i64: 1, 128>}, {pipeline_mode = #tpu.pipeline_mode<synchronous>, transform_indices = @transform_11, window_bounds = array<i64: 128, 256>}, {pipeline_mode = #tpu.pipeline_mode<synchronous>, transform_indices = @transform_12, window_bounds = array<i64: 1, 256>}, {pipeline_mode = #tpu.pipeline_mode<synchronous>, transform_indices = @transform_13, window_bounds = array<i64: 128, 128>}, {pipeline_mode = #tpu.pipeline_mode<synchronous>, transform_indices = @transform_14, window_bounds = array<i64: 1, 128>}, {pipeline_mode = #tpu.pipeline_mode<synchronous>, transform_indices = @transform_15, window_bounds = array<i64: 1, 128>}, {pipeline_mode = #tpu.pipeline_mode<synchronous>, transform_indices = @transform_16, window_bounds = array<i64: 1, 128>}, {pipeline_mode = #tpu.pipeline_mode<synchronous>, transform_indices = @transform_17, window_bounds = array<i64: 1, 128>}, {pipeline_mode = #tpu.pipeline_mode<synchronous>, transform_indices = @transform_18, window_bounds = array<i64: 1, 128>}, {pipeline_mode = #tpu.pipeline_mode<synchronous>, transform_indices = @transform_19, window_bounds = array<i64: 1, 128>}, {pipeline_mode = #tpu.pipeline_mode<synchronous>, transform_indices = @transform_20, window_bounds = array<i64: 1, 128>}, {pipeline_mode = #tpu.pipeline_mode<synchronous>, transform_indices = @transform_21, window_bounds = array<i64: 128, 256>}, {pipeline_mode = #tpu.pipeline_mode<synchronous>, transform_indices = @transform_22, window_bounds = array<i64: 1, 256>}, {pipeline_mode = #tpu.pipeline_mode<synchronous>, transform_indices = @transform_23, window_bounds = array<i64: 256, 128>}, {pipeline_mode = #tpu.pipeline_mode<synchronous>, transform_indices = @transform_24, window_bounds = array<i64: 1, 128>}, {transform_indices = @transform_25, window_bounds = array<i64: 1, 8, 128>}]} {
    %c0 = arith.constant 0 : index
    %c0_0 = arith.constant 0 : index
    %c0_1 = arith.constant 0 : index
    %0 = vector.load %arg1[%c0, %c0_0, %c0_1] : memref<1x8x128xf32, #tpu.memory_space<vmem>>, vector<1x8x128xf32>
    %1 = vector.shape_cast %0 : vector<1x8x128xf32> to vector<8x128xf32>
    %c0_2 = arith.constant 0 : index
    %c0_3 = arith.constant 0 : index
    %c0_4 = arith.constant 0 : index
    %2 = vector.load %arg2[%c0_2, %c0_3, %c0_4] : memref<1x16x128xf32, #tpu.memory_space<vmem>>, vector<1x16x128xf32>
    %3 = vector.shape_cast %2 : vector<1x16x128xf32> to vector<16x128xf32>
    %4 = arith.truncf %1 : vector<8x128xf32> to vector<8x128xbf16>
    %c0_5 = arith.constant 0 : index
    %c0_6 = arith.constant 0 : index
    %5 = vector.load %arg6[%c0_5, %c0_6] : memref<128x384xbf16, #tpu.memory_space<vmem>>, vector<128x384xbf16>
    %cst = arith.constant dense<0.000000e+00> : vector<8x384xf32>
    %6 = tpu.matmul %4, %5, %cst {dimension_numbers = #tpu.dot_dimension_numbers<[1], [0], [0], [1], [0, 0, 1, 1], [], []>} : vector<8x128xbf16>, vector<128x384xbf16>, vector<8x384xf32> -> vector<8x384xf32>
    %c0_7 = arith.constant 0 : index
    %c0_8 = arith.constant 0 : index
    %7 = vector.load %arg7[%c0_7, %c0_8] : memref<1x384xf32, #tpu.memory_space<vmem>>, vector<1x384xf32>
    %8 = vector.broadcast %7 : vector<1x384xf32> to vector<8x384xf32>
    %9 = arith.addf %6, %8 : vector<8x384xf32>
    %c0_9 = arith.constant 0 : index
    %c0_10 = arith.constant 0 : index
    %10 = vector.load %arg3[%c0_9, %c0_10] : memref<8x8xf32, #tpu.memory_space<vmem>>, vector<8x8xf32>
    %c0_11 = arith.constant 0 : index
    %c0_12 = arith.constant 0 : index
    %c0_13 = arith.constant 0 : index
    %11 = vector.load %arg4[%c0_11, %c0_12, %c0_13] : memref<1x1x8xf32, #tpu.memory_space<vmem>>, vector<1x1x8xf32>
    %12 = vector.shape_cast %11 : vector<1x1x8xf32> to vector<1x8xf32>
    %13 = vector.broadcast %12 : vector<1x8xf32> to vector<8x8xf32>
    %14 = arith.addf %10, %13 : vector<8x8xf32>
    %15 = vector.extract_strided_slice %9 {offsets = [0, 0], sizes = [8, 128], strides = [1, 1]} : vector<8x384xf32> to vector<8x128xf32>
    %16 = vector.extract_strided_slice %9 {offsets = [0, 128], sizes = [8, 128], strides = [1, 1]} : vector<8x384xf32> to vector<8x128xf32>
    %17 = vector.extract_strided_slice %9 {offsets = [0, 256], sizes = [8, 128], strides = [1, 1]} : vector<8x384xf32> to vector<8x128xf32>
    %c0_14 = arith.constant 0 : index
    %c0_15 = arith.constant 0 : index
    %18 = vector.load %arg8[%c0_14, %c0_15] : memref<128x128xbf16, #tpu.memory_space<vmem>>, vector<128x128xbf16>
    %c0_16 = arith.constant 0 : index
    %c0_17 = arith.constant 0 : index
    %19 = vector.load %arg9[%c0_16, %c0_17] : memref<1x128xf32, #tpu.memory_space<vmem>>, vector<1x128xf32>
    %20 = vector.shape_cast %15 : vector<8x128xf32> to vector<8x4x32xf32>
    %21 = tpu.transpose %20, [1, 0, 2] : vector<8x4x32xf32> -> vector<4x8x32xf32>
    %22 = arith.truncf %21 : vector<4x8x32xf32> to vector<4x8x32xbf16>
    %23 = vector.shape_cast %16 : vector<8x128xf32> to vector<8x4x32xf32>
    %24 = tpu.transpose %23, [1, 0, 2] : vector<8x4x32xf32> -> vector<4x8x32xf32>
    %25 = arith.truncf %24 : vector<4x8x32xf32> to vector<4x8x32xbf16>
    %26 = vector.shape_cast %17 : vector<8x128xf32> to vector<8x4x32xf32>
    %27 = tpu.transpose %26, [1, 0, 2] : vector<8x4x32xf32> -> vector<4x8x32xf32>
    %28 = arith.truncf %27 : vector<4x8x32xf32> to vector<4x8x32xbf16>
    "tpu.trace_start"() <{level = 10 : i32, message = "hqe,hke->hqk"}> : () -> ()
    %cst_18 = arith.constant dense<0.000000e+00> : vector<4x8x8xf32>
    %29 = tpu.matmul %22, %25, %cst_18 {dimension_numbers = #tpu.dot_dimension_numbers<[2], [2], [1], [1], [0, 0, 0, 1, 1, 1], [0], [0]>} : vector<4x8x32xbf16>, vector<4x8x32xbf16>, vector<4x8x8xf32> -> vector<4x8x8xf32>
    "tpu.trace_stop"() : () -> ()
    %cst_19 = arith.constant 0.176776692 : f32
    %30 = vector.broadcast %cst_19 : f32 to vector<4x8x8xf32>
    %31 = arith.mulf %29, %30 : vector<4x8x8xf32>
    %32 = vector.shape_cast %14 : vector<8x8xf32> to vector<1x8x8xf32>
    %33 = vector.broadcast %32 : vector<1x8x8xf32> to vector<4x8x8xf32>
    %34 = arith.addf %31, %33 : vector<4x8x8xf32>
    %cst_20 = arith.constant dense<0xFF800000> : vector<4x8xf32>
    %35 = vector.multi_reduction <maximumf>, %34, %cst_20 [2] : vector<4x8x8xf32> to vector<4x8xf32>
    %36 = vector.shape_cast %35 : vector<4x8xf32> to vector<4x8x1xf32>
    %37 = vector.broadcast %36 : vector<4x8x1xf32> to vector<4x8x8xf32>
    %38 = arith.subf %34, %37 : vector<4x8x8xf32>
    %39 = math.exp %38 : vector<4x8x8xf32>
    %cst_21 = arith.constant dense<0.000000e+00> : vector<4x8xf32>
    %40 = vector.multi_reduction <add>, %39, %cst_21 [2] : vector<4x8x8xf32> to vector<4x8xf32>
    %41 = vector.shape_cast %40 : vector<4x8xf32> to vector<4x8x1xf32>
    %42 = tpu.reciprocal %41 {approx = true} : vector<4x8x1xf32> -> vector<4x8x1xf32>
    %43 = vector.broadcast %42 : vector<4x8x1xf32> to vector<4x8x8xf32>
    %44 = arith.mulf %39, %43 : vector<4x8x8xf32>
    %45 = arith.truncf %44 : vector<4x8x8xf32> to vector<4x8x8xbf16>
    "tpu.trace_start"() <{level = 10 : i32, message = "hqk,hke->hqe"}> : () -> ()
    %cst_22 = arith.constant dense<0.000000e+00> : vector<4x8x32xf32>
    %46 = tpu.matmul %45, %28, %cst_22 {dimension_numbers = #tpu.dot_dimension_numbers<[2], [1], [1], [2], [0, 0, 0, 1, 1, 2], [0], [0]>} : vector<4x8x8xbf16>, vector<4x8x32xbf16>, vector<4x8x32xf32> -> vector<4x8x32xf32>
    "tpu.trace_stop"() : () -> ()
    %47 = tpu.transpose %46, [1, 0, 2] : vector<4x8x32xf32> -> vector<8x4x32xf32>
    %48 = vector.shape_cast %47 : vector<8x4x32xf32> to vector<8x128xf32>
    %49 = arith.truncf %48 : vector<8x128xf32> to vector<8x128xbf16>
    %cst_23 = arith.constant dense<0.000000e+00> : vector<8x128xf32>
    %50 = tpu.matmul %49, %18, %cst_23 {dimension_numbers = #tpu.dot_dimension_numbers<[1], [0], [0], [1], [0, 0, 1, 1], [], []>} : vector<8x128xbf16>, vector<128x128xbf16>, vector<8x128xf32> -> vector<8x128xf32>
    %51 = vector.broadcast %19 : vector<1x128xf32> to vector<8x128xf32>
    %52 = arith.addf %50, %51 : vector<8x128xf32>
    %c0_24 = arith.constant 0 : index
    %c0_25 = arith.constant 0 : index
    %53 = vector.load %arg16[%c0_24, %c0_25] : memref<1x128xf32, #tpu.memory_space<vmem>>, vector<1x128xf32>
    %c0_26 = arith.constant 0 : index
    %c0_27 = arith.constant 0 : index
    %54 = vector.load %arg17[%c0_26, %c0_27] : memref<1x128xf32, #tpu.memory_space<vmem>>, vector<1x128xf32>
    %55 = arith.addf %52, %1 : vector<8x128xf32>
    %cst_28 = arith.constant dense<0.000000e+00> : vector<8xf32>
    %56 = vector.multi_reduction <add>, %55, %cst_28 [1] : vector<8x128xf32> to vector<8xf32>
    %57 = vector.shape_cast %56 : vector<8xf32> to vector<8x1xf32>
    %cst_29 = arith.constant 1.280000e+02 : f32
    %58 = vector.broadcast %cst_29 : f32 to vector<8x1xf32>
    %59 = arith.divf %57, %58 : vector<8x1xf32>
    %60 = arith.mulf %55, %55 : vector<8x128xf32>
    %cst_30 = arith.constant dense<0.000000e+00> : vector<8xf32>
    %61 = vector.multi_reduction <add>, %60, %cst_30 [1] : vector<8x128xf32> to vector<8xf32>
    %62 = vector.shape_cast %61 : vector<8xf32> to vector<8x1xf32>
    %cst_31 = arith.constant 1.280000e+02 : f32
    %63 = vector.broadcast %cst_31 : f32 to vector<8x1xf32>
    %64 = arith.divf %62, %63 : vector<8x1xf32>
    %65 = arith.mulf %59, %59 : vector<8x1xf32>
    %66 = arith.subf %64, %65 : vector<8x1xf32>
    %cst_32 = arith.constant 0.000000e+00 : f32
    %67 = vector.broadcast %cst_32 : f32 to vector<8x1xf32>
    %68 = arith.maximumf %66, %67 : vector<8x1xf32>
    %69 = vector.broadcast %59 : vector<8x1xf32> to vector<8x128xf32>
    %70 = arith.subf %55, %69 : vector<8x128xf32>
    %cst_33 = arith.constant 9.99999974E-6 : f32
    %71 = vector.broadcast %cst_33 : f32 to vector<8x1xf32>
    %72 = arith.addf %68, %71 : vector<8x1xf32>
    %73 = math.rsqrt %72 : vector<8x1xf32>
    %74 = vector.broadcast %73 : vector<8x1xf32> to vector<8x128xf32>
    %75 = arith.mulf %70, %74 : vector<8x128xf32>
    %76 = vector.broadcast %53 : vector<1x128xf32> to vector<8x128xf32>
    %77 = arith.mulf %75, %76 : vector<8x128xf32>
    %78 = vector.broadcast %54 : vector<1x128xf32> to vector<8x128xf32>
    %79 = arith.addf %77, %78 : vector<8x128xf32>
    %80 = arith.truncf %79 : vector<8x128xf32> to vector<8x128xbf16>
    %c0_34 = arith.constant 0 : index
    %c0_35 = arith.constant 0 : index
    %81 = vector.load %arg10[%c0_34, %c0_35] : memref<128x128xbf16, #tpu.memory_space<vmem>>, vector<128x128xbf16>
    %cst_36 = arith.constant dense<0.000000e+00> : vector<8x128xf32>
    %82 = tpu.matmul %80, %81, %cst_36 {dimension_numbers = #tpu.dot_dimension_numbers<[1], [0], [0], [1], [0, 0, 1, 1], [], []>} : vector<8x128xbf16>, vector<128x128xbf16>, vector<8x128xf32> -> vector<8x128xf32>
    %c0_37 = arith.constant 0 : index
    %c0_38 = arith.constant 0 : index
    %83 = vector.load %arg11[%c0_37, %c0_38] : memref<1x128xf32, #tpu.memory_space<vmem>>, vector<1x128xf32>
    %84 = vector.broadcast %83 : vector<1x128xf32> to vector<8x128xf32>
    %85 = arith.addf %82, %84 : vector<8x128xf32>
    %86 = arith.truncf %3 : vector<16x128xf32> to vector<16x128xbf16>
    %c0_39 = arith.constant 0 : index
    %c0_40 = arith.constant 0 : index
    %87 = vector.load %arg12[%c0_39, %c0_40] : memref<128x256xbf16, #tpu.memory_space<vmem>>, vector<128x256xbf16>
    %cst_41 = arith.constant dense<0.000000e+00> : vector<16x256xf32>
    %88 = tpu.matmul %86, %87, %cst_41 {dimension_numbers = #tpu.dot_dimension_numbers<[1], [0], [0], [1], [0, 0, 1, 1], [], []>} : vector<16x128xbf16>, vector<128x256xbf16>, vector<16x256xf32> -> vector<16x256xf32>
    %c0_42 = arith.constant 0 : index
    %c0_43 = arith.constant 0 : index
    %89 = vector.load %arg13[%c0_42, %c0_43] : memref<1x256xf32, #tpu.memory_space<vmem>>, vector<1x256xf32>
    %90 = vector.broadcast %89 : vector<1x256xf32> to vector<16x256xf32>
    %91 = arith.addf %88, %90 : vector<16x256xf32>
    %c0_44 = arith.constant 0 : index
    %c0_45 = arith.constant 0 : index
    %c0_46 = arith.constant 0 : index
    %92 = vector.load %arg5[%c0_44, %c0_45, %c0_46] : memref<1x1x16xf32, #tpu.memory_space<vmem>>, vector<1x1x16xf32>
    %93 = vector.shape_cast %92 : vector<1x1x16xf32> to vector<1x16xf32>
    %94 = vector.extract_strided_slice %91 {offsets = [0, 0], sizes = [16, 128], strides = [1, 1]} : vector<16x256xf32> to vector<16x128xf32>
    %95 = vector.extract_strided_slice %91 {offsets = [0, 128], sizes = [16, 128], strides = [1, 1]} : vector<16x256xf32> to vector<16x128xf32>
    %c0_47 = arith.constant 0 : index
    %c0_48 = arith.constant 0 : index
    %96 = vector.load %arg14[%c0_47, %c0_48] : memref<128x128xbf16, #tpu.memory_space<vmem>>, vector<128x128xbf16>
    %c0_49 = arith.constant 0 : index
    %c0_50 = arith.constant 0 : index
    %97 = vector.load %arg15[%c0_49, %c0_50] : memref<1x128xf32, #tpu.memory_space<vmem>>, vector<1x128xf32>
    %98 = vector.shape_cast %85 : vector<8x128xf32> to vector<8x4x32xf32>
    %99 = tpu.transpose %98, [1, 0, 2] : vector<8x4x32xf32> -> vector<4x8x32xf32>
    %100 = arith.truncf %99 : vector<4x8x32xf32> to vector<4x8x32xbf16>
    %101 = vector.shape_cast %94 : vector<16x128xf32> to vector<16x4x32xf32>
    %102 = tpu.transpose %101, [1, 0, 2] : vector<16x4x32xf32> -> vector<4x16x32xf32>
    %103 = arith.truncf %102 : vector<4x16x32xf32> to vector<4x16x32xbf16>
    %104 = vector.shape_cast %95 : vector<16x128xf32> to vector<16x4x32xf32>
    %105 = tpu.transpose %104, [1, 0, 2] : vector<16x4x32xf32> -> vector<4x16x32xf32>
    %106 = arith.truncf %105 : vector<4x16x32xf32> to vector<4x16x32xbf16>
    "tpu.trace_start"() <{level = 10 : i32, message = "hqe,hke->hqk"}> : () -> ()
    %cst_51 = arith.constant dense<0.000000e+00> : vector<4x8x16xf32>
    %107 = tpu.matmul %100, %103, %cst_51 {dimension_numbers = #tpu.dot_dimension_numbers<[2], [2], [1], [1], [0, 0, 0, 1, 1, 1], [0], [0]>} : vector<4x8x32xbf16>, vector<4x16x32xbf16>, vector<4x8x16xf32> -> vector<4x8x16xf32>
    "tpu.trace_stop"() : () -> ()
    %cst_52 = arith.constant 0.176776692 : f32
    %108 = vector.broadcast %cst_52 : f32 to vector<4x8x16xf32>
    %109 = arith.mulf %107, %108 : vector<4x8x16xf32>
    %110 = vector.shape_cast %93 : vector<1x16xf32> to vector<1x1x16xf32>
    %111 = vector.broadcast %110 : vector<1x1x16xf32> to vector<4x8x16xf32>
    %112 = arith.addf %109, %111 : vector<4x8x16xf32>
    %cst_53 = arith.constant dense<0xFF800000> : vector<4x8xf32>
    %113 = vector.multi_reduction <maximumf>, %112, %cst_53 [2] : vector<4x8x16xf32> to vector<4x8xf32>
    %114 = vector.shape_cast %113 : vector<4x8xf32> to vector<4x8x1xf32>
    %115 = vector.broadcast %114 : vector<4x8x1xf32> to vector<4x8x16xf32>
    %116 = arith.subf %112, %115 : vector<4x8x16xf32>
    %117 = math.exp %116 : vector<4x8x16xf32>
    %cst_54 = arith.constant dense<0.000000e+00> : vector<4x8xf32>
    %118 = vector.multi_reduction <add>, %117, %cst_54 [2] : vector<4x8x16xf32> to vector<4x8xf32>
    %119 = vector.shape_cast %118 : vector<4x8xf32> to vector<4x8x1xf32>
    %120 = tpu.reciprocal %119 {approx = true} : vector<4x8x1xf32> -> vector<4x8x1xf32>
    %121 = vector.broadcast %120 : vector<4x8x1xf32> to vector<4x8x16xf32>
    %122 = arith.mulf %117, %121 : vector<4x8x16xf32>
    %123 = arith.truncf %122 : vector<4x8x16xf32> to vector<4x8x16xbf16>
    "tpu.trace_start"() <{level = 10 : i32, message = "hqk,hke->hqe"}> : () -> ()
    %cst_55 = arith.constant dense<0.000000e+00> : vector<4x8x32xf32>
    %124 = tpu.matmul %123, %106, %cst_55 {dimension_numbers = #tpu.dot_dimension_numbers<[2], [1], [1], [2], [0, 0, 0, 1, 1, 2], [0], [0]>} : vector<4x8x16xbf16>, vector<4x16x32xbf16>, vector<4x8x32xf32> -> vector<4x8x32xf32>
    "tpu.trace_stop"() : () -> ()
    %125 = tpu.transpose %124, [1, 0, 2] : vector<4x8x32xf32> -> vector<8x4x32xf32>
    %126 = vector.shape_cast %125 : vector<8x4x32xf32> to vector<8x128xf32>
    %127 = arith.truncf %126 : vector<8x128xf32> to vector<8x128xbf16>
    %cst_56 = arith.constant dense<0.000000e+00> : vector<8x128xf32>
    %128 = tpu.matmul %127, %96, %cst_56 {dimension_numbers = #tpu.dot_dimension_numbers<[1], [0], [0], [1], [0, 0, 1, 1], [], []>} : vector<8x128xbf16>, vector<128x128xbf16>, vector<8x128xf32> -> vector<8x128xf32>
    %129 = vector.broadcast %97 : vector<1x128xf32> to vector<8x128xf32>
    %130 = arith.addf %128, %129 : vector<8x128xf32>
    %c0_57 = arith.constant 0 : index
    %c0_58 = arith.constant 0 : index
    %131 = vector.load %arg18[%c0_57, %c0_58] : memref<1x128xf32, #tpu.memory_space<vmem>>, vector<1x128xf32>
    %c0_59 = arith.constant 0 : index
    %c0_60 = arith.constant 0 : index
    %132 = vector.load %arg19[%c0_59, %c0_60] : memref<1x128xf32, #tpu.memory_space<vmem>>, vector<1x128xf32>
    %133 = arith.addf %130, %79 : vector<8x128xf32>
    %cst_61 = arith.constant dense<0.000000e+00> : vector<8xf32>
    %134 = vector.multi_reduction <add>, %133, %cst_61 [1] : vector<8x128xf32> to vector<8xf32>
    %135 = vector.shape_cast %134 : vector<8xf32> to vector<8x1xf32>
    %cst_62 = arith.constant 1.280000e+02 : f32
    %136 = vector.broadcast %cst_62 : f32 to vector<8x1xf32>
    %137 = arith.divf %135, %136 : vector<8x1xf32>
    %138 = arith.mulf %133, %133 : vector<8x128xf32>
    %cst_63 = arith.constant dense<0.000000e+00> : vector<8xf32>
    %139 = vector.multi_reduction <add>, %138, %cst_63 [1] : vector<8x128xf32> to vector<8xf32>
    %140 = vector.shape_cast %139 : vector<8xf32> to vector<8x1xf32>
    %cst_64 = arith.constant 1.280000e+02 : f32
    %141 = vector.broadcast %cst_64 : f32 to vector<8x1xf32>
    %142 = arith.divf %140, %141 : vector<8x1xf32>
    %143 = arith.mulf %137, %137 : vector<8x1xf32>
    %144 = arith.subf %142, %143 : vector<8x1xf32>
    %cst_65 = arith.constant 0.000000e+00 : f32
    %145 = vector.broadcast %cst_65 : f32 to vector<8x1xf32>
    %146 = arith.maximumf %144, %145 : vector<8x1xf32>
    %147 = vector.broadcast %137 : vector<8x1xf32> to vector<8x128xf32>
    %148 = arith.subf %133, %147 : vector<8x128xf32>
    %cst_66 = arith.constant 9.99999974E-6 : f32
    %149 = vector.broadcast %cst_66 : f32 to vector<8x1xf32>
    %150 = arith.addf %146, %149 : vector<8x1xf32>
    %151 = math.rsqrt %150 : vector<8x1xf32>
    %152 = vector.broadcast %151 : vector<8x1xf32> to vector<8x128xf32>
    %153 = arith.mulf %148, %152 : vector<8x128xf32>
    %154 = vector.broadcast %131 : vector<1x128xf32> to vector<8x128xf32>
    %155 = arith.mulf %153, %154 : vector<8x128xf32>
    %156 = vector.broadcast %132 : vector<1x128xf32> to vector<8x128xf32>
    %157 = arith.addf %155, %156 : vector<8x128xf32>
    %158 = arith.truncf %157 : vector<8x128xf32> to vector<8x128xbf16>
    %c0_67 = arith.constant 0 : index
    %c0_68 = arith.constant 0 : index
    %159 = vector.load %arg22[%c0_67, %c0_68] : memref<128x256xbf16, #tpu.memory_space<vmem>>, vector<128x256xbf16>
    %cst_69 = arith.constant dense<0.000000e+00> : vector<8x256xf32>
    %160 = tpu.matmul %158, %159, %cst_69 {dimension_numbers = #tpu.dot_dimension_numbers<[1], [0], [0], [1], [0, 0, 1, 1], [], []>} : vector<8x128xbf16>, vector<128x256xbf16>, vector<8x256xf32> -> vector<8x256xf32>
    %c0_70 = arith.constant 0 : index
    %c0_71 = arith.constant 0 : index
    %161 = vector.load %arg23[%c0_70, %c0_71] : memref<1x256xf32, #tpu.memory_space<vmem>>, vector<1x256xf32>
    %162 = vector.broadcast %161 : vector<1x256xf32> to vector<8x256xf32>
    %163 = arith.addf %160, %162 : vector<8x256xf32>
    %cst_72 = arith.constant 0.000000e+00 : f32
    %164 = vector.broadcast %cst_72 : f32 to vector<8x256xf32>
    %165 = arith.maximumf %163, %164 : vector<8x256xf32>
    %166 = arith.truncf %165 : vector<8x256xf32> to vector<8x256xbf16>
    %c0_73 = arith.constant 0 : index
    %c0_74 = arith.constant 0 : index
    %167 = vector.load %arg24[%c0_73, %c0_74] : memref<256x128xbf16, #tpu.memory_space<vmem>>, vector<256x128xbf16>
    %cst_75 = arith.constant dense<0.000000e+00> : vector<8x128xf32>
    %168 = tpu.matmul %166, %167, %cst_75 {dimension_numbers = #tpu.dot_dimension_numbers<[1], [0], [0], [1], [0, 0, 1, 1], [], []>} : vector<8x256xbf16>, vector<256x128xbf16>, vector<8x128xf32> -> vector<8x128xf32>
    %c0_76 = arith.constant 0 : index
    %c0_77 = arith.constant 0 : index
    %169 = vector.load %arg25[%c0_76, %c0_77] : memref<1x128xf32, #tpu.memory_space<vmem>>, vector<1x128xf32>
    %170 = vector.broadcast %169 : vector<1x128xf32> to vector<8x128xf32>
    %171 = arith.addf %168, %170 : vector<8x128xf32>
    %c0_78 = arith.constant 0 : index
    %c0_79 = arith.constant 0 : index
    %172 = vector.load %arg20[%c0_78, %c0_79] : memref<1x128xf32, #tpu.memory_space<vmem>>, vector<1x128xf32>
    %c0_80 = arith.constant 0 : index
    %c0_81 = arith.constant 0 : index
    %173 = vector.load %arg21[%c0_80, %c0_81] : memref<1x128xf32, #tpu.memory_space<vmem>>, vector<1x128xf32>
    %174 = arith.addf %171, %157 : vector<8x128xf32>
    %cst_82 = arith.constant dense<0.000000e+00> : vector<8xf32>
    %175 = vector.multi_reduction <add>, %174, %cst_82 [1] : vector<8x128xf32> to vector<8xf32>
    %176 = vector.shape_cast %175 : vector<8xf32> to vector<8x1xf32>
    %cst_83 = arith.constant 1.280000e+02 : f32
    %177 = vector.broadcast %cst_83 : f32 to vector<8x1xf32>
    %178 = arith.divf %176, %177 : vector<8x1xf32>
    %179 = arith.mulf %174, %174 : vector<8x128xf32>
    %cst_84 = arith.constant dense<0.000000e+00> : vector<8xf32>
    %180 = vector.multi_reduction <add>, %179, %cst_84 [1] : vector<8x128xf32> to vector<8xf32>
    %181 = vector.shape_cast %180 : vector<8xf32> to vector<8x1xf32>
    %cst_85 = arith.constant 1.280000e+02 : f32
    %182 = vector.broadcast %cst_85 : f32 to vector<8x1xf32>
    %183 = arith.divf %181, %182 : vector<8x1xf32>
    %184 = arith.mulf %178, %178 : vector<8x1xf32>
    %185 = arith.subf %183, %184 : vector<8x1xf32>
    %cst_86 = arith.constant 0.000000e+00 : f32
    %186 = vector.broadcast %cst_86 : f32 to vector<8x1xf32>
    %187 = arith.maximumf %185, %186 : vector<8x1xf32>
    %188 = vector.broadcast %178 : vector<8x1xf32> to vector<8x128xf32>
    %189 = arith.subf %174, %188 : vector<8x128xf32>
    %cst_87 = arith.constant 9.99999974E-6 : f32
    %190 = vector.broadcast %cst_87 : f32 to vector<8x1xf32>
    %191 = arith.addf %187, %190 : vector<8x1xf32>
    %192 = math.rsqrt %191 : vector<8x1xf32>
    %193 = vector.broadcast %192 : vector<8x1xf32> to vector<8x128xf32>
    %194 = arith.mulf %189, %193 : vector<8x128xf32>
    %195 = vector.broadcast %172 : vector<1x128xf32> to vector<8x128xf32>
    %196 = arith.mulf %194, %195 : vector<8x128xf32>
    %197 = vector.broadcast %173 : vector<1x128xf32> to vector<8x128xf32>
    %198 = arith.addf %196, %197 : vector<8x128xf32>
    %c0_88 = arith.constant 0 : index
    %c0_89 = arith.constant 0 : index
    %c0_90 = arith.constant 0 : index
    %199 = vector.load %arg26[%c0_88, %c0_89, %c0_90] : memref<1x8x128xf32, #tpu.memory_space<vmem>>, vector<1x8x128xf32>
    %200 = vector.shape_cast %199 : vector<1x8x128xf32> to vector<8x128xf32>
    %201 = vector.shape_cast %198 : vector<8x128xf32> to vector<1x8x128xf32>
    tpu.vector_store %arg26[%c0_88, %c0_89, %c0_90], %201 {strides = array<i32>} : memref<1x8x128xf32, #tpu.memory_space<vmem>>, vector<1x8x128xf32>,
    return
  }
  func.func @transform_0(%arg0: i32) -> (i32, i32, i32) {
    %c0_i32 = arith.constant 0 : i32
    %c0_i32_0 = arith.constant 0 : i32
    %c0_i32_1 = arith.constant 0 : i32
    return %arg0, %c0_i32, %c0_i32_0 : i32, i32, i32
  }
  func.func @transform_1(%arg0: i32) -> (i32, i32, i32) {
    %c0_i32 = arith.constant 0 : i32
    %c0_i32_0 = arith.constant 0 : i32
    %c0_i32_1 = arith.constant 0 : i32
    return %arg0, %c0_i32, %c0_i32_0 : i32, i32, i32
  }
  func.func @transform_2(%arg0: i32) -> (i32, i32) {
    %c0_i32 = arith.constant 0 : i32
    %c0_i32_0 = arith.constant 0 : i32
    %c0_i32_1 = arith.constant 0 : i32
    return %c0_i32, %c0_i32_0 : i32, i32
  }
  func.func @transform_3(%arg0: i32) -> (i32, i32, i32) {
    %c0_i32 = arith.constant 0 : i32
    %c0_i32_0 = arith.constant 0 : i32
    %c0_i32_1 = arith.constant 0 : i32
    return %arg0, %c0_i32, %c0_i32_0 : i32, i32, i32
  }
  func.func @transform_4(%arg0: i32) -> (i32, i32, i32) {
    %c0_i32 = arith.constant 0 : i32
    %c0_i32_0 = arith.constant 0 : i32
    %c0_i32_1 = arith.constant 0 : i32
    return %arg0, %c0_i32, %c0_i32_0 : i32, i32, i32
  }
  func.func @transform_5(%arg0: i32) -> (i32, i32) {
    %c0_i32 = arith.constant 0 : i32
    %c0_i32_0 = arith.constant 0 : i32
    %c0_i32_1 = arith.constant 0 : i32
    return %c0_i32, %c0_i32_0 : i32, i32
  }
  func.func @transform_6(%arg0: i32) -> (i32, i32) {
    %c0_i32 = arith.constant 0 : i32
    %c0_i32_0 = arith.constant 0 : i32
    %c0_i32_1 = arith.constant 0 : i32
    return %c0_i32, %c0_i32_0 : i32, i32
  }
  func.func @transform_7(%arg0: i32) -> (i32, i32) {
    %c0_i32 = arith.constant 0 : i32
    %c0_i32_0 = arith.constant 0 : i32
    %c0_i32_1 = arith.constant 0 : i32
    return %c0_i32, %c0_i32_0 : i32, i32
  }
  func.func @transform_8(%arg0: i32) -> (i32, i32) {
    %c0_i32 = arith.constant 0 : i32
    %c0_i32_0 = arith.constant 0 : i32
    %c0_i32_1 = arith.constant 0 : i32
    return %c0_i32, %c0_i32_0 : i32, i32
  }
  func.func @transform_9(%arg0: i32) -> (i32, i32) {
    %c0_i32 = arith.constant 0 : i32
    %c0_i32_0 = arith.constant 0 : i32
    %c0_i32_1 = arith.constant 0 : i32
    return %c0_i32, %c0_i32_0 : i32, i32
  }
  func.func @transform_10(%arg0: i32) -> (i32, i32) {
    %c0_i32 = arith.constant 0 : i32
    %c0_i32_0 = arith.constant 0 : i32
    %c0_i32_1 = arith.constant 0 : i32
    return %c0_i32, %c0_i32_0 : i32, i32
  }
  func.func @transform_11(%arg0: i32) -> (i32, i32) {
    %c0_i32 = arith.constant 0 : i32
    %c0_i32_0 = arith.constant 0 : i32
    %c0_i32_1 = arith.constant 0 : i32
    return %c0_i32, %c0_i32_0 : i32, i32
  }
  func.func @transform_12(%arg0: i32) -> (i32, i32) {
    %c0_i32 = arith.constant 0 : i32
    %c0_i32_0 = arith.constant 0 : i32
    %c0_i32_1 = arith.constant 0 : i32
    return %c0_i32, %c0_i32_0 : i32, i32
  }
  func.func @transform_13(%arg0: i32) -> (i32, i32) {
    %c0_i32 = arith.constant 0 : i32
    %c0_i32_0 = arith.constant 0 : i32
    %c0_i32_1 = arith.constant 0 : i32
    return %c0_i32, %c0_i32_0 : i32, i32
  }
  func.func @transform_14(%arg0: i32) -> (i32, i32) {
    %c0_i32 = arith.constant 0 : i32
    %c0_i32_0 = arith.constant 0 : i32
    %c0_i32_1 = arith.constant 0 : i32
    return %c0_i32, %c0_i32_0 : i32, i32
  }
  func.func @transform_15(%arg0: i32) -> (i32, i32) {
    %c0_i32 = arith.constant 0 : i32
    %c0_i32_0 = arith.constant 0 : i32
    %c0_i32_1 = arith.constant 0 : i32
    return %c0_i32, %c0_i32_0 : i32, i32
  }
  func.func @transform_16(%arg0: i32) -> (i32, i32) {
    %c0_i32 = arith.constant 0 : i32
    %c0_i32_0 = arith.constant 0 : i32
    %c0_i32_1 = arith.constant 0 : i32
    return %c0_i32, %c0_i32_0 : i32, i32
  }
  func.func @transform_17(%arg0: i32) -> (i32, i32) {
    %c0_i32 = arith.constant 0 : i32
    %c0_i32_0 = arith.constant 0 : i32
    %c0_i32_1 = arith.constant 0 : i32
    return %c0_i32, %c0_i32_0 : i32, i32
  }
  func.func @transform_18(%arg0: i32) -> (i32, i32) {
    %c0_i32 = arith.constant 0 : i32
    %c0_i32_0 = arith.constant 0 : i32
    %c0_i32_1 = arith.constant 0 : i32
    return %c0_i32, %c0_i32_0 : i32, i32
  }
  func.func @transform_19(%arg0: i32) -> (i32, i32) {
    %c0_i32 = arith.constant 0 : i32
    %c0_i32_0 = arith.constant 0 : i32
    %c0_i32_1 = arith.constant 0 : i32
    return %c0_i32, %c0_i32_0 : i32, i32
  }
  func.func @transform_20(%arg0: i32) -> (i32, i32) {
    %c0_i32 = arith.constant 0 : i32
    %c0_i32_0 = arith.constant 0 : i32
    %c0_i32_1 = arith.constant 0 : i32
    return %c0_i32, %c0_i32_0 : i32, i32
  }
  func.func @transform_21(%arg0: i32) -> (i32, i32) {
    %c0_i32 = arith.constant 0 : i32
    %c0_i32_0 = arith.constant 0 : i32
    %c0_i32_1 = arith.constant 0 : i32
    return %c0_i32, %c0_i32_0 : i32, i32
  }
  func.func @transform_22(%arg0: i32) -> (i32, i32) {
    %c0_i32 = arith.constant 0 : i32
    %c0_i32_0 = arith.constant 0 : i32
    %c0_i32_1 = arith.constant 0 : i32
    return %c0_i32, %c0_i32_0 : i32, i32
  }
  func.func @transform_23(%arg0: i32) -> (i32, i32) {
    %c0_i32 = arith.constant 0 : i32
    %c0_i32_0 = arith.constant 0 : i32
    %c0_i32_1 = arith.constant 0 : i32
    return %c0_i32, %c0_i32_0 : i32, i32
  }
  func.func @transform_24(%arg0: i32) -> (i32, i32) {
    %c0_i32 = arith.constant 0 : i32
    %c0_i32_0 = arith.constant 0 : i32
    %c0_i32_1 = arith.constant 0 : i32
    return %c0_i32, %c0_i32_0 : i32, i32
  }
  func.func @transform_25(%arg0: i32) -> (i32, i32, i32) {
    %c0_i32 = arith.constant 0 : i32
    %c0_i32_0 = arith.constant 0 : i32
    %c0_i32_1 = arith.constant 0 : i32
    return %arg0, %c0_i32, %c0_i32_0 : i32, i32, i32
  }
}

module attributes {stable_mosaic.version = 11 : i64} {
  func.func @_decoder_layer_kernel(%arg0: i32, %arg1: memref<1x8x128xf32, #tpu.memory_space<vmem>>, %arg2: memref<1x16x128xf32, #tpu.memory_space<vmem>>, %arg3: memref<8x8xf32, #tpu.memory_space<vmem>>, %arg4: memref<1x1x8xf32, #tpu.memory_space<vmem>>, %arg5: memref<1x1x16xf32, #tpu.memory_space<vmem>>, %arg6: memref<128x384xbf16, #tpu.memory_space<vmem>>, %arg7: memref<1x384xf32, #tpu.memory_space<vmem>>, %arg8: memref<128x128xbf16, #tpu.memory_space<vmem>>, %arg9: memref<1x128xf32, #tpu.memory_space<vmem>>, %arg10: memref<128x128xbf16, #tpu.memory_space<vmem>>, %arg11: memref<1x128xf32, #tpu.memory_space<vmem>>, %arg12: memref<128x256xbf16, #tpu.memory_space<vmem>>, %arg13: memref<1x256xf32, #tpu.memory_space<vmem>>, %arg14: memref<128x128xbf16, #tpu.memory_space<vmem>>, %arg15: memref<1x128xf32, #tpu.memory_space<vmem>>, %arg16: memref<1x128xf32, #tpu.memory_space<vmem>>, %arg17: memref<1x128xf32, #tpu.memory_space<vmem>>, %arg18: memref<1x128xf32, #tpu.memory_space<vmem>>, %arg19: memref<1x128xf32, #tpu.memory_space<vmem>>, %arg20: memref<1x128xf32, #tpu.memory_space<vmem>>, %arg21: memref<1x128xf32, #tpu.memory_space<vmem>>, %arg22: memref<128x256xbf16, #tpu.memory_space<vmem>>, %arg23: memref<1x256xf32, #tpu.memory_space<vmem>>, %arg24: memref<256x128xbf16, #tpu.memory_space<vmem>>, %arg25: memref<1x128xf32, #tpu.memory_space<vmem>>, %arg26: memref<1x8x128xf32, #tpu.memory_space<vmem>>) attributes {dimension_semantics = [#tpu.dimension_semantics<parallel>], iteration_bounds = array<i64: 2>, scalar_prefetch = 0 : i64, scratch_operands = 0 : i64, tpu.core_type = #tpu.core_type<tc>, window_params = [{transform_indices = @transform_0, window_bounds = array<i64: 1, 8, 128>}, {transform_indices = @transform_1, window_bounds = array<i64: 1, 16, 128>}, {pipeline_mode = #tpu.pipeline_mode<synchronous>, transform_indices = @transform_2, window_bounds = array<i64: 8, 8>}, {transform_indices = @transform_3, window_bounds = array<i64: 1, 1, 8>}, {transform_indices = @transform_4, window_bounds = array<i64: 1, 1, 16>}, {pipeline_mode = #tpu.pipeline_mode<synchronous>, transform_indices = @transform_5, window_bounds = array<i64: 128, 384>}, {pipeline_mode = #tpu.pipeline_mode<synchronous>, transform_indices = @transform_6, window_bounds = array<i64: 1, 384>}, {pipeline_mode = #tpu.pipeline_mode<synchronous>, transform_indices = @transform_7, window_bounds = array<i64: 128, 128>}, {pipeline_mode = #tpu.pipeline_mode<synchronous>, transform_indices = @transform_8, window_bounds = array<i64: 1, 128>}, {pipeline_mode = #tpu.pipeline_mode<synchronous>, transform_indices = @transform_9, window_bounds = array<i64: 128, 128>}, {pipeline_mode = #tpu.pipeline_mode<synchronous>, transform_indices = @transform_10, window_bounds = array<i64: 1, 128>}, {pipeline_mode = #tpu.pipeline_mode<synchronous>, transform_indices = @transform_11, window_bounds = array<i64: 128, 256>}, {pipeline_mode = #tpu.pipeline_mode<synchronous>, transform_indices = @transform_12, window_bounds = array<i64: 1, 256>}, {pipeline_mode = #tpu.pipeline_mode<synchronous>, transform_indices = @transform_13, window_bounds = array<i64: 128, 128>}, {pipeline_mode = #tpu.pipeline_mode<synchronous>, transform_indices = @transform_14, window_bounds = array<i64: 1, 128>}, {pipeline_mode = #tpu.pipeline_mode<synchronous>, transform_indices = @transform_15, window_bounds = array<i64: 1, 128>}, {pipeline_mode = #tpu.pipeline_mode<synchronous>, transform_indices = @transform_16, window_bounds = array<i64: 1, 128>}, {pipeline_mode = #tpu.pipeline_mode<synchronous>, transform_indices = @transform_17, window_bounds = array<i64: 1, 128>}, {pipeline_mode = #tpu.pipeline_mode<synchronous>, transform_indices = @transform_18, window_bounds = array<i64: 1, 128>}, {pipeline_mode = #tpu.pipeline_mode<synchronous>, transform_indices = @transform_19, window_bounds = array<i64: 1, 128>}, {pipeline_mode = #tpu.pipeline_mode<synchronous>, transform_indices = @transform_20, window_bounds = array<i64: 1, 128>}, {pipeline_mode = #tpu.pipeline_mode<synchronous>, transform_indices = @transform_21, window_bounds = array<i64: 128, 256>}, {pipeline_mode = #tpu.pipeline_mode<synchronous>, transform_indices = @transform_22, window_bounds = array<i64: 1, 256>}, {pipeline_mode = #tpu.pipeline_mode<synchronous>, transform_indices = @transform_23, window_bounds = array<i64: 256, 128>}, {pipeline_mode = #tpu.pipeline_mode<synchronous>, transform_indices = @transform_24, window_bounds = array<i64: 1, 128>}, {transform_indices = @transform_25, window_bounds = array<i64: 1, 8, 128>}]} {
    %c0 = arith.constant 0 : index
    %c0_0 = arith.constant 0 : index
    %c0_1 = arith.constant 0 : index
    %0 = vector.load %arg1[%c0, %c0_0, %c0_1] : memref<1x8x128xf32, #tpu.memory_space<vmem>>, vector<1x8x128xf32>
    %1 = vector.shape_cast %0 : vector<1x8x128xf32> to vector<8x128xf32>
    %c0_2 = arith.constant 0 : index
    %c0_3 = arith.constant 0 : index
    %c0_4 = arith.constant 0 : index
    %2 = vector.load %arg2[%c0_2, %c0_3, %c0_4] : memref<1x16x128xf32, #tpu.memory_space<vmem>>, vector<1x16x128xf32>
    %3 = vector.shape_cast %2 : vector<1x16x128xf32> to vector<16x128xf32>
    %4 = arith.truncf %1 : vector<8x128xf32> to vector<8x128xbf16>
    %c0_5 = arith.constant 0 : index
    %c0_6 = arith.constant 0 : index
    %5 = vector.load %arg6[%c0_5, %c0_6] : memref<128x384xbf16, #tpu.memory_space<vmem>>, vector<128x384xbf16>
    %cst = arith.constant dense<0.000000e+00> : vector<8x384xf32>
    %6 = tpu.matmul %4, %5, %cst {dimension_numbers = #tpu.dot_dimension_numbers<[1], [0], [0], [1], [0, 0, 1, 1], [], []>} : vector<8x128xbf16>, vector<128x384xbf16>, vector<8x384xf32> -> vector<8x384xf32>
    %c0_7 = arith.constant 0 : index
    %c0_8 = arith.constant 0 : index
    %7 = vector.load %arg7[%c0_7, %c0_8] : memref<1x384xf32, #tpu.memory_space<vmem>>, vector<1x384xf32>
    %8 = vector.broadcast %7 : vector<1x384xf32> to vector<8x384xf32>
    %9 = arith.addf %6, %8 : vector<8x384xf32>
    %c0_9 = arith.constant 0 : index
    %c0_10 = arith.constant 0 : index
    %10 = vector.load %arg3[%c0_9, %c0_10] : memref<8x8xf32, #tpu.memory_space<vmem>>, vector<8x8xf32>
    %c0_11 = arith.constant 0 : index
    %c0_12 = arith.constant 0 : index
    %c0_13 = arith.constant 0 : index
    %11 = vector.load %arg4[%c0_11, %c0_12, %c0_13] : memref<1x1x8xf32, #tpu.memory_space<vmem>>, vector<1x1x8xf32>
    %12 = vector.shape_cast %11 : vector<1x1x8xf32> to vector<1x8xf32>
    %13 = vector.broadcast %12 : vector<1x8xf32> to vector<8x8xf32>
    %14 = arith.addf %10, %13 : vector<8x8xf32>
    %15 = vector.extract_strided_slice %9 {offsets = [0, 0], sizes = [8, 128], strides = [1, 1]} : vector<8x384xf32> to vector<8x128xf32>
    %16 = vector.extract_strided_slice %9 {offsets = [0, 128], sizes = [8, 128], strides = [1, 1]} : vector<8x384xf32> to vector<8x128xf32>
    %17 = vector.extract_strided_slice %9 {offsets = [0, 256], sizes = [8, 128], strides = [1, 1]} : vector<8x384xf32> to vector<8x128xf32>
    %c0_14 = arith.constant 0 : index
    %c0_15 = arith.constant 0 : index
    %18 = vector.load %arg8[%c0_14, %c0_15] : memref<128x128xbf16, #tpu.memory_space<vmem>>, vector<128x128xbf16>
    %c0_16 = arith.constant 0 : index
    %c0_17 = arith.constant 0 : index
    %19 = vector.load %arg9[%c0_16, %c0_17] : memref<1x128xf32, #tpu.memory_space<vmem>>, vector<1x128xf32>
    %20 = vector.shape_cast %15 : vector<8x128xf32> to vector<8x4x32xf32>
    %21 = tpu.transpose %20, [1, 0, 2] : vector<8x4x32xf32> -> vector<4x8x32xf32>
    %22 = arith.truncf %21 : vector<4x8x32xf32> to vector<4x8x32xbf16>
    %23 = vector.shape_cast %16 : vector<8x128xf32> to vector<8x4x32xf32>
    %24 = tpu.transpose %23, [1, 0, 2] : vector<8x4x32xf32> -> vector<4x8x32xf32>
    %25 = arith.truncf %24 : vector<4x8x32xf32> to vector<4x8x32xbf16>
    %26 = vector.shape_cast %17 : vector<8x128xf32> to vector<8x4x32xf32>
    %27 = tpu.transpose %26, [1, 0, 2] : vector<8x4x32xf32> -> vector<4x8x32xf32>
    %28 = arith.truncf %27 : vector<4x8x32xf32> to vector<4x8x32xbf16>
    "tpu.trace_start"() <{level = 10 : i32, message = "hqe,hke->hqk"}> : () -> ()
    %cst_18 = arith.constant dense<0.000000e+00> : vector<4x8x8xf32>
    %29 = tpu.matmul %22, %25, %cst_18 {dimension_numbers = #tpu.dot_dimension_numbers<[2], [2], [1], [1], [0, 0, 0, 1, 1, 1], [0], [0]>} : vector<4x8x32xbf16>, vector<4x8x32xbf16>, vector<4x8x8xf32> -> vector<4x8x8xf32>
    "tpu.trace_stop"() : () -> ()
    %cst_19 = arith.constant 0.176776692 : f32
    %30 = vector.broadcast %cst_19 : f32 to vector<4x8x8xf32>
    %31 = arith.mulf %29, %30 : vector<4x8x8xf32>
    %32 = vector.shape_cast %14 : vector<8x8xf32> to vector<1x8x8xf32>
    %33 = vector.broadcast %32 : vector<1x8x8xf32> to vector<4x8x8xf32>
    %34 = arith.addf %31, %33 : vector<4x8x8xf32>
    %cst_20 = arith.constant dense<0xFF800000> : vector<4x8xf32>
    %35 = vector.multi_reduction <maximumf>, %34, %cst_20 [2] : vector<4x8x8xf32> to vector<4x8xf32>
    %36 = vector.shape_cast %35 : vector<4x8xf32> to vector<4x8x1xf32>
    %37 = vector.broadcast %36 : vector<4x8x1xf32> to vector<4x8x8xf32>
    %38 = arith.subf %34, %37 : vector<4x8x8xf32>
    %39 = math.exp %38 : vector<4x8x8xf32>
    %cst_21 = arith.constant dense<0.000000e+00> : vector<4x8xf32>
    %40 = vector.multi_reduction <add>, %39, %cst_21 [2] : vector<4x8x8xf32> to vector<4x8xf32>
    %41 = vector.shape_cast %40 : vector<4x8xf32> to vector<4x8x1xf32>
    %42 = tpu.reciprocal %41 {approx = true} : vector<4x8x1xf32> -> vector<4x8x1xf32>
    %43 = vector.broadcast %42 : vector<4x8x1xf32> to vector<4x8x8xf32>
    %44 = arith.mulf %39, %43 : vector<4x8x8xf32>
    %45 = arith.truncf %44 : vector<4x8x8xf32> to vector<4x8x8xbf16>
    "tpu.trace_start"() <{level = 10 : i32, message = "hqk,hke->hqe"}> : () -> ()
    %cst_22 = arith.constant dense<0.000000e+00> : vector<4x8x32xf32>
    %46 = tpu.matmul %45, %28, %cst_22 {dimension_numbers = #tpu.dot_dimension_numbers<[2], [1], [1], [2], [0, 0, 0, 1, 1, 2], [0], [0]>} : vector<4x8x8xbf16>, vector<4x8x32xbf16>, vector<4x8x32xf32> -> vector<4x8x32xf32>
    "tpu.trace_stop"() : () -> ()
    %47 = tpu.transpose %46, [1, 0, 2] : vector<4x8x32xf32> -> vector<8x4x32xf32>
    %48 = vector.shape_cast %47 : vector<8x4x32xf32> to vector<8x128xf32>
    %49 = arith.truncf %48 : vector<8x128xf32> to vector<8x128xbf16>
    %cst_23 = arith.constant dense<0.000000e+00> : vector<8x128xf32>
    %50 = tpu.matmul %49, %18, %cst_23 {dimension_numbers = #tpu.dot_dimension_numbers<[1], [0], [0], [1], [0, 0, 1, 1], [], []>} : vector<8x128xbf16>, vector<128x128xbf16>, vector<8x128xf32> -> vector<8x128xf32>
    %51 = vector.broadcast %19 : vector<1x128xf32> to vector<8x128xf32>
    %52 = arith.addf %50, %51 : vector<8x128xf32>
    %c0_24 = arith.constant 0 : index
    %c0_25 = arith.constant 0 : index
    %53 = vector.load %arg16[%c0_24, %c0_25] : memref<1x128xf32, #tpu.memory_space<vmem>>, vector<1x128xf32>
    %c0_26 = arith.constant 0 : index
    %c0_27 = arith.constant 0 : index
    %54 = vector.load %arg17[%c0_26, %c0_27] : memref<1x128xf32, #tpu.memory_space<vmem>>, vector<1x128xf32>
    %55 = arith.addf %52, %1 : vector<8x128xf32>
    %cst_28 = arith.constant dense<0.000000e+00> : vector<8xf32>
    %56 = vector.multi_reduction <add>, %55, %cst_28 [1] : vector<8x128xf32> to vector<8xf32>
    %57 = vector.shape_cast %56 : vector<8xf32> to vector<8x1xf32>
    %cst_29 = arith.constant 1.280000e+02 : f32
    %58 = vector.broadcast %cst_29 : f32 to vector<8x1xf32>
    %59 = arith.divf %57, %58 : vector<8x1xf32>
    %60 = arith.mulf %55, %55 : vector<8x128xf32>
    %cst_30 = arith.constant dense<0.000000e+00> : vector<8xf32>
    %61 = vector.multi_reduction <add>, %60, %cst_30 [1] : vector<8x128xf32> to vector<8xf32>
    %62 = vector.shape_cast %61 : vector<8xf32> to vector<8x1xf32>
    %cst_31 = arith.constant 1.280000e+02 : f32
    %63 = vector.broadcast %cst_31 : f32 to vector<8x1xf32>
    %64 = arith.divf %62, %63 : vector<8x1xf32>
    %65 = arith.mulf %59, %59 : vector<8x1xf32>
    %66 = arith.subf %64, %65 : vector<8x1xf32>
    %cst_32 = arith.constant 0.000000e+00 : f32
    %67 = vector.broadcast %cst_32 : f32 to vector<8x1xf32>
    %68 = arith.maximumf %66, %67 : vector<8x1xf32>
    %69 = vector.broadcast %59 : vector<8x1xf32> to vector<8x128xf32>
    %70 = arith.subf %55, %69 : vector<8x128xf32>
    %cst_33 = arith.constant 9.99999974E-6 : f32
    %71 = vector.broadcast %cst_33 : f32 to vector<8x1xf32>
    %72 = arith.addf %68, %71 : vector<8x1xf32>
    %73 = math.rsqrt %72 : vector<8x1xf32>
    %74 = vector.broadcast %73 : vector<8x1xf32> to vector<8x128xf32>
    %75 = arith.mulf %70, %74 : vector<8x128xf32>
    %76 = vector.broadcast %53 : vector<1x128xf32> to vector<8x128xf32>
    %77 = arith.mulf %75, %76 : vector<8x128xf32>
    %78 = vector.broadcast %54 : vector<1x128xf32> to vector<8x128xf32>
    %79 = arith.addf %77, %78 : vector<8x128xf32>
    %80 = arith.truncf %79 : vector<8x128xf32> to vector<8x128xbf16>
    %c0_34 = arith.constant 0 : index
    %c0_35 = arith.constant 0 : index
    %81 = vector.load %arg10[%c0_34, %c0_35] : memref<128x128xbf16, #tpu.memory_space<vmem>>, vector<128x128xbf16>
    %cst_36 = arith.constant dense<0.000000e+00> : vector<8x128xf32>
    %82 = tpu.matmul %80, %81, %cst_36 {dimension_numbers = #tpu.dot_dimension_numbers<[1], [0], [0], [1], [0, 0, 1, 1], [], []>} : vector<8x128xbf16>, vector<128x128xbf16>, vector<8x128xf32> -> vector<8x128xf32>
    %c0_37 = arith.constant 0 : index
    %c0_38 = arith.constant 0 : index
    %83 = vector.load %arg11[%c0_37, %c0_38] : memref<1x128xf32, #tpu.memory_space<vmem>>, vector<1x128xf32>
    %84 = vector.broadcast %83 : vector<1x128xf32> to vector<8x128xf32>
    %85 = arith.addf %82, %84 : vector<8x128xf32>
    %86 = arith.truncf %3 : vector<16x128xf32> to vector<16x128xbf16>
    %c0_39 = arith.constant 0 : index
    %c0_40 = arith.constant 0 : index
    %87 = vector.load %arg12[%c0_39, %c0_40] : memref<128x256xbf16, #tpu.memory_space<vmem>>, vector<128x256xbf16>
    %cst_41 = arith.constant dense<0.000000e+00> : vector<16x256xf32>
    %88 = tpu.matmul %86, %87, %cst_41 {dimension_numbers = #tpu.dot_dimension_numbers<[1], [0], [0], [1], [0, 0, 1, 1], [], []>} : vector<16x128xbf16>, vector<128x256xbf16>, vector<16x256xf32> -> vector<16x256xf32>
    %c0_42 = arith.constant 0 : index
    %c0_43 = arith.constant 0 : index
    %89 = vector.load %arg13[%c0_42, %c0_43] : memref<1x256xf32, #tpu.memory_space<vmem>>, vector<1x256xf32>
    %90 = vector.broadcast %89 : vector<1x256xf32> to vector<16x256xf32>
    %91 = arith.addf %88, %90 : vector<16x256xf32>
    %c0_44 = arith.constant 0 : index
    %c0_45 = arith.constant 0 : index
    %c0_46 = arith.constant 0 : index
    %92 = vector.load %arg5[%c0_44, %c0_45, %c0_46] : memref<1x1x16xf32, #tpu.memory_space<vmem>>, vector<1x1x16xf32>
    %93 = vector.shape_cast %92 : vector<1x1x16xf32> to vector<1x16xf32>
    %94 = vector.extract_strided_slice %91 {offsets = [0, 0], sizes = [16, 128], strides = [1, 1]} : vector<16x256xf32> to vector<16x128xf32>
    %95 = vector.extract_strided_slice %91 {offsets = [0, 128], sizes = [16, 128], strides = [1, 1]} : vector<16x256xf32> to vector<16x128xf32>
    %c0_47 = arith.constant 0 : index
    %c0_48 = arith.constant 0 : index
    %96 = vector.load %arg14[%c0_47, %c0_48] : memref<128x128xbf16, #tpu.memory_space<vmem>>, vector<128x128xbf16>
    %c0_49 = arith.constant 0 : index
    %c0_50 = arith.constant 0 : index
    %97 = vector.load %arg15[%c0_49, %c0_50] : memref<1x128xf32, #tpu.memory_space<vmem>>, vector<1x128xf32>
    %98 = vector.shape_cast %85 : vector<8x128xf32> to vector<8x4x32xf32>
    %99 = tpu.transpose %98, [1, 0, 2] : vector<8x4x32xf32> -> vector<4x8x32xf32>
    %100 = arith.truncf %99 : vector<4x8x32xf32> to vector<4x8x32xbf16>
    %101 = vector.shape_cast %94 : vector<16x128xf32> to vector<16x4x32xf32>
    %102 = tpu.transpose %101, [1, 0, 2] : vector<16x4x32xf32> -> vector<4x16x32xf32>
    %103 = arith.truncf %102 : vector<4x16x32xf32> to vector<4x16x32xbf16>
    %104 = vector.shape_cast %95 : vector<16x128xf32> to vector<16x4x32xf32>
    %105 = tpu.transpose %104, [1, 0, 2] : vector<16x4x32xf32> -> vector<4x16x32xf32>
    %106 = arith.truncf %105 : vector<4x16x32xf32> to vector<4x16x32xbf16>
    "tpu.trace_start"() <{level = 10 : i32, message = "hqe,hke->hqk"}> : () -> ()
    %cst_51 = arith.constant dense<0.000000e+00> : vector<4x8x16xf32>
    %107 = tpu.matmul %100, %103, %cst_51 {dimension_numbers = #tpu.dot_dimension_numbers<[2], [2], [1], [1], [0, 0, 0, 1, 1, 1], [0], [0]>} : vector<4x8x32xbf16>, vector<4x16x32xbf16>, vector<4x8x16xf32> -> vector<4x8x16xf32>
    "tpu.trace_stop"() : () -> ()
    %cst_52 = arith.constant 0.176776692 : f32
    %108 = vector.broadcast %cst_52 : f32 to vector<4x8x16xf32>
    %109 = arith.mulf %107, %108 : vector<4x8x16xf32>
    %110 = vector.shape_cast %93 : vector<1x16xf32> to vector<1x1x16xf32>
    %111 = vector.broadcast %110 : vector<1x1x16xf32> to vector<4x8x16xf32>
    %112 = arith.addf %109, %111 : vector<4x8x16xf32>
    %cst_53 = arith.constant dense<0xFF800000> : vector<4x8xf32>
    %113 = vector.multi_reduction <maximumf>, %112, %cst_53 [2] : vector<4x8x16xf32> to vector<4x8xf32>
    %114 = vector.shape_cast %113 : vector<4x8xf32> to vector<4x8x1xf32>
    %115 = vector.broadcast %114 : vector<4x8x1xf32> to vector<4x8x16xf32>
    %116 = arith.subf %112, %115 : vector<4x8x16xf32>
    %117 = math.exp %116 : vector<4x8x16xf32>
    %cst_54 = arith.constant dense<0.000000e+00> : vector<4x8xf32>
    %118 = vector.multi_reduction <add>, %117, %cst_54 [2] : vector<4x8x16xf32> to vector<4x8xf32>
    %119 = vector.shape_cast %118 : vector<4x8xf32> to vector<4x8x1xf32>
    %120 = tpu.reciprocal %119 {approx = true} : vector<4x8x1xf32> -> vector<4x8x1xf32>
    %121 = vector.broadcast %120 : vector<4x8x1xf32> to vector<4x8x16xf32>
    %122 = arith.mulf %117, %121 : vector<4x8x16xf32>
    %123 = arith.truncf %122 : vector<4x8x16xf32> to vector<4x8x16xbf16>
    "tpu.trace_start"() <{level = 10 : i32, message = "hqk,hke->hqe"}> : () -> ()
    %cst_55 = arith.constant dense<0.000000e+00> : vector<4x8x32xf32>
    %124 = tpu.matmul %123, %106, %cst_55 {dimension_numbers = #tpu.dot_dimension_numbers<[2], [1], [1], [2], [0, 0, 0, 1, 1, 2], [0], [0]>} : vector<4x8x16xbf16>, vector<4x16x32xbf16>, vector<4x8x32xf32> -> vector<4x8x32xf32>
    "tpu.trace_stop"() : () -> ()
    %125 = tpu.transpose %124, [1, 0, 2] : vector<4x8x32xf32> -> vector<8x4x32xf32>
    %126 = vector.shape_cast %125 : vector<8x4x32xf32> to vector<8x128xf32>
    %127 = arith.truncf %126 : vector<8x128xf32> to vector<8x128xbf16>
    %cst_56 = arith.constant dense<0.000000e+00> : vector<8x128xf32>
    %128 = tpu.matmul %127, %96, %cst_56 {dimension_numbers = #tpu.dot_dimension_numbers<[1], [0], [0], [1], [0, 0, 1, 1], [], []>} : vector<8x128xbf16>, vector<128x128xbf16>, vector<8x128xf32> -> vector<8x128xf32>
    %129 = vector.broadcast %97 : vector<1x128xf32> to vector<8x128xf32>
    %130 = arith.addf %128, %129 : vector<8x128xf32>
    %c0_57 = arith.constant 0 : index
    %c0_58 = arith.constant 0 : index
    %131 = vector.load %arg18[%c0_57, %c0_58] : memref<1x128xf32, #tpu.memory_space<vmem>>, vector<1x128xf32>
    %c0_59 = arith.constant 0 : index
    %c0_60 = arith.constant 0 : index
    %132 = vector.load %arg19[%c0_59, %c0_60] : memref<1x128xf32, #tpu.memory_space<vmem>>, vector<1x128xf32>
    %133 = arith.addf %130, %79 : vector<8x128xf32>
    %cst_61 = arith.constant dense<0.000000e+00> : vector<8xf32>
    %134 = vector.multi_reduction <add>, %133, %cst_61 [1] : vector<8x128xf32> to vector<8xf32>
    %135 = vector.shape_cast %134 : vector<8xf32> to vector<8x1xf32>
    %cst_62 = arith.constant 1.280000e+02 : f32
    %136 = vector.broadcast %cst_62 : f32 to vector<8x1xf32>
    %137 = arith.divf %135, %136 : vector<8x1xf32>
    %138 = arith.mulf %133, %133 : vector<8x128xf32>
    %cst_63 = arith.constant dense<0.000000e+00> : vector<8xf32>
    %139 = vector.multi_reduction <add>, %138, %cst_63 [1] : vector<8x128xf32> to vector<8xf32>
    %140 = vector.shape_cast %139 : vector<8xf32> to vector<8x1xf32>
    %cst_64 = arith.constant 1.280000e+02 : f32
    %141 = vector.broadcast %cst_64 : f32 to vector<8x1xf32>
    %142 = arith.divf %140, %141 : vector<8x1xf32>
    %143 = arith.mulf %137, %137 : vector<8x1xf32>
    %144 = arith.subf %142, %143 : vector<8x1xf32>
    %cst_65 = arith.constant 0.000000e+00 : f32
    %145 = vector.broadcast %cst_65 : f32 to vector<8x1xf32>
    %146 = arith.maximumf %144, %145 : vector<8x1xf32>
    %147 = vector.broadcast %137 : vector<8x1xf32> to vector<8x128xf32>
    %148 = arith.subf %133, %147 : vector<8x128xf32>
    %cst_66 = arith.constant 9.99999974E-6 : f32
    %149 = vector.broadcast %cst_66 : f32 to vector<8x1xf32>
    %150 = arith.addf %146, %149 : vector<8x1xf32>
    %151 = math.rsqrt %150 : vector<8x1xf32>
    %152 = vector.broadcast %151 : vector<8x1xf32> to vector<8x128xf32>
    %153 = arith.mulf %148, %152 : vector<8x128xf32>
    %154 = vector.broadcast %131 : vector<1x128xf32> to vector<8x128xf32>
    %155 = arith.mulf %153, %154 : vector<8x128xf32>
    %156 = vector.broadcast %132 : vector<1x128xf32> to vector<8x128xf32>
    %157 = arith.addf %155, %156 : vector<8x128xf32>
    %158 = arith.truncf %157 : vector<8x128xf32> to vector<8x128xbf16>
    %c0_67 = arith.constant 0 : index
    %c0_68 = arith.constant 0 : index
    %159 = vector.load %arg22[%c0_67, %c0_68] : memref<128x256xbf16, #tpu.memory_space<vmem>>, vector<128x256xbf16>
    %cst_69 = arith.constant dense<0.000000e+00> : vector<8x256xf32>
    %160 = tpu.matmul %158, %159, %cst_69 {dimension_numbers = #tpu.dot_dimension_numbers<[1], [0], [0], [1], [0, 0, 1, 1], [], []>} : vector<8x128xbf16>, vector<128x256xbf16>, vector<8x256xf32> -> vector<8x256xf32>
    %c0_70 = arith.constant 0 : index
    %c0_71 = arith.constant 0 : index
    %161 = vector.load %arg23[%c0_70, %c0_71] : memref<1x256xf32, #tpu.memory_space<vmem>>, vector<1x256xf32>
    %162 = vector.broadcast %161 : vector<1x256xf32> to vector<8x256xf32>
    %163 = arith.addf %160, %162 : vector<8x256xf32>
    %cst_72 = arith.constant 0.000000e+00 : f32
    %164 = vector.broadcast %cst_72 : f32 to vector<8x256xf32>
    %165 = arith.maximumf %163, %164 : vector<8x256xf32>
    %166 = arith.truncf %165 : vector<8x256xf32> to vector<8x256xbf16>
    %c0_73 = arith.constant 0 : index
    %c0_74 = arith.constant 0 : index
    %167 = vector.load %arg24[%c0_73, %c0_74] : memref<256x128xbf16, #tpu.memory_space<vmem>>, vector<256x128xbf16>
    %cst_75 = arith.constant dense<0.000000e+00> : vector<8x128xf32>
    %168 = tpu.matmul %166, %167, %cst_75 {dimension_numbers = #tpu.dot_dimension_numbers<[1], [0], [0], [1], [0, 0, 1, 1], [], []>} : vector<8x256xbf16>, vector<256x128xbf16>, vector<8x128xf32> -> vector<8x128xf32>
    %c0_76 = arith.constant 0 : index
    %c0_77 = arith.constant 0 : index
    %169 = vector.load %arg25[%c0_76, %c0_77] : memref<1x128xf32, #tpu.memory_space<vmem>>, vector<1x128xf32>
    %170 = vector.broadcast %169 : vector<1x128xf32> to vector<8x128xf32>
    %171 = arith.addf %168, %170 : vector<8x128xf32>
    %c0_78 = arith.constant 0 : index
    %c0_79 = arith.constant 0 : index
    %172 = vector.load %arg20[%c0_78, %c0_79] : memref<1x128xf32, #tpu.memory_space<vmem>>, vector<1x128xf32>
    %c0_80 = arith.constant 0 : index
    %c0_81 = arith.constant 0 : index
    %173 = vector.load %arg21[%c0_80, %c0_81] : memref<1x128xf32, #tpu.memory_space<vmem>>, vector<1x128xf32>
    %174 = arith.addf %171, %157 : vector<8x128xf32>
    %cst_82 = arith.constant dense<0.000000e+00> : vector<8xf32>
    %175 = vector.multi_reduction <add>, %174, %cst_82 [1] : vector<8x128xf32> to vector<8xf32>
    %176 = vector.shape_cast %175 : vector<8xf32> to vector<8x1xf32>
    %cst_83 = arith.constant 1.280000e+02 : f32
    %177 = vector.broadcast %cst_83 : f32 to vector<8x1xf32>
    %178 = arith.divf %176, %177 : vector<8x1xf32>
    %179 = arith.mulf %174, %174 : vector<8x128xf32>
    %cst_84 = arith.constant dense<0.000000e+00> : vector<8xf32>
    %180 = vector.multi_reduction <add>, %179, %cst_84 [1] : vector<8x128xf32> to vector<8xf32>
    %181 = vector.shape_cast %180 : vector<8xf32> to vector<8x1xf32>
    %cst_85 = arith.constant 1.280000e+02 : f32
    %182 = vector.broadcast %cst_85 : f32 to vector<8x1xf32>
    %183 = arith.divf %181, %182 : vector<8x1xf32>
    %184 = arith.mulf %178, %178 : vector<8x1xf32>
    %185 = arith.subf %183, %184 : vector<8x1xf32>
    %cst_86 = arith.constant 0.000000e+00 : f32
    %186 = vector.broadcast %cst_86 : f32 to vector<8x1xf32>
    %187 = arith.maximumf %185, %186 : vector<8x1xf32>
    %188 = vector.broadcast %178 : vector<8x1xf32> to vector<8x128xf32>
    %189 = arith.subf %174, %188 : vector<8x128xf32>
    %cst_87 = arith.constant 9.99999974E-6 : f32
    %190 = vector.broadcast %cst_87 : f32 to vector<8x1xf32>
    %191 = arith.addf %187, %190 : vector<8x1xf32>
    %192 = math.rsqrt %191 : vector<8x1xf32>
    %193 = vector.broadcast %192 : vector<8x1xf32> to vector<8x128xf32>
    %194 = arith.mulf %189, %193 : vector<8x128xf32>
    %195 = vector.broadcast %172 : vector<1x128xf32> to vector<8x128xf32>
    %196 = arith.mulf %194, %195 : vector<8x128xf32>
    %197 = vector.broadcast %173 : vector<1x128xf32> to vector<8x128xf32>
    %198 = arith.addf %196, %197 : vector<8x128xf32>
    %c0_88 = arith.constant 0 : index
    %c0_89 = arith.constant 0 : index
    %c0_90 = arith.constant 0 : index
    %199 = vector.load %arg26[%c0_88, %c0_89, %c0_90] : memref<1x8x128xf32, #tpu.memory_space<vmem>>, vector<1x8x128xf32>
    %200 = vector.shape_cast %199 : vector<1x8x128xf32> to vector<8x128xf32>
    %201 = vector.shape_cast %198 : vector<8x128xf32> to vector<1x8x128xf32>
    tpu.vector_store %arg26[%c0_88, %c0_89, %c0_90], %201 {strides = array<i32>} : memref<1x8x128xf32, #tpu.memory_space<vmem>>, vector<1x8x128xf32>,
    return
  }
  func.func @transform_0(%arg0: i32) -> (i32, i32, i32) {
    %c0_i32 = arith.constant 0 : i32
    %c0_i32_0 = arith.constant 0 : i32
    %c0_i32_1 = arith.constant 0 : i32
    return %arg0, %c0_i32, %c0_i32_0 : i32, i32, i32
  }
  func.func @transform_1(%arg0: i32) -> (i32, i32, i32) {
    %c0_i32 = arith.constant 0 : i32
    %c0_i32_0 = arith.constant 0 : i32
    %c0_i32_1 = arith.constant 0 : i32
    return %arg0, %c0_i32, %c0_i32_0 : i32, i32, i32
  }
  func.func @transform_2(%arg0: i32) -> (i32, i32) {
    %c0_i32 = arith.constant 0 : i32
    %c0_i32_0 = arith.constant 0 : i32
    %c0_i32_1 = arith.constant 0 : i32
    return %c0_i32, %c0_i32_0 : i32, i32
  }
  func.func @transform_3(%arg0: i32) -> (i32, i32, i32) {
    %c0_i32 = arith.constant 0 : i32
    %c0_i32_0 = arith.constant 0 : i32
    %c0_i32_1 = arith.constant 0 : i32
    return %arg0, %c0_i32, %c0_i32_0 : i32, i32, i32
  }
  func.func @transform_4(%arg0: i32) -> (i32, i32, i32) {
    %c0_i32 = arith.constant 0 : i32
    %c0_i32_0 = arith.constant 0 : i32
    %c0_i32_1 = arith.constant 0 : i32
    return %arg0, %c0_i32, %c0_i32_0 : i32, i32, i32
  }
  func.func @transform_5(%arg0: i32) -> (i32, i32) {
    %c0_i32 = arith.constant 0 : i32
    %c0_i32_0 = arith.constant 0 : i32
    %c0_i32_1 = arith.constant 0 : i32
    return %c0_i32, %c0_i32_0 : i32, i32
  }
  func.func @transform_6(%arg0: i32) -> (i32, i32) {
    %c0_i32 = arith.constant 0 : i32
    %c0_i32_0 = arith.constant 0 : i32
    %c0_i32_1 = arith.constant 0 : i32
    return %c0_i32, %c0_i32_0 : i32, i32
  }
  func.func @transform_7(%arg0: i32) -> (i32, i32) {
    %c0_i32 = arith.constant 0 : i32
    %c0_i32_0 = arith.constant 0 : i32
    %c0_i32_1 = arith.constant 0 : i32
    return %c0_i32, %c0_i32_0 : i32, i32
  }
  func.func @transform_8(%arg0: i32) -> (i32, i32) {
    %c0_i32 = arith.constant 0 : i32
    %c0_i32_0 = arith.constant 0 : i32
    %c0_i32_1 = arith.constant 0 : i32
    return %c0_i32, %c0_i32_0 : i32, i32
  }
  func.func @transform_9(%arg0: i32) -> (i32, i32) {
    %c0_i32 = arith.constant 0 : i32
    %c0_i32_0 = arith.constant 0 : i32
    %c0_i32_1 = arith.constant 0 : i32
    return %c0_i32, %c0_i32_0 : i32, i32
  }
  func.func @transform_10(%arg0: i32) -> (i32, i32) {
    %c0_i32 = arith.constant 0 : i32
    %c0_i32_0 = arith.constant 0 : i32
    %c0_i32_1 = arith.constant 0 : i32
    return %c0_i32, %c0_i32_0 : i32, i32
  }
  func.func @transform_11(%arg0: i32) -> (i32, i32) {
    %c0_i32 = arith.constant 0 : i32
    %c0_i32_0 = arith.constant 0 : i32
    %c0_i32_1 = arith.constant 0 : i32
    return %c0_i32, %c0_i32_0 : i32, i32
  }
  func.func @transform_12(%arg0: i32) -> (i32, i32) {
    %c0_i32 = arith.constant 0 : i32
    %c0_i32_0 = arith.constant 0 : i32
    %c0_i32_1 = arith.constant 0 : i32
    return %c0_i32, %c0_i32_0 : i32, i32
  }
  func.func @transform_13(%arg0: i32) -> (i32, i32) {
    %c0_i32 = arith.constant 0 : i32
    %c0_i32_0 = arith.constant 0 : i32
    %c0_i32_1 = arith.constant 0 : i32
    return %c0_i32, %c0_i32_0 : i32, i32
  }
  func.func @transform_14(%arg0: i32) -> (i32, i32) {
    %c0_i32 = arith.constant 0 : i32
    %c0_i32_0 = arith.constant 0 : i32
    %c0_i32_1 = arith.constant 0 : i32
    return %c0_i32, %c0_i32_0 : i32, i32
  }
  func.func @transform_15(%arg0: i32) -> (i32, i32) {
    %c0_i32 = arith.constant 0 : i32
    %c0_i32_0 = arith.constant 0 : i32
    %c0_i32_1 = arith.constant 0 : i32
    return %c0_i32, %c0_i32_0 : i32, i32
  }
  func.func @transform_16(%arg0: i32) -> (i32, i32) {
    %c0_i32 = arith.constant 0 : i32
    %c0_i32_0 = arith.constant 0 : i32
    %c0_i32_1 = arith.constant 0 : i32
    return %c0_i32, %c0_i32_0 : i32, i32
  }
  func.func @transform_17(%arg0: i32) -> (i32, i32) {
    %c0_i32 = arith.constant 0 : i32
    %c0_i32_0 = arith.constant 0 : i32
    %c0_i32_1 = arith.constant 0 : i32
    return %c0_i32, %c0_i32_0 : i32, i32
  }
  func.func @transform_18(%arg0: i32) -> (i32, i32) {
    %c0_i32 = arith.constant 0 : i32
    %c0_i32_0 = arith.constant 0 : i32
    %c0_i32_1 = arith.constant 0 : i32
    return %c0_i32, %c0_i32_0 : i32, i32
  }
  func.func @transform_19(%arg0: i32) -> (i32, i32) {
    %c0_i32 = arith.constant 0 : i32
    %c0_i32_0 = arith.constant 0 : i32
    %c0_i32_1 = arith.constant 0 : i32
    return %c0_i32, %c0_i32_0 : i32, i32
  }
  func.func @transform_20(%arg0: i32) -> (i32, i32) {
    %c0_i32 = arith.constant 0 : i32
    %c0_i32_0 = arith.constant 0 : i32
    %c0_i32_1 = arith.constant 0 : i32
    return %c0_i32, %c0_i32_0 : i32, i32
  }
  func.func @transform_21(%arg0: i32) -> (i32, i32) {
    %c0_i32 = arith.constant 0 : i32
    %c0_i32_0 = arith.constant 0 : i32
    %c0_i32_1 = arith.constant 0 : i32
    return %c0_i32, %c0_i32_0 : i32, i32
  }
  func.func @transform_22(%arg0: i32) -> (i32, i32) {
    %c0_i32 = arith.constant 0 : i32
    %c0_i32_0 = arith.constant 0 : i32
    %c0_i32_1 = arith.constant 0 : i32
    return %c0_i32, %c0_i32_0 : i32, i32
  }
  func.func @transform_23(%arg0: i32) -> (i32, i32) {
    %c0_i32 = arith.constant 0 : i32
    %c0_i32_0 = arith.constant 0 : i32
    %c0_i32_1 = arith.constant 0 : i32
    return %c0_i32, %c0_i32_0 : i32, i32
  }
  func.func @transform_24(%arg0: i32) -> (i32, i32) {
    %c0_i32 = arith.constant 0 : i32
    %c0_i32_0 = arith.constant 0 : i32
    %c0_i32_1 = arith.constant 0 : i32
    return %c0_i32, %c0_i32_0 : i32, i32
  }
  func.func @transform_25(%arg0: i32) -> (i32, i32, i32) {
    %c0_i32 = arith.constant 0 : i32
    %c0_i32_0 = arith.constant 0 : i32
    %c0_i32_1 = arith.constant 0 : i32
    return %arg0, %c0_i32, %c0_i32_0 : i32, i32, i32
  }
}

</mosaic_0001>

<bundles_post_ra>
// kernel: decoder_layer_forward.1
= control target key start
LH: loop header
LB: loop body
LE: loop exit
PB: predicated region body
PF: predicated region fallthrough
CT: control target
= control target key end

     0   :  { %s6140_s0 = inlined_call_operand.vmem [shape: f32[2,8,128], index: 0, kind: input, shape index: {}]   ;;  %s6141_s1 = inlined_call_operand.vmem [shape: f32[2,16,128], index: 1, kind: input, shape index: {}]   ;;  %s6142_s2 = inlined_call_operand.vmem [shape: f32[8,8], index: 2, kind: input, shape index: {}]   ;;  %s6143_s3 = inlined_call_operand.vmem [shape: f32[2,1,8], index: 3, kind: input, shape index: {}]   ;;  %s6144_s4 = inlined_call_operand.vmem [shape: f32[2,1,16], index: 4, kind: input, shape index: {}]   ;;  %s6145_s5 = inlined_call_operand.vmem [shape: bf16[128,384], index: 5, kind: input, shape index: {}]   ;;  %s6146_s6 = inlined_call_operand.vmem [shape: f32[1,384], index: 6, kind: input, shape index: {}]   ;;  %s6147_s7 = inlined_call_operand.vmem [shape: bf16[128,128], index: 7, kind: input, shape index: {}]   ;;  %s6148_s8 = inlined_call_operand.vmem [shape: f32[1,128], index: 8, kind: input, shape index: {}]   ;;  %s6149_s9 = inlined_call_operand.vmem [shape: bf16[128,128], index: 9, kind: input, shape index: {}]   ;;  %s6150_s10 = inlined_call_operand.vmem [shape: f32[1,128], index: 10, kind: input, shape index: {}]   ;;  %s6151_s11 = inlined_call_operand.vmem [shape: bf16[128,256], index: 11, kind: input, shape index: {}]   ;;  %s6152_s12 = inlined_call_operand.vmem [shape: f32[1,256], index: 12, kind: input, shape index: {}]   ;;  %s6153_s13 = inlined_call_operand.vmem [shape: bf16[128,128], index: 13, kind: input, shape index: {}]   ;;  %s6154_s14 = inlined_call_operand.vmem [shape: f32[1,128], index: 14, kind: input, shape index: {}]   ;;  %s6155_s15 = inlined_call_operand.vmem [shape: f32[1,128], index: 15, kind: input, shape index: {}]   ;;  %s6156_s16 = inlined_call_operand.vmem [shape: f32[1,128], index: 16, kind: input, shape index: {}]   ;;  %s6157_s17 = inlined_call_operand.vmem [shape: f32[1,128], index: 17, kind: input, shape index: {}]   ;;  %s6158_s18 = inlined_call_operand.vmem [shape: f32[1,128], index: 18, kind: input, shape index: {}]   ;;  %s6159_s19 = inlined_call_operand.vmem [shape: f32[1,128], index: 19, kind: input, shape index: {}]   ;;  %s6160_s20 = inlined_call_operand.vmem [shape: f32[1,128], index: 20, kind: input, shape index: {}]   ;;  %s6161_s21 = inlined_call_operand.vmem [shape: bf16[128,256], index: 21, kind: input, shape index: {}]   ;;  %s6162_s22 = inlined_call_operand.vmem [shape: f32[1,256], index: 22, kind: input, shape index: {}]   ;;  %s6163_s23 = inlined_call_operand.vmem [shape: bf16[256,128], index: 23, kind: input, shape index: {}]   ;;  %s6164_s24 = inlined_call_operand.vmem [shape: f32[1,128], index: 24, kind: input, shape index: {}]   ;;  %s6165_s25 = inlined_call_operand.hbm [shape: f32[2,8,128], index: 25, kind: output, shape index: {}]  }
   0x1   :  { %6184 = sst [smem:[#allocation11_spill]] %s6140_s0 }
   0x2   :  { %6185 = sst [smem:[#allocation12_spill]] %s6141_s1 }
   0x3   :  { %6186 = sst [smem:[#allocation13_spill]] %s6142_s2 }
   0x4   :  { %6187 = sst [smem:[#allocation14_spill]] %s6143_s3 }
   0x5   :  { %6188 = sst [smem:[#allocation15_spill]] %s6144_s4 }
   0x6   :  { %6189 = sst [smem:[#allocation16_spill]] %s6145_s5 }
   0x7   :  { %6190 = sst [smem:[#allocation17_spill]] %s6146_s6 }
   0x8   :  { %6191 = sst [smem:[#allocation18_spill]] %s6147_s7 }
   0x9   :  { %6192 = sst [smem:[#allocation19_spill]] %s6148_s8 }
   0xa   :  { %6193 = sst [smem:[#allocation20_spill]] %s6149_s9 }
   0xb   :  { %6194 = sst [smem:[#allocation21_spill]] %s6150_s10 }
   0xc   :  { %6195 = sst [smem:[#allocation22_spill]] %s6151_s11 }
   0xd   :  { %6196 = sst [smem:[#allocation23_spill]] %s6159_s19 }
   0xe   :  { %6197 = sst [smem:[#allocation24_spill]] %s6160_s20 }
   0xf   :  { %6198 = sst [smem:[#allocation25_spill]] %s6165_s25 }
  0x10   :  { %30 = vsyncpa [#allocation3], 0 }
  0x11   :  { %32 = vsyncpa [#allocation3 + $0x1], 0  ;;  %s5270_s29 = smov 0   ;;  %s5272_s2 = smov 0  }
  0x12   :  { %s5274_s6 = smov 0   ;;  %s5276_s30 = smov 0  }
  0x13 LB: > { %6199 = sst [smem:[#allocation5_spill]] %s5117_s29  ;;  %s5291_s7 = sadd.s32 4294967295, %s5129_s30   ;;  %s5129_s30 = sphi %s5276_s30, %s6229_s30   ;;  %s5125_s6 = sphi %s5274_s6, %s6231_s6   ;;  %s5121_s2 = sphi %s5272_s2, %s6233_s2   ;;  %s5117_s29 = sphi %s5270_s29, %s6232_s29  }
  0x14   : > { %6200 = sst [smem:[#allocation6_spill]] %s5125_s6  ;;  %s4438_s3 = sadd.s32 4294967294, %s5129_s30  }
  0x15   : > { %6201 = sst [smem:[#allocation7_spill]] %s5129_s30  ;;  %s5295_s26 = sadd.s32 1, %s5129_s30  }
  0x16   : > { %6202 = sst [smem:[#allocation8_spill]] %s5295_s26  ;;  %s590_s1 = sadd.s32 1, %s5125_s6 }
  0x17   : > { %s587_s8 = ssub.s32 %s5129_s30, %s5295_s26  ;;  %p600_p0 = scmp.ne.s32.totalorder %s5125_s6, %s5121_s2 }
  0x18   : > { %p588_p1 = scmp.eq.s32.totalorder %s587_s8, 0  ;;  %p601_p2 = scmp.eq.s32.totalorder %s5291_s7, 1 }
  0x19   : > { %p606_p3 = scmp.ne.s32.totalorder %s5121_s2, %s5117_s29  ;;  %p607_p4 = scmp.eq.s32.totalorder %s4438_s3, 1 }
  0x1a   : > { %s5306_s27 = scalar_select %p588_p1, %s5125_s6, %s590_s1  }
  0x1b   : > { %p5308_p5 = por %p601_p2, %p600_p0  ;;  %p5312_p6 = por %p607_p4, %p606_p3 }
  0x1c   : > { %6203 = sst [smem:[#allocation9_spill]] %s5306_s27  ;;  %p4441_p7 = scmp.ge.s32.totalorder %s5129_s30, 1 }
  0x1d   : > { %s6205_s28 = scalar_select %p5312_p6, 1, 0 }
  0x1e   : > { %p715_p8 = scmp.lt.s32.totalorder %s5129_s30, 3 }
  0x1f   : > { %6206 = sst [smem:[#allocation10_spill]] %s6205_s28 }
  0x20   : > { %p716_p9 = pnand %p4441_p7, %p715_p8 }
  0x21   : > { %s6207_s0 = sld [smem:[#allocation16_spill]] (!%p716_p9)  ;;  %v5131_v2 = vmov (!%p716_p9), 0   ;;  %p793_p10 = scmp.lt.s32.totalorder (!%p716_p9), %s5291_s7, 1  ;;  %v5132_v20 = vmov (!%p716_p9), 0.0   ;;  %v847_v23 = vlaneseq (!%p716_p9)  ;;  %vm5136_vm0 = vmmov (!%p716_p9), 0  }
  0x22   : > { %719 = sbr.rel (%p716_p9) target bundleno = 4075 (0xfeb), region = 120  ;;  %1022 = vmatprep.mubr.bf16.mxu0 (!%p716_p9), %v5131_v2  ;;  %s6208_s20 = sld [smem:[#allocation11_spill]] (!%p716_p9)  ;;  %4685 = vmatprep.subr.bf16.mxu1 (!%p716_p9), %v5132_v20  ;;  %v5137_v41 = vmov (!%p716_p9), 1983009808   ;;  %v5138_v43 = vmov (!%p716_p9), 1934713408  }
  0x23   : > { %v5395_v25 = vshrl.u32 (!%p716_p9), %v847_v23, 7  ;;  %s6209_s6 = sld [smem:[#allocation17_spill]] (!%p716_p9)  ;;  %s6176_s5 = smov (!%p716_p9), 32   ;;  %4701 = vmatprep.mubr.msk.bf16.mxu1 (!%p716_p9), %vm5136_vm0, %v5132_v20  ;;  %v1110_v42 = vunpack.c.l.s4 (!%p716_p9), %v5137_v41  ;;  %v1142_v44 = vunpack.c.l.s4 (!%p716_p9), %v5138_v43  ;;  %vm1547_vm1 = vcmask (!%p716_p9), 261120  }
  0x24   : > { %s6180_s25 = smov (!%p716_p9), 96   ;;  %s6178_s1 = smov (!%p716_p9), 64   ;;  %vm1740_vm2 = vcmask (!%p716_p9), 64512   ;;  %vm1792_vm3 = vcmask (!%p716_p9), 1043456   ;;  %vm2123_vm4 = vcmask (!%p716_p9), 523264   ;;  %vm2125_vm5 = vcmask (!%p716_p9), 785408  }
  0x25   : > { %v5402_v27 = vsub.s32 (!%p716_p9), 1, %v5395_v25  ;;  %v5411_v29 = vsub.s32 (!%p716_p9), 0, %v5395_v25  ;;  %v1111_v45 = vunpack.c.0.s8 (!%p716_p9), %v1110_v42  ;;  %v1143_v48 = vunpack.c.0.s8 (!%p716_p9), %v1142_v44  ;;  %s6211_s9 = sld [smem:[#allocation13_spill]] (!%p716_p9)  ;;  %s6212_s27 = sld [smem:[#allocation18_spill]] (!%p716_p9) }
  0x26   : > { %s6213_s11 = sld [smem:[#allocation22_spill]] (!%p716_p9)  ;;  %s6217_s28 = smov (!%p716_p9), 96   ;;  %vm3476_vm6 = vcmask (!%p716_p9), 130048  }
  0x27   : > { %v4908_v0 = vld [vmem:[%s6207_s0 + $0x4] ss:$12 sps:$4 sm:$0xff] (!%p716_p9)   ;;  %v4910_v1 = vld [vmem:[%s6207_s0] ss:$12 sps:$4 sm:$0xff] (!%p716_p9)   ;;  %v4911_v3 = vld [vmem:[%s6207_s0 + $0x1c] ss:$12 sps:$4 sm:$0xff] (!%p716_p9)   ;;  %v5442_v49 = vsub.s32 (!%p716_p9), %v1111_v45, %v5395_v25  ;;  %v5445_v56 = vsub.s32 (!%p716_p9), %v1143_v48, %v5395_v25 }
  0x28   : > { %990 = vmatprep.subr.bf16.mxu0 (!%p716_p9), %v4908_v0  ;;  %v4913_v4 = vld [vmem:[%s6207_s0 + $0x18] ss:$12 sps:$4 sm:$0xff] (!%p716_p9)   ;;  %v4914_v5 = vld [vmem:[%s6207_s0 + $0x34] ss:$12 sps:$4 sm:$0xff] (!%p716_p9)   ;;  %v4916_v6 = vld [vmem:[%s6207_s0 + $0x30] ss:$12 sps:$4 sm:$0xff] (!%p716_p9)  }
  0x29   : > { %991 = vmatpush1.bf16.msra.mxu0 %v4910_v1  ;;  %s5336_s3 = scalar_select %p793_p10, %s5291_s7, 1  ;;  %v4917_v7 = vld [vmem:[%s6207_s0 + $0x4c] ss:$12 sps:$4 sm:$0xff]   ;;  %v4919_v8 = vld [vmem:[%s6207_s0 + $0x48] ss:$12 sps:$4 sm:$0xff]  }
  0x2a   : > { %992 = vmatprep.subr.bf16.mxu0 %v4911_v3  ;;  %v4920_v9 = vld [vmem:[%s6207_s0 + $0x64] ss:$12 sps:$4 sm:$0xff]   ;;  %v4922_v10 = vld [vmem:[%s6207_s0 + $0x60] ss:$12 sps:$4 sm:$0xff]   ;;  %v4923_v11 = vld [vmem:[%s6207_s0 + $0x7c] ss:$12 sps:$4 sm:$0xff]  }
  0x2b   : > { %s4443_s29 = sshll.u32 %s5336_s3, 3  ;;  %v4925_v12 = vld [vmem:[%s6207_s0 + $0x78] ss:$12 sps:$4 sm:$0xff]   ;;  %v4926_v13 = vld [vmem:[%s6207_s0 + $0x94] ss:$12 sps:$4 sm:$0xff]   ;;  %s6219_s8 = smov 32  }
  0x2c   : > { %v4928_v14 = vld [vmem:[%s6207_s0 + $0x90] ss:$12 sps:$4 sm:$0xff]   ;;  %v4929_v15 = vld [vmem:[%s6207_s0 + $0xac] ss:$12 sps:$4 sm:$0xff]   ;;  %s5372_s19 = scalar_lea.vmem %s6208_s20, %s4443_s29  ;;  %v4931_v16 = vld [vmem:[%s6207_s0 + $0xa8] ss:$12 sps:$4 sm:$0xff]  }
  0x2d   : > { %993 = vmatpush1.bf16.msra.mxu0 %v4913_v4  ;;  %v809_v17 = vld [vmem:[%s5372_s19] sm:$0xff]  ;;  %v4932_v19 = vld [vmem:[%s6207_s0 + $0x8] ss:$12 sps:$4 sm:$0xff]   ;;  %v4935_v24 = vld [vmem:[%s6207_s0 + $0x50] ss:$12 sps:$4 sm:$0xff]   ;;  %s4594_s29 = sshll.u32 %s5336_s3, 4 }
  0x2e   : > { %994 = vmatprep.subr.bf16.mxu0 %v4914_v5  ;;  %v812_v18 = vpack.c.bf16 %v809_v17, %v809_v17  ;;  %4686 = vmatpush3.bf16.msra.mxu1 %v4932_v19  ;;  %v4933_v21 = vld [vmem:[%s6207_s0 + $0x20] ss:$12 sps:$4 sm:$0xff]   ;;  %v4934_v22 = vld [vmem:[%s6207_s0 + $0x38] ss:$12 sps:$4 sm:$0xff]   ;;  %v4936_v26 = vld [vmem:[%s6207_s0 + $0x68] ss:$12 sps:$4 sm:$0xff]  }
  0x2f   : > { %4687 = vmatprep.subr.bf16.mxu1 %v5132_v20  ;;  %v5407_v28 = vld [vmem:[%s6209_s6] sm:$0x7]  ;;  %v4938_v37 = vld [vmem:[%s6207_s0 + $0x98] ss:$12 sps:$4 sm:$0xff]   ;;  %v4939_v40 = vld [vmem:[%s6207_s0 + $0xb0] ss:$12 sps:$4 sm:$0xff]  }
  0x30   : > { %v854_v30 = vrot.slane %v5407_v28, %v5402_v27  ;;  %v4937_v31 = vld [vmem:[%s6207_s0 + $0x80] ss:$12 sps:$4 sm:$0xff]   ;;  %v850_v34 = vrot.slane %v5407_v28, %v5411_v29  ;;  %s6210_s6 = sld [smem:[#allocation14_spill]]  ;;  %s6220_s10 = sld [smem:[#allocation21_spill]] }
  0x31   : > { %995 = vmatpush1.bf16.msra.mxu0 %v4916_v6 }
  0x32   : > { %996 = vmatprep.subr.bf16.mxu0 %v4917_v7  ;;  %4688 = vmatpush3.bf16.msra.mxu1 %v4933_v21 }
  0x33   : > { %4689 = vmatprep.subr.bf16.mxu1 %v5132_v20 }
  0x35   : > { %997 = vmatpush1.bf16.msra.mxu0 %v4919_v8 }
  0x36   : > { %998 = vmatprep.subr.bf16.mxu0 %v4920_v9  ;;  %4690 = vmatpush3.bf16.msra.mxu1 %v4934_v22  ;;  %s804_s26 = scalar_lea.vmem %s6210_s6, %s5336_s3 }
  0x37   : > { %4691 = vmatprep.subr.bf16.mxu1 %v5132_v20 }
  0x39   : > { %999 = vmatpush1.bf16.msra.mxu0 %v4922_v10 }
  0x3a   : > { %1000 = vmatprep.subr.bf16.mxu0 %v4923_v11  ;;  %4692 = vmatpush3.bf16.msra.mxu1 %v4935_v24 }
  0x3b   : > { %4693 = vmatprep.subr.bf16.mxu1 %v5132_v20 }
  0x3d   : > { %1001 = vmatpush1.bf16.msra.mxu0 %v4925_v12 }
  0x3e   : > { %1002 = vmatprep.subr.bf16.mxu0 %v4926_v13  ;;  %4694 = vmatpush3.bf16.msra.mxu1 %v4936_v26 }
  0x3f   : > { %4695 = vmatprep.subr.bf16.mxu1 %v5132_v20 }
  0x41   : > { %1003 = vmatpush1.bf16.msra.mxu0 %v4928_v14 }
  0x42   : > { %1004 = vmatprep.subr.bf16.mxu0 %v4929_v15  ;;  %4696 = vmatpush3.bf16.msra.mxu1 %v4937_v31 }
  0x43   : > { %4697 = vmatprep.subr.bf16.mxu1 %v5132_v20 }
  0x45   : > { %1005 = vmatpush1.bf16.msra.mxu0 %v4931_v16 }
  0x46   : > { %4729 = vmatprep.subr.bf16.mxu0 %v5132_v20  ;;  %4698 = vmatpush3.bf16.msra.mxu1 %v4938_v37 }
  0x47   : > { %4699 = vmatprep.subr.bf16.mxu1 %v5132_v20 }
  0x48   : > { %1023 = vmatmul.mubr.bf16.vlgmr.msra.gmra.mrb[0].mxu0 %v812_v18 }
  0x49   : > { %4731 = vmatprep.mubr.msk.bf16.mxu0 %vm5136_vm0, %v5132_v20 }
  0x4a   : > { %4700 = vmatpush3.bf16.msra.mxu1 %v4939_v40 }
  0x4b   : > { %4705 = vmatprep.subr.bf16.mxu1 %v5132_v20 }
  0x4d   : > { %4702 = vmatmul.mubr.bf16.vlgmr.msra.gmra.mrb[0].mxu1 %v812_v18 }
  0x4e   : > { %4707 = vmatprep.mubr.msk.bf16.mxu1 %vm5136_vm0, %v5132_v20 }
 0x11b   : > { %v1024_v32 = vpop.f32.mrb[0].mxu0 }
 0x11c   : > { %v1026_v33 = vpop.f32.mrb[1].mxu0  ;;  %v1025_v39 = vadd.f32 %v1024_v32, %v850_v34 }
 0x11d   : > { %v1027_v35 = vadd.f32 %v1026_v33, %v854_v30  ;;  %v1028_v36 = vpop.f32.mrb[2].mxu0 }
 0x11e   : > { %v1029_v38 = vpop.f32.mrb[3].mxu0 }
 0x11f   : > { %1254 = vrot.lane.b32.xlu1 %v1027_v35, %s6176_s5  ;;  %1248 = vrot.lane.b32.xlu0 %v1027_v35, %s6180_s25 }
 0x123   : > { %1251 = vrot.lane.b32.xlu0 %v1027_v35, %s6178_s1  ;;  %1098 = vrot.lane.b32.xlu1 %v1025_v39, %s6180_s25 }
 0x127   : > { %1101 = vrot.lane.b32.xlu0 %v1025_v39, %s6178_s1  ;;  %1104 = vrot.lane.b32.xlu1 %v1025_v39, %s6176_s5 }
 0x191   : > { %v1255_v46 = vpop.permute.xlu1 %1254  ;;  %v1249_v47 = vpop.permute.xlu0 %1248 }
 0x192   : > { %v1273_v50 = vcombine.low %v1249_v47, %v1255_v46  ;;  %v1274_v51 = vcombine.high %v1249_v47, %v1255_v46 }
 0x194   : > { %v1281_v57 = vrot.slane %v1273_v50, %v5442_v49  ;;  %v1288_v58 = vrot.slane %v1274_v51, %v5442_v49 }
 0x195   : > { %v1252_v52 = vpop.permute.xlu0 %1251  ;;  %v1099_v53 = vpop.permute.xlu1 %1098 }
 0x196   : > { %v1257_v54 = vcombine.low %v1027_v35, %v1252_v52  ;;  %v1258_v55 = vcombine.high %v1027_v35, %v1252_v52 }
 0x198   : > { %v1265_v59 = vrot.slane %v1257_v54, %v5442_v49  ;;  %v1272_v60 = vrot.slane %v1258_v55, %v5442_v49 }
 0x199   : > { %v1102_v61 = vpop.permute.xlu0 %1101  ;;  %v1105_v62 = vpop.permute.xlu1 %1104 }
 0x19a   : > { %v1289_v63 = vcombine.low %v1265_v59, %v1281_v57  ;;  %v1290_v0 = vcombine.high %v1265_v59, %v1281_v57  ;;  %v1305_v1 = vcombine.low %v1272_v60, %v1288_v58  ;;  %v1306_v3 = vcombine.high %v1272_v60, %v1288_v58 }
 0x19b   : > { %v1107_v4 = vcombine.low %v1025_v39, %v1102_v61  ;;  %v1108_v5 = vcombine.high %v1025_v39, %v1102_v61  ;;  %v1123_v6 = vcombine.low %v1099_v53, %v1105_v62  ;;  %v1124_v7 = vcombine.high %v1099_v53, %v1105_v62 }
 0x19c   : > { %v1297_v8 = vrot.slane %v1289_v63, %v5445_v56  ;;  %v1304_v9 = vrot.slane %v1290_v0, %v5445_v56  ;;  %v1313_v10 = vrot.slane %v1305_v1, %v5445_v56  ;;  %v1320_v11 = vrot.slane %v1306_v3, %v5445_v56 }
 0x19d   : > { %v1115_v12 = vrot.slane %v1107_v4, %v5442_v49  ;;  %v1122_v13 = vrot.slane %v1108_v5, %v5442_v49  ;;  %v1131_v14 = vrot.slane %v1123_v6, %v5442_v49  ;;  %v1138_v15 = vrot.slane %v1124_v7, %v5442_v49 }
 0x19e   : > { %v1325_v16 = vcombine.low %v1297_v8, %v1304_v9  ;;  %v4473_v17 = vcombine.high %v1297_v8, %v1304_v9  ;;  %v1341_v18 = vcombine.low %v1313_v10, %v1320_v11  ;;  %v4474_v19 = vcombine.high %v1313_v10, %v1320_v11 }
 0x19f   : > { %v1139_v21 = vcombine.low %v1115_v12, %v1131_v14  ;;  %v1140_v22 = vcombine.high %v1115_v12, %v1131_v14  ;;  %v1155_v23 = vcombine.low %v1122_v13, %v1138_v15  ;;  %v1156_v24 = vcombine.high %v1122_v13, %v1138_v15 }
 0x1a0   : > { %v1332_v26 = vrot.slane %v1325_v16, %v5442_v49  ;;  %v1340_v30 = vrot.slane %v4473_v17, %v5442_v49  ;;  %v1348_v31 = vrot.slane %v1341_v18, %v5442_v49  ;;  %v1356_v32 = vrot.slane %v4474_v19, %v5442_v49 }
 0x1a1   : > { %v1147_v33 = vrot.slane %v1139_v21, %v5445_v56  ;;  %v1154_v34 = vrot.slane %v1140_v22, %v5445_v56  ;;  %v1163_v35 = vrot.slane %v1155_v23, %v5445_v56  ;;  %v1170_v36 = vrot.slane %v1156_v24, %v5445_v56  ;;  %v1065_v21 = vpop.f32.mrb[0].mxu1 }
 0x1a2   : > { %v1357_v37 = vcombine.low %v1332_v26, %v1340_v30  ;;  %v1373_v38 = vcombine.low %v1348_v31, %v1356_v32  ;;  %v1358_v59 = vcombine.high %v1332_v26, %v1340_v30  ;;  %v1374_v60 = vcombine.high %v1348_v31, %v1356_v32  ;;  %v4703_v22 = vpop.f32.mrb[1].mxu1  ;;  %v1071_v26 = vld [vmem:[%s6211_s9] sm:$0xff]  ;;  %s6221_s9 = sld [smem:[#allocation15_spill]] }
 0x1a3   : > { %v1175_v39 = vcombine.low %v1147_v33, %v1154_v34  ;;  %v4471_v40 = vcombine.high %v1147_v33, %v1154_v34  ;;  %v1191_v41 = vcombine.low %v1163_v35, %v1170_v36  ;;  %v4472_v42 = vcombine.high %v1163_v35, %v1170_v36  ;;  %v1068_v23 = vpop.f32.mrb[2].mxu1  ;;  %v4470_v30 = vld [vmem:[%s804_s26] ss:$0 sm:$0xff]  ;;  %s6215_s26 = sld [smem:[#allocation12_spill]] }
 0x1a4   : > { %v1365_v43 = vrot.slane %v1357_v37, %v5445_v56  ;;  %v1381_v44 = vrot.slane %v1373_v38, %v5445_v56  ;;  %v1372_v63 = vrot.slane %v1358_v59, %v5445_v56  ;;  %v1388_v0 = vrot.slane %v1374_v60, %v5445_v56  ;;  %v4704_v24 = vpop.f32.mrb[3].mxu1 }
 0x1a5   : > { %v1182_v45 = vrot.slane %v1175_v39, %v5442_v49  ;;  %v1190_v46 = vrot.slane %v4471_v40, %v5442_v49  ;;  %v1198_v47 = vrot.slane %v1191_v41, %v5442_v49  ;;  %v1206_v48 = vrot.slane %v4472_v42, %v5442_v49 }
 0x1a6   : > { %v1389_v50 = vcombine.low %v1365_v43, %v1381_v44  ;;  %v1390_v58 = vcombine.high %v1365_v43, %v1381_v44  ;;  %v1391_v4 = vcombine.low %v1372_v63, %v1388_v0  ;;  %v1392_v13 = vcombine.high %v1372_v63, %v1388_v0 }
 0x1a7   : > { %v1207_v51 = vcombine.low %v1182_v45, %v1190_v46  ;;  %v1223_v52 = vcombine.low %v1198_v47, %v1206_v48  ;;  %v1208_v5 = vcombine.high %v1182_v45, %v1190_v46  ;;  %v1224_v6 = vcombine.high %v1198_v47, %v1206_v48 }
 0x1a8   : > { %v1393_v53 = vpack.c.bf16 %v1389_v50, %v1389_v50  ;;  %v1394_v62 = vpack.c.bf16 %v1390_v58, %v1390_v58  ;;  %v1395_v8 = vpack.c.bf16 %v1391_v4, %v1391_v4  ;;  %v1396_v15 = vpack.c.bf16 %v1392_v13, %v1392_v13  ;;  %s807_s30 = scalar_lea.vmem %s6221_s9, %s5336_s3 }
 0x1a9   : > { %v1215_v54 = vrot.slane %v1207_v51, %v5445_v56  ;;  %v1231_v55 = vrot.slane %v1223_v52, %v5445_v56  ;;  %v1222_v10 = vrot.slane %v1208_v5, %v5445_v56  ;;  %v1238_v11 = vrot.slane %v1224_v6, %v5445_v56  ;;  %s801_s20 = scalar_lea.vmem %s6215_s26, %s4594_s29  ;;  %s6216_s29 = sld [smem:[#allocation19_spill]] }
 0x1aa   : > { %v1552_v57 = vsel %vm1547_vm1, %v1393_v53, 0  ;;  %v1598_v3 = vsel %vm1547_vm1, %v1394_v62, 0  ;;  %v1644_v12 = vsel %vm1547_vm1, %v1395_v8, 0  ;;  %v1690_v17 = vsel %vm1547_vm1, %v1396_v15, 0  ;;  %s6223_s26 = sld [smem:[#allocation24_spill]] }
 0x1ab   : > { %4706 = vmatpush3.bf16.xpose.msra.mxu1 %v1552_v57  ;;  %v1239_v61 = vcombine.low %v1215_v54, %v1231_v55  ;;  %v1240_v7 = vcombine.high %v1215_v54, %v1231_v55  ;;  %v1241_v14 = vcombine.low %v1222_v10, %v1238_v11  ;;  %v1242_v18 = vcombine.high %v1222_v10, %v1238_v11 }
 0x1ac   : > { %4711 = vmatprep.subr.bf16.mxu1 %v5132_v20  ;;  %v1079_v31 = vadd.f32 %v4470_v30, %v1071_v26  ;;  %v857_v53 = vsub.s32 2, %v5395_v25 }
 0x1ad   : > { %v1243_v1 = vpack.c.bf16 %v1239_v61, %v1239_v61  ;;  %v1244_v9 = vpack.c.bf16 %v1240_v7, %v1240_v7  ;;  %v1245_v16 = vpack.c.bf16 %v1241_v14, %v1241_v14  ;;  %v1246_v19 = vpack.c.bf16 %v1242_v18, %v1242_v18 }
 0x1ae   : > { %v858_v57 = vrot.slane %v5407_v28, %v857_v53 }
 0x1b0   : > { %v1066_v63 = vadd.f32 %v1065_v21, %v858_v57 }
 0x1b2   : > { %4708 = vmatmul.mubr.msk.bf16.vlgmr.msra.gmra.mrb[4].mxu1 %vm1547_vm1, %v1243_v1 }
 0x1b3   : > { %4712 = vmatpush3.bf16.xpose.msra.mxu1 %v1598_v3  ;;  %4713 = vmatprep.mubr.msk.bf16.mxu1 %vm5136_vm0, %v5132_v20 }
 0x1b4   : > { %4717 = vmatprep.subr.bf16.mxu1 %v5132_v20 }
 0x1ba   : > { %4714 = vmatmul.mubr.msk.bf16.vlgmr.msra.gmra.mrb[8].mxu1 %vm1547_vm1, %v1244_v9 }
 0x1bb   : > { %4718 = vmatpush3.bf16.xpose.msra.mxu1 %v1644_v12  ;;  %4719 = vmatprep.mubr.msk.bf16.mxu1 %vm5136_vm0, %v5132_v20 }
 0x1bc   : > { %4723 = vmatprep.subr.bf16.mxu1 %v5132_v20 }
 0x1c2   : > { %4720 = vmatmul.mubr.msk.bf16.vlgmr.msra.gmra.mrb[12].mxu1 %vm1547_vm1, %v1245_v16 }
 0x1c3   : > { %4724 = vmatpush3.bf16.xpose.msra.mxu1 %v1690_v17  ;;  %4725 = vmatprep.mubr.msk.bf16.mxu1 %vm5136_vm0, %v5132_v20 }
 0x1c4   : > { %4735 = vmatprep.subr.bf16.mxu1 %v5132_v20 }
 0x1ca   : > { %4726 = vmatmul.mubr.msk.bf16.vlgmr.msra.gmra.mrb[16].mxu1 %vm1547_vm1, %v1246_v19 }
 0x1cb   : > { %4737 = vmatprep.mubr.msk.bf16.mxu1 %vm5136_vm0, %v5132_v20 }
 0x285   : > { %v1588_v32 = vpop.f32.mrb[4].mxu1 }
 0x286   : > { %v1732_v33 = vmul.f32 0.17677669, %v1588_v32  ;;  %v4709_v34 = vpop.f32.mrb[5].mxu1 }
 0x287   : > { %v1591_v35 = vpop.f32.mrb[6].mxu1 }
 0x288   : > { %v4710_v36 = vpop.f32.mrb[7].mxu1  ;;  %v1736_v37 = vadd.f32 %v1732_v33, %v1079_v31 }
 0x28a   : > { %v1741_v38 = vsel %vm1740_vm2, %v1736_v37, -inf }
 0x28b   : > { %1742 = vmax.xlane.f32.xlu0 %v1741_v38 }
 0x28d   : > { %v1634_v39 = vpop.f32.mrb[8].mxu1 }
 0x28e   : > { %v1733_v40 = vmul.f32 0.17677669, %v1634_v39  ;;  %v4715_v41 = vpop.f32.mrb[9].mxu1 }
 0x28f   : > { %v1637_v42 = vpop.f32.mrb[10].mxu1 }
 0x290   : > { %v4716_v43 = vpop.f32.mrb[11].mxu1  ;;  %v1737_v44 = vadd.f32 %v1733_v40, %v1079_v31 }
 0x292   : > { %v1744_v45 = vsel %vm1740_vm2, %v1737_v44, -inf }
 0x293   : > { %1745 = vmax.xlane.f32.xlu1 %v1744_v45 }
 0x295   : > { %v1680_v46 = vpop.f32.mrb[12].mxu1 }
 0x296   : > { %v1734_v47 = vmul.f32 0.17677669, %v1680_v46  ;;  %v4721_v48 = vpop.f32.mrb[13].mxu1 }
 0x297   : > { %v1683_v50 = vpop.f32.mrb[14].mxu1 }
 0x298   : > { %v4722_v51 = vpop.f32.mrb[15].mxu1  ;;  %v1738_v52 = vadd.f32 %v1734_v47, %v1079_v31 }
 0x29a   : > { %v1747_v54 = vsel %vm1740_vm2, %v1738_v52, -inf }
 0x29b   : > { %1748 = vmax.xlane.f32.xlu0 %v1747_v54 }
 0x29d   : > { %v1726_v55 = vpop.f32.mrb[16].mxu1 }
 0x29e   : > { %v1735_v58 = vmul.f32 0.17677669, %v1726_v55  ;;  %v4727_v59 = vpop.f32.mrb[17].mxu1 }
 0x29f   : > { %v1729_v60 = vpop.f32.mrb[18].mxu1 }
 0x2a0   : > { %v4728_v61 = vpop.f32.mrb[19].mxu1  ;;  %v1739_v62 = vadd.f32 %v1735_v58, %v1079_v31 }
 0x2a2   : > { %v1750_v0 = vsel %vm1740_vm2, %v1739_v62, -inf }
 0x2a3   : > { %1751 = vmax.xlane.f32.xlu0 %v1750_v0 }
 0x2a4   : > { %1398 = vrot.lane.b32.xlu1 %v1066_v63, %s6180_s25 }
 0x318   : > { %v1743_v1 = vpop.xlane.xlu0 %1742 }
 0x319   : > { %v1753_v3 = vsub.f32 %v1736_v37, %v1743_v1 }
 0x31b   : > { %v1757_v25 = vmul.f32 1.442695, %v1753_v3 }
 0x31d   : > { %5028 = vpow2.f32 %v1757_v25 }
 0x320   : > { %v1746_v4 = vpop.xlane.xlu1 %1745 }
 0x321   : > { %v1754_v5 = vsub.f32 %v1737_v44, %v1746_v4 }
 0x323   : > { %v1759_v6 = vmul.f32 1.442695, %v1754_v5 }
 0x324   : > { %v1399_v21 = vpop.permute.xlu1 %1398 }
 0x325   : > { %5030 = vpow2.f32 %v1759_v6 }
 0x327   : > { %v5513_v28 = vpop.eup %5028 }
 0x328   : > { %v1765_v7 = vsel %vm1740_vm2, %v5513_v28, 0.0  ;;  %v1749_v10 = vpop.xlane.xlu0 %1748 }
 0x329   : > { %1766 = vadd.xlane.f32.xlu1 %v1765_v7  ;;  %v1755_v11 = vsub.f32 %v1738_v52, %v1749_v10 }
 0x32b   : > { %v1761_v12 = vmul.f32 1.442695, %v1755_v11 }
 0x32d   : > { %5032 = vpow2.f32 %v1761_v12 }
 0x32f   : > { %v5517_v8 = vpop.eup %5030 }
 0x330   : > { %v1768_v9 = vsel %vm1740_vm2, %v5517_v8, 0.0  ;;  %v1752_v13 = vpop.xlane.xlu0 %1751 }
 0x331   : > { %1769 = vadd.xlane.f32.xlu0 %v1768_v9  ;;  %v1756_v14 = vsub.f32 %v1739_v62, %v1752_v13 }
 0x333   : > { %v1763_v15 = vmul.f32 1.442695, %v1756_v14 }
 0x335   : > { %5034 = vpow2.f32 %v1763_v15 }
 0x337   : > { %v5523_v16 = vpop.eup %5032 }
 0x338   : > { %v1771_v17 = vsel %vm1740_vm2, %v5523_v16, 0.0 }
 0x33a   : > { %1404 = vrot.lane.b32.xlu1 %v1066_v63, %s6176_s5 }
 0x33f   : > { %v5527_v18 = vpop.eup %5034 }
 0x340   : > { %v1774_v19 = vsel %vm1740_vm2, %v5527_v18, 0.0 }
 0x347   : > { %1401 = vrot.lane.b32.xlu0 %v1066_v63, %s6178_s1 }
 0x35e   : > { %1772 = vadd.xlane.f32.xlu1 %v1771_v17 }
 0x366   : > { %1775 = vadd.xlane.f32.xlu0 %v1774_v19 }
 0x3b6   : > { %v1767_v22 = vpop.xlane.xlu1 %1766 }
 0x3b7   : > { %5036 = vrcp.f32 %v1767_v22 }
 0x3ba   : > { %v1405_v23 = vpop.permute.xlu1 %1404 }
 0x3bb   : > { %v1423_v26 = vcombine.low %v1399_v21, %v1405_v23  ;;  %v1424_v30 = vcombine.high %v1399_v21, %v1405_v23 }
 0x3bd   : > { %v1431_v34 = vrot.slane %v1423_v26, %v5442_v49  ;;  %v1438_v35 = vrot.slane %v1424_v30, %v5442_v49 }
 0x3be   : > { %v1770_v24 = vpop.xlane.xlu0 %1769 }
 0x3bf   : > { %5038 = vrcp.f32 %v1770_v24 }
 0x3c1   : > { %v5037_v60 = vpop.eup %5036 }
 0x3c2   : > { %v1402_v31 = vpop.permute.xlu0 %1401  ;;  %v1781_v6 = vmul.f32 %v5037_v60, %v5513_v28 }
 0x3c3   : > { %v1407_v32 = vcombine.low %v1066_v63, %v1402_v31  ;;  %v1408_v33 = vcombine.high %v1066_v63, %v1402_v31 }
 0x3c4   : > { %v1785_v15 = vpack.c.bf16 %v1781_v6, %v1781_v6 }
 0x3c5   : > { %v1415_v36 = vrot.slane %v1407_v32, %v5442_v49  ;;  %v1422_v37 = vrot.slane %v1408_v33, %v5442_v49  ;;  %v4940_v32 = vld [vmem:[%s6212_s27] sm:$0xff]   ;;  %v4943_v33 = vld [vmem:[%s6212_s27 + $0x18] sm:$0xff]  }
 0x3c7   : > { %v1439_v38 = vcombine.low %v1415_v36, %v1431_v34  ;;  %v1440_v39 = vcombine.high %v1415_v36, %v1431_v34  ;;  %v1455_v40 = vcombine.low %v1422_v37, %v1438_v35  ;;  %v1456_v41 = vcombine.high %v1422_v37, %v1438_v35  ;;  %v4944_v34 = vld [vmem:[%s6212_s27 + $0x20] sm:$0xff]   ;;  %v4945_v35 = vld [vmem:[%s6212_s27 + $0x28] sm:$0xff]  }
 0x3c9   : > { %v1447_v42 = vrot.slane %v1439_v38, %v5445_v56  ;;  %v1454_v43 = vrot.slane %v1440_v39, %v5445_v56  ;;  %v1463_v44 = vrot.slane %v1455_v40, %v5445_v56  ;;  %v1470_v45 = vrot.slane %v1456_v41, %v5445_v56  ;;  %v5039_v1 = vpop.eup %5038 }
 0x3ca   : > { %v1782_v7 = vmul.f32 %v5039_v1, %v5517_v8 }
 0x3cb   : > { %v1475_v46 = vcombine.low %v1447_v42, %v1454_v43  ;;  %v4475_v47 = vcombine.high %v1447_v42, %v1454_v43  ;;  %v1491_v48 = vcombine.low %v1463_v44, %v1470_v45  ;;  %v4476_v50 = vcombine.high %v1463_v44, %v1470_v45 }
 0x3cc   : > { %v1786_v17 = vpack.c.bf16 %v1782_v7, %v1782_v7 }
 0x3cd   : > { %v1482_v51 = vrot.slane %v1475_v46, %v5442_v49  ;;  %v1490_v52 = vrot.slane %v4475_v47, %v5442_v49  ;;  %v1498_v53 = vrot.slane %v1491_v48, %v5442_v49  ;;  %v1506_v54 = vrot.slane %v4476_v50, %v5442_v49 }
 0x3cf   : > { %v1507_v55 = vcombine.low %v1482_v51, %v1490_v52  ;;  %v1523_v57 = vcombine.low %v1498_v53, %v1506_v54  ;;  %v1508_v58 = vcombine.high %v1482_v51, %v1490_v52  ;;  %v1524_v59 = vcombine.high %v1498_v53, %v1506_v54 }
 0x3d1   : > { %v1515_v61 = vrot.slane %v1507_v55, %v5445_v56  ;;  %v1531_v62 = vrot.slane %v1523_v57, %v5445_v56  ;;  %v1522_v63 = vrot.slane %v1508_v58, %v5445_v56  ;;  %v1538_v0 = vrot.slane %v1524_v59, %v5445_v56 }
 0x3d3   : > { %v1539_v3 = vcombine.low %v1515_v61, %v1531_v62  ;;  %v1540_v25 = vcombine.high %v1515_v61, %v1531_v62  ;;  %v1541_v4 = vcombine.low %v1522_v63, %v1538_v0  ;;  %v1542_v5 = vcombine.high %v1522_v63, %v1538_v0 }
 0x3d5   : > { %v1543_v9 = vpack.c.bf16 %v1539_v3, %v1539_v3  ;;  %v1544_v10 = vpack.c.bf16 %v1540_v25, %v1540_v25  ;;  %v1545_v13 = vpack.c.bf16 %v1541_v4, %v1541_v4  ;;  %v1546_v14 = vpack.c.bf16 %v1542_v5, %v1542_v5  ;;  %v4946_v3 = vld [vmem:[%s6212_s27 + $0x30] sm:$0xff]  }
 0x3d7   : > { %v1794_v11 = vsel %vm1792_vm3, %v1543_v9, 0  ;;  %v1840_v12 = vsel %vm1792_vm3, %v1544_v10, 0  ;;  %v1886_v28 = vsel %vm1792_vm3, %v1545_v13, 0  ;;  %v1932_v8 = vsel %vm1792_vm3, %v1546_v14, 0 }
 0x3d8   : > { %4730 = vmatpush3.bf16.msra.mxu0 %v1794_v11  ;;  %4736 = vmatpush3.bf16.msra.mxu1 %v1840_v12  ;;  %v4947_v12 = vld [vmem:[%s6212_s27 + $0x38] sm:$0xff]  }
 0x3d9   : > { %4741 = vmatprep.subr.bf16.mxu0 %v5132_v20  ;;  %4747 = vmatprep.subr.bf16.mxu1 %v5132_v20 }
 0x3db   : > { %4732 = vmatmul.mubr.msk.bf16.vlgmr.msra.gmra.mrb[4].mxu0 %vm1740_vm2, %v1785_v15  ;;  %4738 = vmatmul.mubr.msk.bf16.vlgmr.msra.gmra.mrb[20].mxu1 %vm1740_vm2, %v1786_v17 }
 0x3dc   : > { %4742 = vmatpush3.bf16.msra.mxu0 %v1886_v28  ;;  %4748 = vmatpush3.bf16.msra.mxu1 %v1932_v8 }
 0x3dd   : > { %4743 = vmatprep.mubr.msk.bf16.mxu0 %vm5136_vm0, %v5132_v20  ;;  %4749 = vmatprep.mubr.msk.bf16.mxu1 %vm5136_vm0, %v5132_v20 }
 0x3de   : > { %4753 = vmatprep.subr.bf16.mxu0 %v5132_v20  ;;  %4773 = vmatprep.subr.bf16.mxu1 %v5132_v20 }
 0x3eb   : > { %v1773_v19 = vpop.xlane.xlu1 %1772 }
 0x3ec   : > { %5040 = vrcp.f32 %v1773_v19 }
 0x3f3   : > { %v1776_v21 = vpop.xlane.xlu0 %1775 }
 0x3f4   : > { %5042 = vrcp.f32 %v1776_v21 }
 0x3f6   : > { %v5041_v22 = vpop.eup %5040 }
 0x3f7   : > { %v1783_v23 = vmul.f32 %v5041_v22, %v5523_v16  ;;  %v4941_v16 = vld [vmem:[%s6212_s27 + $0x8] sm:$0xff]  }
 0x3f9   : > { %v1787_v24 = vpack.c.bf16 %v1783_v23, %v1783_v23 }
 0x3fb   : > { %4744 = vmatmul.mubr.msk.bf16.vlgmr.msra.gmra.mrb[8].mxu0 %vm1740_vm2, %v1787_v24 }
 0x3fc   : > { %4769 = vmatprep.mubr.msk.bf16.mxu0 %vm5136_vm0, %v5132_v20  ;;  %4754 = vmatpush3.bf16.msra.mxu0 %v4940_v32 }
 0x3fd   : > { %4755 = vmatprep.subr.bf16.mxu0 %v5132_v20 }
 0x3fe   : > { %v5043_v26 = vpop.eup %5042 }
 0x3ff   : > { %v1784_v30 = vmul.f32 %v5043_v26, %v5527_v18  ;;  %v4942_v18 = vld [vmem:[%s6212_s27 + $0x10] sm:$0xff]  }
 0x400   : > { %4756 = vmatpush3.bf16.msra.mxu0 %v4941_v16 }
 0x401   : > { %v1788_v31 = vpack.c.bf16 %v1784_v30, %v1784_v30  ;;  %4757 = vmatprep.subr.bf16.mxu0 %v5132_v20 }
 0x403   : > { %4750 = vmatmul.mubr.msk.bf16.vlgmr.msra.gmra.mrb[24].mxu1 %vm1740_vm2, %v1788_v31 }
 0x404   : > { %4789 = vmatprep.mubr.msk.bf16.mxu1 %vm5136_vm0, %v5132_v20  ;;  %4758 = vmatpush3.bf16.msra.mxu0 %v4942_v18 }
 0x405   : > { %4759 = vmatprep.subr.bf16.mxu0 %v5132_v20 }
 0x408   : > { %4760 = vmatpush3.bf16.msra.mxu0 %v4943_v33 }
 0x409   : > { %4761 = vmatprep.subr.bf16.mxu0 %v5132_v20 }
 0x40c   : > { %4762 = vmatpush3.bf16.msra.mxu0 %v4944_v34 }
 0x40d   : > { %4763 = vmatprep.subr.bf16.mxu0 %v5132_v20 }
 0x410   : > { %4764 = vmatpush3.bf16.msra.mxu0 %v4945_v35 }
 0x411   : > { %4765 = vmatprep.subr.bf16.mxu0 %v5132_v20 }
 0x414   : > { %4766 = vmatpush3.bf16.msra.mxu0 %v4946_v3  ;;  %v5066_v3 = vld [vmem:[%s5372_s19] sm:$0xff]  ;;  %s6218_s19 = smov 64  }
 0x415   : > { %4767 = vmatprep.subr.bf16.mxu0 %v5132_v20 }
 0x418   : > { %4768 = vmatpush3.bf16.msra.mxu0 %v4947_v12 }
 0x4ae   : > { %v1830_v36 = vpop.f32.mrb[4].mxu0  ;;  %v1876_v37 = vpop.f32.mrb[20].mxu1 }
 0x4af   : > { %v4733_v38 = vpop.f32.mrb[5].mxu0  ;;  %v4739_v39 = vpop.f32.mrb[21].mxu1 }
 0x4b0   : > { %v1833_v40 = vpop.f32.mrb[6].mxu0  ;;  %v1879_v41 = vpop.f32.mrb[22].mxu1  ;;  %v4948_v39 = vld [vmem:[%s6213_s11] ss:$8 sps:$4 sm:$0xff]  }
 0x4b1   : > { %v4734_v42 = vpop.f32.mrb[7].mxu0  ;;  %v4740_v43 = vpop.f32.mrb[23].mxu1  ;;  %v4950_v40 = vld [vmem:[%s6213_s11 + $0x4] ss:$8 sps:$4 sm:$0xff]   ;;  %v4951_v41 = vld [vmem:[%s6213_s11 + $0x10] ss:$8 sps:$4 sm:$0xff]  }
 0x4b2   : > { %2475 = vmatprep.subr.bf16.mxu0 %v4950_v40  ;;  %v4953_v42 = vld [vmem:[%s6213_s11 + $0x14] ss:$8 sps:$4 sm:$0xff]   ;;  %v4956_v43 = vld [vmem:[%s6213_s11 + $0x24] ss:$8 sps:$4 sm:$0xff]   ;;  %v4497_v40 = vld [vmem:[%s6156_s16] ss:$0 sm:$0xff] }
 0x4ce   : > { %v1922_v44 = vpop.f32.mrb[8].mxu0 }
 0x4cf   : > { %v1974_v45 = vcombine.low %v1830_v36, %v1922_v44  ;;  %v1975_v46 = vcombine.high %v1830_v36, %v1922_v44  ;;  %v4745_v47 = vpop.f32.mrb[9].mxu0  ;;  %v4954_v44 = vld [vmem:[%s6213_s11 + $0x20] ss:$8 sps:$4 sm:$0xff]  }
 0x4d0   : > { %v1925_v48 = vpop.f32.mrb[10].mxu0  ;;  %v4957_v47 = vld [vmem:[%s6213_s11 + $0x30] ss:$8 sps:$4 sm:$0xff]  }
 0x4d1   : > { %v4746_v50 = vpop.f32.mrb[11].mxu0  ;;  %v1982_v57 = vrot.slane %v1974_v45, %v5442_v49  ;;  %v1989_v58 = vrot.slane %v1975_v46, %v5442_v49  ;;  %v4959_v45 = vld [vmem:[%s6213_s11 + $0x34] ss:$8 sps:$4 sm:$0xff]   ;;  %v4962_v48 = vld [vmem:[%s6213_s11 + $0x44] ss:$8 sps:$4 sm:$0xff]  }
 0x4d2   : > { %v4960_v50 = vld [vmem:[%s6213_s11 + $0x40] ss:$8 sps:$4 sm:$0xff]  }
 0x4d6   : > { %v1968_v51 = vpop.f32.mrb[24].mxu1 }
 0x4d7   : > { %v1990_v52 = vcombine.low %v1876_v37, %v1968_v51  ;;  %v1991_v53 = vcombine.high %v1876_v37, %v1968_v51  ;;  %v4751_v54 = vpop.f32.mrb[25].mxu1  ;;  %v4965_v51 = vld [vmem:[%s6213_s11 + $0x54] ss:$8 sps:$4 sm:$0xff]  }
 0x4d8   : > { %v1971_v55 = vpop.f32.mrb[26].mxu1  ;;  %v4966_v54 = vld [vmem:[%s6213_s11 + $0x60] ss:$8 sps:$4 sm:$0xff]  }
 0x4d9   : > { %v1998_v59 = vrot.slane %v1990_v52, %v5442_v49  ;;  %v2005_v60 = vrot.slane %v1991_v53, %v5442_v49  ;;  %v4752_v61 = vpop.f32.mrb[27].mxu1  ;;  %v4963_v52 = vld [vmem:[%s6213_s11 + $0x50] ss:$8 sps:$4 sm:$0xff]   ;;  %v4968_v53 = vld [vmem:[%s6213_s11 + $0x64] ss:$8 sps:$4 sm:$0xff]  }
 0x4da   : > { %v4971_v55 = vld [vmem:[%s6213_s11 + $0x74] ss:$8 sps:$4 sm:$0xff]   ;;  %v4487_v61 = vld [vmem:[%s6216_s29] ss:$0 sm:$0xff]  ;;  %s6224_s29 = sld [smem:[#allocation25_spill]] }
 0x4db   : > { %v2006_v62 = vcombine.low %v1982_v57, %v1998_v59  ;;  %v2007_v63 = vcombine.high %v1982_v57, %v1998_v59  ;;  %v2022_v0 = vcombine.low %v1989_v58, %v2005_v60  ;;  %v2023_v1 = vcombine.high %v1989_v58, %v2005_v60  ;;  %v4969_v57 = vld [vmem:[%s6213_s11 + $0x70] ss:$8 sps:$4 sm:$0xff]   ;;  %v810_v58 = vld [vmem:[%s801_s20] sm:$0xff]  ;;  %v811_v59 = vld [vmem:[%s801_s20 + $0x8] sm:$0xff]  ;;  %s4591_s20 = sshll.u32 %s5291_s7, 7  ;;  %s5139_s7 = smov [#allocation2]  }
 0x4dc   : > { %v2366_v60 = vpack.c.bf16 %v811_v59, %v810_v58 }
 0x4dd   : > { %v2014_v25 = vrot.slane %v2006_v62, %v5445_v56  ;;  %v2021_v4 = vrot.slane %v2007_v63, %v5445_v56  ;;  %v2030_v5 = vrot.slane %v2022_v0, %v5445_v56  ;;  %v2037_v6 = vrot.slane %v2023_v1, %v5445_v56 }
 0x4df   : > { %v2042_v7 = vcombine.low %v2014_v25, %v2021_v4  ;;  %v4485_v9 = vcombine.high %v2014_v25, %v2021_v4  ;;  %v2058_v10 = vcombine.low %v2030_v5, %v2037_v6  ;;  %v4486_v11 = vcombine.high %v2030_v5, %v2037_v6 }
 0x4e0   : > { %s6098_s11 = scalar_lea.hbm %s6224_s29, %s4591_s20 }
 0x4e1   : > { %v2049_v13 = vrot.slane %v2042_v7, %v5442_v49  ;;  %v2057_v14 = vrot.slane %v4485_v9, %v5442_v49  ;;  %v2065_v15 = vrot.slane %v2058_v10, %v5442_v49  ;;  %v2073_v17 = vrot.slane %v4486_v11, %v5442_v49 }
 0x4e3   : > { %v2075_v28 = vcombine.high %v2049_v13, %v2057_v14  ;;  %v2091_v8 = vcombine.high %v2065_v15, %v2073_v17  ;;  %v2074_v19 = vcombine.low %v2049_v13, %v2057_v14  ;;  %v2090_v21 = vcombine.low %v2065_v15, %v2073_v17  ;;  %v2383_v14 = vld [vmem:[%s6152_s12] sm:$0x3] }
 0x4e4   : > { %v2388_v15 = vrot.slane %v2383_v14, %v5411_v29  ;;  %v2392_v17 = vrot.slane %v2383_v14, %v5402_v27 }
 0x4e5   : > { %v2089_v22 = vrot.slane %v2075_v28, %v5445_v56  ;;  %v2105_v23 = vrot.slane %v2091_v8, %v5445_v56  ;;  %v2082_v24 = vrot.slane %v2074_v19, %v5445_v56  ;;  %v2098_v26 = vrot.slane %v2090_v21, %v5445_v56 }
 0x4e7   : > { %v2108_v30 = vcombine.low %v2089_v22, %v2105_v23  ;;  %v2107_v31 = vcombine.high %v2082_v24, %v2098_v26  ;;  %v2109_v32 = vcombine.high %v2089_v22, %v2105_v23  ;;  %v2106_v16 = vcombine.low %v2082_v24, %v2098_v26 }
 0x4e9   : > { %2115 = vrot.lane.b32.xlu1 %v2108_v30, %s6178_s1  ;;  %2111 = vrot.lane.b32.xlu0 %v2107_v31, %s6176_s5 }
 0x4ed   : > { %2119 = vrot.lane.b32.xlu1 %v2109_v32, %s6180_s25  ;;  %s6214_s25 = sld [smem:[#allocation20_spill]] }
 0x4f3   : > { %v4972_v46 = vld [vmem:[%s6214_s25] sm:$0xff]   ;;  %v4973_v6 = vld [vmem:[%s6214_s25 + $0x8] sm:$0xff]   ;;  %v4974_v7 = vld [vmem:[%s6214_s25 + $0x10] sm:$0xff]  }
 0x4f4   : > { %4774 = vmatpush3.bf16.msra.mxu1 %v4972_v46  ;;  %v4975_v9 = vld [vmem:[%s6214_s25 + $0x18] sm:$0xff]   ;;  %v4976_v10 = vld [vmem:[%s6214_s25 + $0x20] sm:$0xff]   ;;  %v4977_v11 = vld [vmem:[%s6214_s25 + $0x28] sm:$0xff]  }
 0x4f5   : > { %4775 = vmatprep.subr.bf16.mxu1 %v5132_v20  ;;  %v4978_v12 = vld [vmem:[%s6214_s25 + $0x30] sm:$0xff]   ;;  %v4979_v13 = vld [vmem:[%s6214_s25 + $0x38] sm:$0xff]  }
 0x4f8   : > { %4776 = vmatpush3.bf16.msra.mxu1 %v4973_v6 }
 0x4f9   : > { %4777 = vmatprep.subr.bf16.mxu1 %v5132_v20 }
 0x4fc   : > { %4778 = vmatpush3.bf16.msra.mxu1 %v4974_v7 }
 0x4fd   : > { %4779 = vmatprep.subr.bf16.mxu1 %v5132_v20 }
 0x500   : > { %4780 = vmatpush3.bf16.msra.mxu1 %v4975_v9 }
 0x501   : > { %4781 = vmatprep.subr.bf16.mxu1 %v5132_v20 }
 0x504   : > { %4782 = vmatpush3.bf16.msra.mxu1 %v4976_v10 }
 0x505   : > { %4783 = vmatprep.subr.bf16.mxu1 %v5132_v20 }
 0x508   : > { %4784 = vmatpush3.bf16.msra.mxu1 %v4977_v11 }
 0x509   : > { %4785 = vmatprep.subr.bf16.mxu1 %v5132_v20 }
 0x50c   : > { %4786 = vmatpush3.bf16.msra.mxu1 %v4978_v12 }
 0x50d   : > { %4787 = vmatprep.subr.bf16.mxu1 %v5132_v20 }
 0x510   : > { %4788 = vmatpush3.bf16.msra.mxu1 %v4979_v13 }
 0x511   : > { %4793 = vmatprep.subr.bf16.mxu1 %v5132_v20 }
 0x55b   : > { %v2116_v18 = vpop.permute.xlu1 %2115  ;;  %v2112_v33 = vpop.permute.xlu0 %2111 }
 0x55c   : > { %v2122_v34 = vsel %vm1547_vm1, %v2106_v16, %v2112_v33 }
 0x55d   : > { %v2124_v36 = vsel %vm2123_vm4, %v2122_v34, %v2116_v18 }
 0x55f   : > { %v2120_v35 = vpop.permute.xlu1 %2119 }
 0x560   : > { %v2126_v37 = vsel %vm2125_vm5, %v2124_v36, %v2120_v35 }
 0x561   : > { %v2127_v38 = vpack.c.bf16 %v2126_v37, %v2126_v37 }
 0x563   : > { %4770 = vmatmul.mubr.bf16.vlgmr.msra.gmra.mrb[12].mxu0 %v2127_v38  ;;  %v4496_v38 = vld [vmem:[%s6155_s15] ss:$0 sm:$0xff] }
 0x564   : > { %2507 = vmatprep.mubr.bf16.mxu0 %v5131_v2  ;;  %2476 = vmatpush1.bf16.msra.mxu0 %v4948_v39 }
 0x565   : > { %2477 = vmatprep.subr.bf16.mxu0 %v4953_v42 }
 0x568   : > { %2478 = vmatpush1.bf16.msra.mxu0 %v4951_v41 }
 0x569   : > { %2479 = vmatprep.subr.bf16.mxu0 %v4956_v43 }
 0x56c   : > { %2480 = vmatpush1.bf16.msra.mxu0 %v4954_v44 }
 0x56d   : > { %2481 = vmatprep.subr.bf16.mxu0 %v4959_v45 }
 0x570   : > { %2482 = vmatpush1.bf16.msra.mxu0 %v4957_v47 }
 0x571   : > { %2483 = vmatprep.subr.bf16.mxu0 %v4962_v48 }
 0x574   : > { %2484 = vmatpush1.bf16.msra.mxu0 %v4960_v50 }
 0x575   : > { %2485 = vmatprep.subr.bf16.mxu0 %v4965_v51 }
 0x578   : > { %2486 = vmatpush1.bf16.msra.mxu0 %v4963_v52 }
 0x579   : > { %2487 = vmatprep.subr.bf16.mxu0 %v4968_v53 }
 0x57c   : > { %2488 = vmatpush1.bf16.msra.mxu0 %v4966_v54 }
 0x57d   : > { %2489 = vmatprep.subr.bf16.mxu0 %v4971_v55 }
 0x580   : > { %2490 = vmatpush1.bf16.msra.mxu0 %v4969_v57 }
 0x581   : > { %4817 = vmatprep.subr.bf16.mxu0 %v5132_v20 }
 0x583   : > { %2508 = vmatmul.mubr.bf16.vlgmr.msra.gmra.mrb[16].mxu0 %v2366_v60 }
 0x584   : > { %4819 = vmatprep.mubr.msk.bf16.mxu0 %vm5136_vm0, %v5132_v20 }
 0x636   : > { %v2216_v62 = vpop.f32.mrb[12].mxu0 }
 0x637   : > { %v2217_v63 = vadd.f32 %v4487_v61, %v2216_v62  ;;  %v4771_v0 = vpop.f32.mrb[13].mxu0 }
 0x638   : > { %v2219_v1 = vpop.f32.mrb[14].mxu0 }
 0x639   : > { %v2224_v25 = vadd.f32 %v5066_v3, %v2217_v63  ;;  %v4772_v4 = vpop.f32.mrb[15].mxu0 }
 0x63b   : > { %2225 = vadd.xlane.f32.xlu0 %v2224_v25  ;;  %v2229_v5 = vmul.f32 %v2224_v25, %v2224_v25 }
 0x63d   : > { %2230 = vadd.xlane.f32.xlu1 %v2229_v5 }
 0x656   : > { %v2509_v28 = vpop.f32.mrb[16].mxu0 }
 0x657   : > { %v2510_v8 = vadd.f32 %v2509_v28, %v2388_v15  ;;  %v2511_v19 = vpop.f32.mrb[17].mxu0 }
 0x658   : > { %v5721_v21 = vadd.f32 %v2511_v19, %v2392_v17  ;;  %v2513_v22 = vpop.f32.mrb[18].mxu0 }
 0x659   : > { %v2514_v23 = vadd.f32 %v2513_v22, %v2388_v15  ;;  %2688 = vrot.lane.b32.xlu0 %v2510_v8, %s6217_s28  ;;  %v2515_v24 = vpop.f32.mrb[19].mxu0 }
 0x65a   : > { %v5724_v26 = vadd.f32 %v2515_v24, %v2392_v17 }
 0x65b   : > { %2690 = vrot.lane.b32.xlu1 %v2514_v23, %s6217_s28 }
 0x65d   : > { %2694 = vrot.lane.b32.xlu0 %v2510_v8, %s6218_s19 }
 0x65f   : > { %2696 = vrot.lane.b32.xlu1 %v2514_v23, %s6218_s19 }
 0x661   : > { %2700 = vrot.lane.b32.xlu0 %v2510_v8, %s6219_s8 }
 0x663   : > { %2702 = vrot.lane.b32.xlu1 %v2514_v23, %s6219_s8 }
 0x6c8   : > { %v2226_v30 = vpop.xlane.xlu0 %2225 }
 0x6c9   : > { %v2228_v31 = vmul.f32 0.0078125, %v2226_v30 }
 0x6ca   : > { %v2231_v32 = vpop.xlane.xlu1 %2230 }
 0x6cb   : > { %v2233_v16 = vmul.f32 %v2228_v31, %v2228_v31  ;;  %v2232_v18 = vmul.f32 0.0078125, %v2231_v32  ;;  %v2236_v36 = vsub.f32 %v2224_v25, %v2228_v31 }
 0x6cc   : > { %v2689_v44 = vpop.permute.xlu0 %2688 }
 0x6cd   : > { %v2234_v33 = vsub.f32 %v2232_v18, %v2233_v16 }
 0x6ce   : > { %v2691_v45 = vpop.permute.xlu1 %2690 }
 0x6cf   : > { %v2235_v34 = vmax.f32 %v2234_v33, 0.0 }
 0x6d0   : > { %v2695_v46 = vpop.permute.xlu0 %2694 }
 0x6d1   : > { %v2237_v35 = vadd.f32 1e-05, %v2235_v34  ;;  %v2706_v47 = vcombine.low %v2510_v8, %v2695_v46  ;;  %v2707_v50 = vcombine.high %v2510_v8, %v2695_v46 }
 0x6d2   : > { %v2697_v48 = vpop.permute.xlu1 %2696 }
 0x6d3   : > { %5044 = vrsqrt.f32 %v2237_v35  ;;  %v2774_v51 = vcombine.low %v2514_v23, %v2697_v48  ;;  %v2775_v52 = vcombine.high %v2514_v23, %v2697_v48  ;;  %v2714_v54 = vrot.slane %v2706_v47, %v5442_v49 }
 0x6d4   : > { %v2701_v53 = vpop.permute.xlu0 %2700  ;;  %v2721_v60 = vrot.slane %v2707_v50, %v5442_v49 }
 0x6d5   : > { %v2722_v55 = vcombine.low %v2689_v44, %v2701_v53  ;;  %v2723_v57 = vcombine.high %v2689_v44, %v2701_v53  ;;  %v2782_v58 = vrot.slane %v2774_v51, %v5442_v49  ;;  %v2789_v59 = vrot.slane %v2775_v52, %v5442_v49 }
 0x6d6   : > { %v2703_v61 = vpop.permute.xlu1 %2702 }
 0x6d7   : > { %v2790_v62 = vcombine.low %v2691_v45, %v2703_v61  ;;  %v2791_v63 = vcombine.high %v2691_v45, %v2703_v61  ;;  %v2730_v0 = vrot.slane %v2722_v55, %v5442_v49  ;;  %v2737_v1 = vrot.slane %v2723_v57, %v5442_v49 }
 0x6d9   : > { %v2798_v3 = vrot.slane %v2790_v62, %v5442_v49  ;;  %v2805_v25 = vrot.slane %v2791_v63, %v5442_v49  ;;  %v2738_v4 = vcombine.low %v2714_v54, %v2730_v0  ;;  %v2739_v5 = vcombine.high %v2714_v54, %v2730_v0 }
 0x6da   : > { %v2754_v6 = vcombine.low %v2721_v60, %v2737_v1  ;;  %v2755_v7 = vcombine.high %v2721_v60, %v2737_v1 }
 0x6db   : > { %v2806_v9 = vcombine.low %v2782_v58, %v2798_v3  ;;  %v2807_v10 = vcombine.high %v2782_v58, %v2798_v3  ;;  %v2822_v11 = vcombine.low %v2789_v59, %v2805_v25  ;;  %v2823_v12 = vcombine.high %v2789_v59, %v2805_v25 }
 0x6dc   : > { %v2746_v13 = vrot.slane %v2738_v4, %v5445_v56  ;;  %v2753_v14 = vrot.slane %v2739_v5, %v5445_v56  ;;  %v2762_v15 = vrot.slane %v2754_v6, %v5445_v56  ;;  %v2769_v17 = vrot.slane %v2755_v7, %v5445_v56 }
 0x6dd   : > { %v5045_v37 = vpop.eup %5044  ;;  %v2814_v28 = vrot.slane %v2806_v9, %v5445_v56  ;;  %v2821_v8 = vrot.slane %v2807_v10, %v5445_v56  ;;  %v2830_v19 = vrot.slane %v2822_v11, %v5445_v56  ;;  %v2837_v22 = vrot.slane %v2823_v12, %v5445_v56  ;;  %v4498_v11 = vld [vmem:[%s6220_s10] ss:$0 sm:$0xff]  ;;  %s6225_s10 = smov %s6224_s29 }
 0x6de   : > { %v2239_v39 = vmul.f32 %v5045_v37, %v2236_v36  ;;  %v2842_v23 = vcombine.low %v2746_v13, %v2753_v14  ;;  %v4525_v24 = vcombine.high %v2746_v13, %v2753_v14  ;;  %v2858_v30 = vcombine.low %v2762_v15, %v2769_v17 }
 0x6df   : > { %v4526_v31 = vcombine.high %v2762_v15, %v2769_v17  ;;  %v2910_v32 = vcombine.low %v2814_v28, %v2821_v8  ;;  %v4527_v16 = vcombine.high %v2814_v28, %v2821_v8  ;;  %v2926_v18 = vcombine.low %v2830_v19, %v2837_v22 }
 0x6e0   : > { %v2246_v41 = vmul.f32 %v4496_v38, %v2239_v39  ;;  %v4528_v33 = vcombine.high %v2830_v19, %v2837_v22  ;;  %v2849_v34 = vrot.slane %v2842_v23, %v5442_v49  ;;  %v2857_v35 = vrot.slane %v4525_v24, %v5442_v49 }
 0x6e1   : > { %v2865_v36 = vrot.slane %v2858_v30, %v5442_v49  ;;  %v2873_v37 = vrot.slane %v4526_v31, %v5442_v49  ;;  %v2917_v38 = vrot.slane %v2910_v32, %v5442_v49  ;;  %v2925_v39 = vrot.slane %v4527_v16, %v5442_v49 }
 0x6e2   : > { %v5737_v42 = vadd.f32 %v4497_v40, %v2246_v41  ;;  %v2933_v40 = vrot.slane %v2926_v18, %v5442_v49  ;;  %v2941_v41 = vrot.slane %v4528_v33, %v5442_v49  ;;  %v2875_v47 = vcombine.high %v2849_v34, %v2857_v35 }
 0x6e3   : > { %v2890_v44 = vcombine.low %v2865_v36, %v2873_v37  ;;  %v2942_v45 = vcombine.low %v2917_v38, %v2925_v39  ;;  %v2891_v48 = vcombine.high %v2865_v36, %v2873_v37  ;;  %v2943_v50 = vcombine.high %v2917_v38, %v2925_v39 }
 0x6e4   : > { %v2254_v43 = vpack.c.bf16 %v5737_v42, %v5737_v42  ;;  %v2958_v46 = vcombine.low %v2933_v40, %v2941_v41  ;;  %v2959_v51 = vcombine.high %v2933_v40, %v2941_v41  ;;  %v2889_v57 = vrot.slane %v2875_v47, %v5445_v56 }
 0x6e5   : > { %v2898_v53 = vrot.slane %v2890_v44, %v5445_v56  ;;  %v2950_v54 = vrot.slane %v2942_v45, %v5445_v56  ;;  %v2905_v58 = vrot.slane %v2891_v48, %v5445_v56  ;;  %v2957_v59 = vrot.slane %v2943_v50, %v5445_v56 }
 0x6e6   : > { %4790 = vmatmul.mubr.bf16.vlgmr.msra.gmra.mrb[28].mxu1 %v2254_v43  ;;  %v2874_v43 = vcombine.low %v2849_v34, %v2857_v35  ;;  %v2966_v55 = vrot.slane %v2958_v46, %v5445_v56  ;;  %v2973_v60 = vrot.slane %v2959_v51, %v5445_v56 }
 0x6e7   : > { %4795 = vmatprep.mubr.msk.bf16.mxu1 %vm5136_vm0, %v5132_v20  ;;  %v2908_v1 = vcombine.low %v2889_v57, %v2905_v58  ;;  %v2909_v25 = vcombine.high %v2889_v57, %v2905_v58 }
 0x6e8   : > { %v2882_v52 = vrot.slane %v2874_v43, %v5445_v56  ;;  %v2974_v62 = vcombine.low %v2950_v54, %v2966_v55  ;;  %v2975_v0 = vcombine.high %v2950_v54, %v2966_v55  ;;  %v2976_v3 = vcombine.low %v2957_v59, %v2973_v60 }
 0x6e9   : > { %v2977_v4 = vcombine.high %v2957_v59, %v2973_v60 }
 0x6ea   : > { %v2906_v61 = vcombine.low %v2882_v52, %v2898_v53  ;;  %v2907_v63 = vcombine.high %v2882_v52, %v2898_v53  ;;  %v2980_v7 = vpack.c.bf16 %v2976_v3, %v2908_v1 }
 0x6eb   : > { %v5775_v9 = vpack.c.bf16 %v2977_v4, %v2909_v25 }
 0x6ec   : > { %v2978_v5 = vpack.c.bf16 %v2974_v62, %v2906_v61  ;;  %v2979_v6 = vpack.c.bf16 %v2975_v0, %v2907_v63  ;;  %v3374_v1 = vsel %vm1547_vm1, %v2980_v7, 0 }
 0x6ed   : > { %v3420_v4 = vsel %vm1547_vm1, %v5775_v9, 0 }
 0x6ee   : > { %v3282_v10 = vsel %vm1547_vm1, %v2978_v5, 0  ;;  %v3328_v58 = vsel %vm1547_vm1, %v2979_v6, 0 }
 0x6ef   : > { %4794 = vmatpush3.bf16.xpose.msra.mxu1 %v3282_v10  ;;  %v4537_v10 = vld [vmem:[%s807_s30] ss:$0 sm:$0xff]  ;;  %s6222_s30 = sld [smem:[#allocation23_spill]] }
 0x6f0   : > { %4799 = vmatprep.subr.bf16.mxu1 %v5132_v20 }
 0x7b9   : > { %v2360_v12 = vpop.f32.mrb[28].mxu1 }
 0x7ba   : > { %v2361_v13 = vadd.f32 %v4498_v11, %v2360_v12  ;;  %v4791_v14 = vpop.f32.mrb[29].mxu1 }
 0x7bb   : > { %v2363_v15 = vpop.f32.mrb[30].mxu1 }
 0x7bc   : > { %2540 = vrot.lane.b32.xlu1 %v2361_v13, %s6218_s19  ;;  %2537 = vrot.lane.b32.xlu0 %v2361_v13, %s6217_s28  ;;  %v4792_v17 = vpop.f32.mrb[31].mxu1 }
 0x7c0   : > { %2986 = vrot.lane.b32.xlu1 %v5724_v26, %s6217_s28  ;;  %2543 = vrot.lane.b32.xlu0 %v2361_v13, %s6219_s8 }
 0x7c4   : > { %2984 = vrot.lane.b32.xlu0 %v5721_v21, %s6217_s28 }
 0x82e   : > { %v2541_v28 = vpop.permute.xlu1 %2540  ;;  %v2538_v8 = vpop.permute.xlu0 %2537 }
 0x82f   : > { %v2546_v19 = vcombine.low %v2361_v13, %v2541_v28  ;;  %v2547_v22 = vcombine.high %v2361_v13, %v2541_v28 }
 0x831   : > { %v2554_v31 = vrot.slane %v2546_v19, %v5442_v49  ;;  %v2561_v32 = vrot.slane %v2547_v22, %v5442_v49 }
 0x832   : > { %v2544_v23 = vpop.permute.xlu0 %2543 }
 0x833   : > { %v2562_v24 = vcombine.low %v2538_v8, %v2544_v23  ;;  %v2563_v30 = vcombine.high %v2538_v8, %v2544_v23 }
 0x835   : > { %v2570_v16 = vrot.slane %v2562_v24, %v5442_v49  ;;  %v2577_v18 = vrot.slane %v2563_v30, %v5442_v49 }
 0x837   : > { %v2578_v33 = vcombine.low %v2554_v31, %v2570_v16  ;;  %v2579_v34 = vcombine.high %v2554_v31, %v2570_v16  ;;  %v2594_v35 = vcombine.low %v2561_v32, %v2577_v18  ;;  %v2595_v36 = vcombine.high %v2561_v32, %v2577_v18 }
 0x839   : > { %v2586_v37 = vrot.slane %v2578_v33, %v5445_v56  ;;  %v2593_v38 = vrot.slane %v2579_v34, %v5445_v56  ;;  %v2602_v39 = vrot.slane %v2594_v35, %v5445_v56  ;;  %v2609_v40 = vrot.slane %v2595_v36, %v5445_v56 }
 0x83b   : > { %v2614_v41 = vcombine.low %v2586_v37, %v2593_v38  ;;  %v4523_v43 = vcombine.high %v2586_v37, %v2593_v38  ;;  %v2630_v44 = vcombine.low %v2602_v39, %v2609_v40  ;;  %v4524_v45 = vcombine.high %v2602_v39, %v2609_v40 }
 0x83d   : > { %v2621_v46 = vrot.slane %v2614_v41, %v5442_v49  ;;  %v2629_v47 = vrot.slane %v4523_v43, %v5442_v49  ;;  %v2637_v48 = vrot.slane %v2630_v44, %v5442_v49  ;;  %v2645_v50 = vrot.slane %v4524_v45, %v5442_v49  ;;  %v2987_v43 = vpop.permute.xlu1 %2986 }
 0x83f   : > { %v2646_v51 = vcombine.low %v2621_v46, %v2629_v47  ;;  %v2662_v52 = vcombine.low %v2637_v48, %v2645_v50  ;;  %v2647_v59 = vcombine.high %v2621_v46, %v2629_v47  ;;  %v2663_v60 = vcombine.high %v2637_v48, %v2645_v50  ;;  %v5836_v47 = vpop.permute.xlu0 %2984 }
 0x841   : > { %v2654_v53 = vrot.slane %v2646_v51, %v5445_v56  ;;  %v2670_v54 = vrot.slane %v2662_v52, %v5445_v56  ;;  %v2661_v63 = vrot.slane %v2647_v59, %v5445_v56  ;;  %v2677_v0 = vrot.slane %v2663_v60, %v5445_v56 }
 0x843   : > { %v2678_v55 = vcombine.low %v2654_v53, %v2670_v54  ;;  %v2679_v61 = vcombine.high %v2654_v53, %v2670_v54  ;;  %v2680_v3 = vcombine.low %v2661_v63, %v2677_v0  ;;  %v2681_v5 = vcombine.high %v2661_v63, %v2677_v0 }
 0x845   : > { %v2682_v57 = vpack.c.bf16 %v2678_v55, %v2678_v55  ;;  %v2683_v62 = vpack.c.bf16 %v2679_v61, %v2679_v61  ;;  %v2684_v25 = vpack.c.bf16 %v2680_v3, %v2680_v3  ;;  %v2685_v6 = vpack.c.bf16 %v2681_v5, %v2681_v5 }
 0x847   : > { %4796 = vmatmul.mubr.msk.bf16.vlgmr.msra.gmra.mrb[32].mxu1 %vm1547_vm1, %v2682_v57 }
 0x848   : > { %4800 = vmatpush3.bf16.xpose.msra.mxu1 %v3328_v58  ;;  %4801 = vmatprep.mubr.msk.bf16.mxu1 %vm5136_vm0, %v5132_v20 }
 0x849   : > { %4805 = vmatprep.subr.bf16.mxu1 %v5132_v20 }
 0x84f   : > { %4802 = vmatmul.mubr.msk.bf16.vlgmr.msra.gmra.mrb[36].mxu1 %vm1547_vm1, %v2683_v62 }
 0x850   : > { %4806 = vmatpush3.bf16.xpose.msra.mxu1 %v3374_v1  ;;  %4807 = vmatprep.mubr.msk.bf16.mxu1 %vm5136_vm0, %v5132_v20 }
 0x851   : > { %4811 = vmatprep.subr.bf16.mxu1 %v5132_v20 }
 0x857   : > { %4808 = vmatmul.mubr.msk.bf16.vlgmr.msra.gmra.mrb[40].mxu1 %vm1547_vm1, %v2684_v25 }
 0x858   : > { %4812 = vmatpush3.bf16.xpose.msra.mxu1 %v3420_v4  ;;  %4813 = vmatprep.mubr.msk.bf16.mxu1 %vm5136_vm0, %v5132_v20 }
 0x859   : > { %4823 = vmatprep.subr.bf16.mxu1 %v5132_v20 }
 0x85f   : > { %4814 = vmatmul.mubr.msk.bf16.vlgmr.msra.gmra.mrb[44].mxu1 %vm1547_vm1, %v2685_v6 }
 0x860   : > { %4825 = vmatprep.mubr.msk.bf16.mxu1 %vm5136_vm0, %v5132_v20 }
 0x91a   : > { %v3318_v7 = vpop.f32.mrb[32].mxu1 }
 0x91b   : > { %v3462_v9 = vmul.f32 0.17677669, %v3318_v7  ;;  %v4797_v11 = vpop.f32.mrb[33].mxu1 }
 0x91c   : > { %v3321_v12 = vpop.f32.mrb[34].mxu1 }
 0x91d   : > { %v4798_v13 = vpop.f32.mrb[35].mxu1  ;;  %v3472_v14 = vadd.f32 %v4537_v10, %v3462_v9 }
 0x91f   : > { %v3477_v15 = vsel %vm3476_vm6, %v3472_v14, -inf }
 0x920   : > { %3478 = vmax.xlane.f32.xlu1 %v3477_v15 }
 0x922   : > { %v3364_v17 = vpop.f32.mrb[36].mxu1 }
 0x923   : > { %v3463_v28 = vmul.f32 0.17677669, %v3364_v17  ;;  %v4803_v8 = vpop.f32.mrb[37].mxu1 }
 0x924   : > { %v3367_v19 = vpop.f32.mrb[38].mxu1 }
 0x925   : > { %v4804_v22 = vpop.f32.mrb[39].mxu1  ;;  %v3473_v23 = vadd.f32 %v4537_v10, %v3463_v28 }
 0x927   : > { %v3480_v24 = vsel %vm3476_vm6, %v3473_v23, -inf }
 0x928   : > { %3481 = vmax.xlane.f32.xlu0 %v3480_v24 }
 0x92a   : > { %v3410_v30 = vpop.f32.mrb[40].mxu1 }
 0x92b   : > { %v3464_v31 = vmul.f32 0.17677669, %v3410_v30  ;;  %v4809_v32 = vpop.f32.mrb[41].mxu1 }
 0x92c   : > { %v3413_v16 = vpop.f32.mrb[42].mxu1 }
 0x92d   : > { %v4810_v18 = vpop.f32.mrb[43].mxu1  ;;  %v3474_v33 = vadd.f32 %v4537_v10, %v3464_v31 }
 0x92f   : > { %v3483_v34 = vsel %vm3476_vm6, %v3474_v33, -inf }
 0x930   : > { %3484 = vmax.xlane.f32.xlu0 %v3483_v34 }
 0x932   : > { %v3456_v35 = vpop.f32.mrb[44].mxu1 }
 0x933   : > { %v3465_v36 = vmul.f32 0.17677669, %v3456_v35  ;;  %v4815_v37 = vpop.f32.mrb[45].mxu1 }
 0x934   : > { %v3459_v38 = vpop.f32.mrb[46].mxu1 }
 0x935   : > { %v4816_v39 = vpop.f32.mrb[47].mxu1  ;;  %v3475_v40 = vadd.f32 %v4537_v10, %v3465_v36 }
 0x937   : > { %v3486_v41 = vsel %vm3476_vm6, %v3475_v40, -inf }
 0x938   : > { %3487 = vmax.xlane.f32.xlu1 %v3486_v41 }
 0x946   : > { %2992 = vrot.lane.b32.xlu0 %v5724_v26, %s6218_s19 }
 0x949   : > { %2990 = vrot.lane.b32.xlu1 %v5721_v21, %s6218_s19 }
 0x9ad   : > { %v3479_v44 = vpop.xlane.xlu1 %3478 }
 0x9ae   : > { %v3489_v45 = vsub.f32 %v3472_v14, %v3479_v44 }
 0x9b0   : > { %v3493_v46 = vmul.f32 1.442695, %v3489_v45 }
 0x9b2   : > { %5046 = vpow2.f32 %v3493_v46 }
 0x9b5   : > { %v3482_v48 = vpop.xlane.xlu0 %3481 }
 0x9b6   : > { %v3490_v50 = vsub.f32 %v3473_v23, %v3482_v48 }
 0x9b8   : > { %v3495_v51 = vmul.f32 1.442695, %v3490_v50 }
 0x9ba   : > { %5048 = vpow2.f32 %v3495_v51 }
 0x9bc   : > { %v5838_v52 = vpop.eup %5046 }
 0x9bd   : > { %v3501_v53 = vsel %vm3476_vm6, %v5838_v52, 0.0  ;;  %v3485_v60 = vpop.xlane.xlu0 %3484 }
 0x9be   : > { %3502 = vadd.xlane.f32.xlu0 %v3501_v53  ;;  %v3491_v61 = vsub.f32 %v3474_v33, %v3485_v60 }
 0x9c0   : > { %v3497_v62 = vmul.f32 1.442695, %v3491_v61 }
 0x9c1   : > { %v2993_v25 = vpop.permute.xlu0 %2992 }
 0x9c2   : > { %v3070_v5 = vcombine.low %v5724_v26, %v2993_v25  ;;  %v3071_v6 = vcombine.high %v5724_v26, %v2993_v25 }
 0x9c4   : > { %v5842_v54 = vpop.eup %5048  ;;  %v3078_v12 = vrot.slane %v3070_v5, %v5442_v49  ;;  %v3085_v13 = vrot.slane %v3071_v6, %v5442_v49 }
 0x9c5   : > { %v3504_v55 = vsel %vm3476_vm6, %v5842_v54, 0.0  ;;  %v3488_v57 = vpop.xlane.xlu1 %3487 }
 0x9c6   : > { %3505 = vadd.xlane.f32.xlu1 %v3504_v55  ;;  %v3492_v58 = vsub.f32 %v3475_v40, %v3488_v57 }
 0x9c8   : > { %v3499_v59 = vmul.f32 1.442695, %v3492_v58 }
 0x9c9   : > { %v2991_v7 = vpop.permute.xlu1 %2990 }
 0x9ca   : > { %5050 = vpow2.f32 %v3499_v59  ;;  %v3002_v23 = vcombine.low %v5721_v21, %v2991_v7  ;;  %v3003_v32 = vcombine.high %v5721_v21, %v2991_v7 }
 0x9cb   : > { %5052 = vpow2.f32 %v3497_v62 }
 0x9cc   : > { %v3010_v38 = vrot.slane %v3002_v23, %v5442_v49  ;;  %v3017_v39 = vrot.slane %v3003_v32, %v5442_v49 }
 0x9d4   : > { %2998 = vrot.lane.b32.xlu0 %v5724_v26, %s6219_s8  ;;  %v5850_v63 = vpop.eup %5050 }
 0x9d5   : > { %v3510_v0 = vsel %vm3476_vm6, %v5850_v63, 0.0  ;;  %v5854_v1 = vpop.eup %5052 }
 0x9d6   : > { %v3507_v3 = vsel %vm3476_vm6, %v5854_v1, 0.0 }
 0x9d7   : > { %2996 = vrot.lane.b32.xlu1 %v5721_v21, %s6219_s8 }
 0x9f3   : > { %3511 = vadd.xlane.f32.xlu0 %v3510_v0 }
 0x9fb   : > { %3508 = vadd.xlane.f32.xlu1 %v3507_v3 }
 0xa4b   : > { %v3503_v4 = vpop.xlane.xlu0 %3502 }
 0xa4c   : > { %5054 = vrcp.f32 %v3503_v4 }
 0xa4f   : > { %v2999_v10 = vpop.permute.xlu0 %2998 }
 0xa50   : > { %v3086_v9 = vcombine.low %v2987_v43, %v2999_v10  ;;  %v3087_v11 = vcombine.high %v2987_v43, %v2999_v10 }
 0xa52   : > { %v3094_v14 = vrot.slane %v3086_v9, %v5442_v49  ;;  %v3101_v15 = vrot.slane %v3087_v11, %v5442_v49 }
 0xa53   : > { %v3506_v17 = vpop.xlane.xlu1 %3505 }
 0xa54   : > { %v3102_v28 = vcombine.low %v3078_v12, %v3094_v14  ;;  %v3103_v8 = vcombine.high %v3078_v12, %v3094_v14  ;;  %v3118_v19 = vcombine.low %v3085_v13, %v3101_v15  ;;  %v3119_v22 = vcombine.high %v3085_v13, %v3101_v15 }
 0xa55   : > { %5056 = vrcp.f32 %v3506_v17 }
 0xa56   : > { %v3110_v26 = vrot.slane %v3102_v28, %v5445_v56  ;;  %v3117_v24 = vrot.slane %v3103_v8, %v5445_v56  ;;  %v3126_v30 = vrot.slane %v3118_v19, %v5445_v56  ;;  %v3133_v31 = vrot.slane %v3119_v22, %v5445_v56  ;;  %v5055_v6 = vpop.eup %5054 }
 0xa57   : > { %v2997_v16 = vpop.permute.xlu1 %2996 }
 0xa58   : > { %v3206_v18 = vcombine.low %v3110_v26, %v3117_v24  ;;  %v4531_v33 = vcombine.high %v3110_v26, %v3117_v24  ;;  %v3222_v34 = vcombine.low %v3126_v30, %v3133_v31  ;;  %v4532_v35 = vcombine.high %v3126_v30, %v3133_v31 }
 0xa59   : > { %v3018_v36 = vcombine.low %v5836_v47, %v2997_v16  ;;  %v3019_v37 = vcombine.high %v5836_v47, %v2997_v16  ;;  %v3517_v16 = vmul.f32 %v5055_v6, %v5838_v52 }
 0xa5a   : > { %v3213_v21 = vrot.slane %v3206_v18, %v5442_v49  ;;  %v3221_v43 = vrot.slane %v4531_v33, %v5442_v49  ;;  %v3229_v44 = vrot.slane %v3222_v34, %v5442_v49  ;;  %v3237_v45 = vrot.slane %v4532_v35, %v5442_v49 }
 0xa5b   : > { %v3026_v40 = vrot.slane %v3018_v36, %v5442_v49  ;;  %v3033_v41 = vrot.slane %v3019_v37, %v5442_v49 }
 0xa5c   : > { %v3238_v58 = vcombine.low %v3213_v21, %v3221_v43  ;;  %v3254_v59 = vcombine.low %v3229_v44, %v3237_v45  ;;  %v3239_v9 = vcombine.high %v3213_v21, %v3221_v43  ;;  %v3255_v11 = vcombine.high %v3229_v44, %v3237_v45 }
 0xa5d   : > { %v3034_v46 = vcombine.low %v3010_v38, %v3026_v40  ;;  %v3035_v47 = vcombine.high %v3010_v38, %v3026_v40  ;;  %v3050_v48 = vcombine.low %v3017_v39, %v3033_v41  ;;  %v3051_v50 = vcombine.high %v3017_v39, %v3033_v41 }
 0xa5e   : > { %v3246_v7 = vrot.slane %v3238_v58, %v5445_v56  ;;  %v3262_v10 = vrot.slane %v3254_v59, %v5445_v56  ;;  %v3253_v23 = vrot.slane %v3239_v9, %v5445_v56  ;;  %v3269_v26 = vrot.slane %v3255_v11, %v5445_v56 }
 0xa5f   : > { %v3042_v51 = vrot.slane %v3034_v46, %v5445_v56  ;;  %v3049_v53 = vrot.slane %v3035_v47, %v5445_v56  ;;  %v3058_v55 = vrot.slane %v3050_v48, %v5445_v56  ;;  %v3065_v57 = vrot.slane %v3051_v50, %v5445_v56  ;;  %v5057_v12 = vpop.eup %5056  ;;  %v4980_v50 = vld [vmem:[%s6153_s13] sm:$0xff]  }
 0xa60   : > { %v3270_v30 = vcombine.low %v3246_v7, %v3262_v10  ;;  %v3271_v32 = vcombine.high %v3246_v7, %v3262_v10  ;;  %v3518_v18 = vmul.f32 %v5057_v12, %v5842_v54  ;;  %v3272_v37 = vcombine.low %v3253_v23, %v3269_v26 }
 0xa61   : > { %v3138_v60 = vcombine.low %v3042_v51, %v3049_v53  ;;  %v4529_v61 = vcombine.high %v3042_v51, %v3049_v53  ;;  %v3154_v62 = vcombine.low %v3058_v55, %v3065_v57  ;;  %v4530_v0 = vcombine.high %v3058_v55, %v3065_v57  ;;  %v4984_v51 = vld [vmem:[%s6153_s13 + $0x20] sm:$0xff]   ;;  %v4985_v53 = vld [vmem:[%s6153_s13 + $0x28] sm:$0xff]  }
 0xa62   : > { %v3273_v38 = vcombine.high %v3253_v23, %v3269_v26  ;;  %v3521_v39 = vpack.c.bf16 %v3517_v16, %v3517_v16  ;;  %v3522_v40 = vpack.c.bf16 %v3518_v18, %v3518_v18 }
 0xa63   : > { %v3145_v3 = vrot.slane %v3138_v60, %v5442_v49  ;;  %v3153_v25 = vrot.slane %v4529_v61, %v5442_v49  ;;  %v3161_v4 = vrot.slane %v3154_v62, %v5442_v49  ;;  %v3169_v5 = vrot.slane %v4530_v0, %v5442_v49 }
 0xa65   : > { %v3170_v13 = vcombine.low %v3145_v3, %v3153_v25  ;;  %v3186_v14 = vcombine.low %v3161_v4, %v3169_v5  ;;  %v3171_v15 = vcombine.high %v3145_v3, %v3153_v25  ;;  %v3187_v17 = vcombine.high %v3161_v4, %v3169_v5 }
 0xa67   : > { %v3178_v28 = vrot.slane %v3170_v13, %v5445_v56  ;;  %v3194_v8 = vrot.slane %v3186_v14, %v5445_v56  ;;  %v3185_v19 = vrot.slane %v3171_v15, %v5445_v56  ;;  %v3201_v22 = vrot.slane %v3187_v17, %v5445_v56 }
 0xa69   : > { %v3202_v24 = vcombine.low %v3178_v28, %v3194_v8  ;;  %v3203_v31 = vcombine.high %v3178_v28, %v3194_v8  ;;  %v3204_v35 = vcombine.low %v3185_v19, %v3201_v22  ;;  %v3205_v36 = vcombine.high %v3185_v19, %v3201_v22 }
 0xa6b   : > { %v3274_v33 = vpack.c.bf16 %v3270_v30, %v3202_v24  ;;  %v3275_v34 = vpack.c.bf16 %v3271_v32, %v3203_v31  ;;  %v3276_v41 = vpack.c.bf16 %v3272_v37, %v3204_v35  ;;  %v3277_v21 = vpack.c.bf16 %v3273_v38, %v3205_v36  ;;  %v4986_v24 = vld [vmem:[%s6153_s13 + $0x30] sm:$0xff]   ;;  %v4987_v36 = vld [vmem:[%s6153_s13 + $0x38] sm:$0xff]  }
 0xa6d   : > { %4818 = vmatpush3.bf16.msra.mxu0 %v3274_v33  ;;  %4824 = vmatpush3.bf16.msra.mxu1 %v3275_v34 }
 0xa6e   : > { %4829 = vmatprep.subr.bf16.mxu0 %v5132_v20  ;;  %4835 = vmatprep.subr.bf16.mxu1 %v5132_v20 }
 0xa70   : > { %4820 = vmatmul.mubr.msk.bf16.vlgmr.msra.gmra.mrb[20].mxu0 %vm3476_vm6, %v3521_v39  ;;  %4826 = vmatmul.mubr.msk.bf16.vlgmr.msra.gmra.mrb[48].mxu1 %vm3476_vm6, %v3522_v40 }
 0xa71   : > { %4830 = vmatpush3.bf16.msra.mxu0 %v3276_v41  ;;  %4836 = vmatpush3.bf16.msra.mxu1 %v3277_v21 }
 0xa72   : > { %4837 = vmatprep.mubr.msk.bf16.mxu1 %vm5136_vm0, %v5132_v20  ;;  %4831 = vmatprep.mubr.msk.bf16.mxu0 %vm5136_vm0, %v5132_v20 }
 0xa73   : > { %4841 = vmatprep.subr.bf16.mxu0 %v5132_v20 }
 0xa80   : > { %v3512_v52 = vpop.xlane.xlu0 %3511 }
 0xa81   : > { %5058 = vrcp.f32 %v3512_v52 }
 0xa88   : > { %v3509_v54 = vpop.xlane.xlu1 %3508 }
 0xa89   : > { %5060 = vrcp.f32 %v3509_v54 }
 0xa8b   : > { %v5059_v43 = vpop.eup %5058 }
 0xa8c   : > { %v3520_v44 = vmul.f32 %v5059_v43, %v5850_v63  ;;  %v4981_v63 = vld [vmem:[%s6153_s13 + $0x8] sm:$0xff]  }
 0xa8e   : > { %v3524_v45 = vpack.c.bf16 %v3520_v44, %v3520_v44 }
 0xa90   : > { %4838 = vmatmul.mubr.msk.bf16.vlgmr.msra.gmra.mrb[52].mxu1 %vm3476_vm6, %v3524_v45 }
 0xa91   : > { %4115 = vmatprep.mubr.bf16.mxu1 %v5131_v2  ;;  %v4982_v2 = vld [vmem:[%s6153_s13 + $0x10] sm:$0xff]  }
 0xa93   : > { %v5061_v46 = vpop.eup %5060 }
 0xa94   : > { %v3519_v47 = vmul.f32 %v5061_v46, %v5854_v1  ;;  %v4983_v1 = vld [vmem:[%s6153_s13 + $0x18] sm:$0xff]  }
 0xa96   : > { %v3523_v48 = vpack.c.bf16 %v3519_v47, %v3519_v47 }
 0xa98   : > { %4832 = vmatmul.mubr.msk.bf16.vlgmr.msra.gmra.mrb[24].mxu0 %vm3476_vm6, %v3523_v48 }
 0xa99   : > { %4857 = vmatprep.mubr.msk.bf16.mxu0 %vm5136_vm0, %v5132_v20  ;;  %4842 = vmatpush3.bf16.msra.mxu0 %v4980_v50 }
 0xa9a   : > { %4843 = vmatprep.subr.bf16.mxu0 %v5132_v20 }
 0xa9d   : > { %4844 = vmatpush3.bf16.msra.mxu0 %v4981_v63 }
 0xa9e   : > { %4845 = vmatprep.subr.bf16.mxu0 %v5132_v20 }
 0xaa1   : > { %4846 = vmatpush3.bf16.msra.mxu0 %v4982_v2 }
 0xaa2   : > { %4847 = vmatprep.subr.bf16.mxu0 %v5132_v20 }
 0xaa5   : > { %4848 = vmatpush3.bf16.msra.mxu0 %v4983_v1 }
 0xaa6   : > { %4849 = vmatprep.subr.bf16.mxu0 %v5132_v20 }
 0xaa9   : > { %4850 = vmatpush3.bf16.msra.mxu0 %v4984_v51 }
 0xaaa   : > { %4851 = vmatprep.subr.bf16.mxu0 %v5132_v20 }
 0xaad   : > { %4852 = vmatpush3.bf16.msra.mxu0 %v4985_v53 }
 0xaae   : > { %4853 = vmatprep.subr.bf16.mxu0 %v5132_v20 }
 0xab1   : > { %4854 = vmatpush3.bf16.msra.mxu0 %v4986_v24  ;;  %v5017_v24 = vld [vmem:[%s6163_s23 + $0x10] sm:$0xff]  }
 0xab2   : > { %4855 = vmatprep.subr.bf16.mxu0 %v5132_v20 }
 0xab5   : > { %4856 = vmatpush3.bf16.msra.mxu0 %v4987_v36 }
 0xb43   : > { %v3562_v55 = vpop.f32.mrb[20].mxu0  ;;  %v3605_v57 = vpop.f32.mrb[48].mxu1 }
 0xb44   : > { %v4821_v58 = vpop.f32.mrb[21].mxu0  ;;  %v4827_v59 = vpop.f32.mrb[49].mxu1 }
 0xb45   : > { %v3565_v60 = vpop.f32.mrb[22].mxu0  ;;  %v3608_v61 = vpop.f32.mrb[50].mxu1  ;;  %v4544_v58 = vld [vmem:[%s6154_s14] ss:$0 sm:$0xff] }
 0xb46   : > { %v4822_v62 = vpop.f32.mrb[23].mxu0  ;;  %v4828_v0 = vpop.f32.mrb[51].mxu1 }
 0xb63   : > { %v3691_v3 = vpop.f32.mrb[52].mxu1 }
 0xb64   : > { %v3713_v25 = vcombine.low %v3605_v57, %v3691_v3  ;;  %v3714_v4 = vcombine.high %v3605_v57, %v3691_v3  ;;  %v4839_v5 = vpop.f32.mrb[53].mxu1  ;;  %v4990_v57 = vld [vmem:[%s6161_s21 + $0x4] ss:$8 sps:$4 sm:$0xff]  }
 0xb65   : > { %v3694_v6 = vpop.f32.mrb[54].mxu1  ;;  %4083 = vmatprep.subr.bf16.mxu1 %v4990_v57  ;;  %v4991_v5 = vld [vmem:[%s6161_s21 + $0x10] ss:$8 sps:$4 sm:$0xff]  }
 0xb66   : > { %v4840_v7 = vpop.f32.mrb[55].mxu1  ;;  %v3721_v14 = vrot.slane %v3713_v25, %v5442_v49  ;;  %v3728_v15 = vrot.slane %v3714_v4, %v5442_v49  ;;  %v4993_v4 = vld [vmem:[%s6161_s21 + $0x14] ss:$8 sps:$4 sm:$0xff]   ;;  %v4994_v6 = vld [vmem:[%s6161_s21 + $0x20] ss:$8 sps:$4 sm:$0xff]  }
 0xb67   : > { %v4999_v7 = vld [vmem:[%s6161_s21 + $0x34] ss:$8 sps:$4 sm:$0xff]  }
 0xb6b   : > { %v3648_v10 = vpop.f32.mrb[24].mxu0 }
 0xb6c   : > { %v3697_v9 = vcombine.low %v3562_v55, %v3648_v10  ;;  %v3698_v11 = vcombine.high %v3562_v55, %v3648_v10  ;;  %v4833_v12 = vpop.f32.mrb[25].mxu0  ;;  %v4988_v55 = vld [vmem:[%s6161_s21] ss:$8 sps:$4 sm:$0xff]   ;;  %v4997_v10 = vld [vmem:[%s6161_s21 + $0x30] ss:$8 sps:$4 sm:$0xff]  }
 0xb6d   : > { %v3651_v13 = vpop.f32.mrb[26].mxu0  ;;  %4084 = vmatpush1.bf16.msra.mxu1 %v4988_v55  ;;  %v5005_v12 = vld [vmem:[%s6161_s21 + $0x54] ss:$8 sps:$4 sm:$0xff]  }
 0xb6e   : > { %v3705_v17 = vrot.slane %v3697_v9, %v5442_v49  ;;  %v3712_v28 = vrot.slane %v3698_v11, %v5442_v49  ;;  %v4834_v8 = vpop.f32.mrb[27].mxu0  ;;  %4085 = vmatprep.subr.bf16.mxu1 %v4993_v4  ;;  %v5002_v9 = vld [vmem:[%s6161_s21 + $0x44] ss:$8 sps:$4 sm:$0xff]   ;;  %v5000_v11 = vld [vmem:[%s6161_s21 + $0x40] ss:$8 sps:$4 sm:$0xff]  }
 0xb6f   : > { %v5003_v13 = vld [vmem:[%s6161_s21 + $0x50] ss:$8 sps:$4 sm:$0xff]   ;;  %v5012_v8 = vld [vmem:[%s6163_s23 + $0x40] sm:$0xff]  }
 0xb70   : > { %v3729_v19 = vcombine.low %v3705_v17, %v3721_v14  ;;  %v3730_v22 = vcombine.high %v3705_v17, %v3721_v14  ;;  %v3745_v23 = vcombine.low %v3712_v28, %v3728_v15  ;;  %v3746_v26 = vcombine.high %v3712_v28, %v3728_v15  ;;  %v5008_v14 = vld [vmem:[%s6161_s21 + $0x64] ss:$8 sps:$4 sm:$0xff]   ;;  %v5006_v15 = vld [vmem:[%s6161_s21 + $0x60] ss:$8 sps:$4 sm:$0xff]   ;;  %v5011_v17 = vld [vmem:[%s6161_s21 + $0x74] ss:$8 sps:$4 sm:$0xff]   ;;  %4663 = vmatprep.subr.bf16.mxu0 %v5012_v8 }
 0xb71   : > { %4086 = vmatpush1.bf16.msra.mxu1 %v4991_v5  ;;  %v5009_v28 = vld [vmem:[%s6161_s21 + $0x70] ss:$8 sps:$4 sm:$0xff]   ;;  %v4588_v8 = vld [vmem:[%s6222_s30] ss:$0 sm:$0xff] }
 0xb72   : > { %v3737_v30 = vrot.slane %v3729_v19, %v5445_v56  ;;  %v3744_v31 = vrot.slane %v3730_v22, %v5445_v56  ;;  %v3753_v32 = vrot.slane %v3745_v23, %v5445_v56  ;;  %v3760_v16 = vrot.slane %v3746_v26, %v5445_v56  ;;  %v5013_v19 = vld [vmem:[%s6163_s23] sm:$0xff]   ;;  %v5014_v22 = vld [vmem:[%s6163_s23 + $0x48] sm:$0xff]   ;;  %v5016_v26 = vld [vmem:[%s6163_s23 + $0x50] sm:$0xff]  }
 0xb73   : > { %v5015_v23 = vld [vmem:[%s6163_s23 + $0x8] sm:$0xff]  }
 0xb74   : > { %v3765_v18 = vcombine.low %v3737_v30, %v3744_v31  ;;  %v4542_v33 = vcombine.high %v3737_v30, %v3744_v31  ;;  %v3781_v34 = vcombine.low %v3753_v32, %v3760_v16  ;;  %v4543_v35 = vcombine.high %v3753_v32, %v3760_v16  ;;  %v5018_v30 = vld [vmem:[%s6163_s23 + $0x58] sm:$0xff]   ;;  %v5020_v32 = vld [vmem:[%s6163_s23 + $0x60] sm:$0xff]  }
 0xb75   : > { %v5019_v31 = vld [vmem:[%s6163_s23 + $0x18] sm:$0xff]   ;;  %v5021_v16 = vld [vmem:[%s6163_s23 + $0x20] sm:$0xff]  }
 0xb76   : > { %v3772_v37 = vrot.slane %v3765_v18, %v5442_v49  ;;  %v3780_v38 = vrot.slane %v4542_v33, %v5442_v49  ;;  %v3788_v39 = vrot.slane %v3781_v34, %v5442_v49  ;;  %v3796_v40 = vrot.slane %v4543_v35, %v5442_v49  ;;  %v5022_v18 = vld [vmem:[%s6163_s23 + $0x68] sm:$0xff]  }
 0xb77   : > { %v5023_v33 = vld [vmem:[%s6163_s23 + $0x28] sm:$0xff]  }
 0xb78   : > { %v3798_v41 = vcombine.high %v3772_v37, %v3780_v38  ;;  %v3814_v21 = vcombine.high %v3788_v39, %v3796_v40  ;;  %v3797_v52 = vcombine.low %v3772_v37, %v3780_v38  ;;  %v3813_v54 = vcombine.low %v3788_v39, %v3796_v40 }
 0xb7a   : > { %v3812_v43 = vrot.slane %v3798_v41, %v5445_v56  ;;  %v3828_v20 = vrot.slane %v3814_v21, %v5445_v56  ;;  %v3805_v44 = vrot.slane %v3797_v52, %v5445_v56  ;;  %v3821_v45 = vrot.slane %v3813_v54, %v5445_v56  ;;  %v4553_v54 = vld [vmem:[%s6157_s17] ss:$0 sm:$0xff] }
 0xb7c   : > { %v3831_v46 = vcombine.low %v3812_v43, %v3828_v20  ;;  %v3830_v47 = vcombine.high %v3805_v44, %v3821_v45  ;;  %v3832_v48 = vcombine.high %v3812_v43, %v3828_v20  ;;  %v3829_v50 = vcombine.low %v3805_v44, %v3821_v45  ;;  %v4554_v20 = vld [vmem:[%s6158_s18] ss:$0 sm:$0xff] }
 0xb7e   : > { %3838 = vrot.lane.b32.xlu1 %v3831_v46, %s6218_s19  ;;  %3834 = vrot.lane.b32.xlu0 %v3830_v47, %s6219_s8  ;;  %v5024_v47 = vld [vmem:[%s6163_s23 + $0x70] sm:$0xff]  }
 0xb82   : > { %3842 = vrot.lane.b32.xlu1 %v3832_v48, %s6217_s28  ;;  %v5025_v48 = vld [vmem:[%s6163_s23 + $0x30] sm:$0xff]   ;;  %s790_s28 = sand.u32 1, %s5121_s2  }
 0xb83   : > { %s4442_s8 = sshll.u32 %s790_s28, 3  ;;  %s4336_s27 = scalar_lea.sflag [#allocation3], %s790_s28 }
 0xb84   : > { %s792_s5 = scalar_lea.vmem [#allocation2], %s4442_s8  ;;  %s5071_s8 = sshll.u32 %s5139_s7, 4  ;;  %s5072_s8 = int_to_ptr.vmem [resolvable:$false] %s5071_s8 }
 0xb85   : > { %s4349_s1 = sshll.u32 %s792_s5, 4  ;;  %s5073_s30 = scalar_lea.vmem %s5072_s8, 256  ;;  %s6100_s1 = int_to_ptr.vmem [resolvable:$true] %s4349_s1 }
 0xb86   : > { %s5067_s9 = scalar_lea.vmem %s6100_s1, 128  ;;  %p5074_p0 = scmp.lt.s32.totalorder %s6100_s1, %s5072_s8 }
 0xb87   : > { %p5068_p11 = scmp.ne.s32.totalorder %s6100_s1, %s5067_s9  ;;  %p5075_p1 = scmp.lt.s32.totalorder %s5073_s30, %s5067_s9 }
 0xb89   : > { %p5069_p12 = pnand %p5068_p11, %p5308_p5  ;;  %p5076_p2 = por %p5075_p1, %p5074_p0 }
 0xb8b   : > { %p5070_p13 = pneg %p5069_p12 }
 0xb8d   : > { %p5077_p3 = pnand %p5076_p2, %p5070_p13 }
 0xbf0   : > { %v3839_v49 = vpop.permute.xlu1 %3838  ;;  %v3835_v63 = vpop.permute.xlu0 %3834 }
 0xbf1   : > { %v3845_v2 = vsel %vm1547_vm1, %v3829_v50, %v3835_v63  ;;  %v5026_v50 = vld [vmem:[%s6163_s23 + $0x78] sm:$0xff]   ;;  %v3991_v63 = vld [vmem:[%s6162_s22] sm:$0x3] }
 0xbf2   : > { %v3846_v51 = vsel %vm2123_vm4, %v3845_v2, %v3839_v49  ;;  %v5027_v49 = vld [vmem:[%s6163_s23 + $0x38] sm:$0xff]   ;;  %v3996_v2 = vrot.slane %v3991_v63, %v5411_v29 }
 0xbf4   : > { %v3843_v1 = vpop.permute.xlu1 %3842 }
 0xbf5   : > { %v3847_v53 = vsel %vm2125_vm5, %v3846_v51, %v3843_v1  ;;  %v4000_v1 = vrot.slane %v3991_v63, %v5402_v27 }
 0xbf6   : > { %v3848_v56 = vpack.c.bf16 %v3847_v53, %v3847_v53 }
 0xbf8   : > { %4858 = vmatmul.mubr.bf16.vlgmr.msra.gmra.mrb[28].mxu0 %v3848_v56 }
 0xbf9   : > { %4664 = vmatpush3.bf16.msra.mxu0 %v5013_v19 }
 0xbfa   : > { %4665 = vmatprep.subr.bf16.mxu0 %v5014_v22  ;;  %v4589_v22 = vld [vmem:[%s6223_s26] ss:$0 sm:$0xff] }
 0xbfd   : > { %4666 = vmatpush3.bf16.msra.mxu0 %v5015_v23 }
 0xbfe   : > { %4667 = vmatprep.subr.bf16.mxu0 %v5016_v26 }
 0xc01   : > { %4668 = vmatpush3.bf16.msra.mxu0 %v5017_v24 }
 0xc02   : > { %4669 = vmatprep.subr.bf16.mxu0 %v5018_v30 }
 0xc05   : > { %4670 = vmatpush3.bf16.msra.mxu0 %v5019_v31 }
 0xc06   : > { %4671 = vmatprep.subr.bf16.mxu0 %v5020_v32 }
 0xc09   : > { %4672 = vmatpush3.bf16.msra.mxu0 %v5021_v16 }
 0xc0a   : > { %4673 = vmatprep.subr.bf16.mxu0 %v5022_v18 }
 0xc0d   : > { %4674 = vmatpush3.bf16.msra.mxu0 %v5023_v33 }
 0xc0e   : > { %4675 = vmatprep.subr.bf16.mxu0 %v5024_v47 }
 0xc11   : > { %4676 = vmatpush3.bf16.msra.mxu0 %v5025_v48 }
 0xc12   : > { %4677 = vmatprep.subr.bf16.mxu0 %v5026_v50 }
 0xc15   : > { %4678 = vmatpush3.bf16.msra.mxu0 %v5027_v49 }
 0xccb   : > { %v3937_v59 = vpop.f32.mrb[28].mxu0 }
 0xccc   : > { %v3938_v60 = vadd.f32 %v4544_v58, %v3937_v59  ;;  %v4859_v61 = vpop.f32.mrb[29].mxu0 }
 0xccd   : > { %v3940_v62 = vpop.f32.mrb[30].mxu0 }
 0xcce   : > { %v5977_v0 = vadd.f32 %v3938_v60, %v5737_v42  ;;  %v4860_v3 = vpop.f32.mrb[31].mxu0  ;;  %v4996_v42 = vld [vmem:[%s6161_s21 + $0x24] ss:$8 sps:$4 sm:$0xff]  }
 0xccf   : > { %4087 = vmatprep.subr.bf16.mxu1 %v4996_v42  ;;  %v4571_v3 = vld [vmem:[%s6164_s24] ss:$0 sm:$0xff] }
 0xcd0   : > { %3946 = vadd.xlane.f32.xlu0 %v5977_v0  ;;  %v3949_v25 = vmul.f32 %v5977_v0, %v5977_v0  ;;  %4088 = vmatpush1.bf16.msra.mxu1 %v4994_v6 }
 0xcd1   : > { %4089 = vmatprep.subr.bf16.mxu1 %v4999_v7 }
 0xcd2   : > { %3950 = vadd.xlane.f32.xlu1 %v3949_v25 }
 0xcd4   : > { %4090 = vmatpush1.bf16.msra.mxu1 %v4997_v10 }
 0xcd5   : > { %4091 = vmatprep.subr.bf16.mxu1 %v5002_v9 }
 0xcd8   : > { %4092 = vmatpush1.bf16.msra.mxu1 %v5000_v11 }
 0xcd9   : > { %4093 = vmatprep.subr.bf16.mxu1 %v5005_v12 }
 0xcdc   : > { %4094 = vmatpush1.bf16.msra.mxu1 %v5003_v13 }
 0xcdd   : > { %4095 = vmatprep.subr.bf16.mxu1 %v5008_v14 }
 0xce0   : > { %4096 = vmatpush1.bf16.msra.mxu1 %v5006_v15 }
 0xce1   : > { %4097 = vmatprep.subr.bf16.mxu1 %v5011_v17 }
 0xce4   : > { %4098 = vmatpush1.bf16.msra.mxu1 %v5009_v28 }
 0xd5d   : > { %v3947_v34 = vpop.xlane.xlu0 %3946 }
 0xd5e   : > { %v3948_v35 = vmul.f32 0.0078125, %v3947_v34 }
 0xd5f   : > { %v3951_v36 = vpop.xlane.xlu1 %3950 }
 0xd60   : > { %v3953_v37 = vmul.f32 %v3948_v35, %v3948_v35  ;;  %v3952_v38 = vmul.f32 0.0078125, %v3951_v36  ;;  %v3956_v21 = vsub.f32 %v5977_v0, %v3948_v35 }
 0xd62   : > { %v3954_v39 = vsub.f32 %v3952_v38, %v3953_v37 }
 0xd64   : > { %v3955_v40 = vmax.f32 %v3954_v39, 0.0 }
 0xd66   : > { %v3957_v41 = vadd.f32 1e-05, %v3955_v40 }
 0xd68   : > { %5062 = vrsqrt.f32 %v3957_v41 }
 0xd72   : > { %v5063_v52 = vpop.eup %5062 }
 0xd73   : > { %v3959_v43 = vmul.f32 %v5063_v52, %v3956_v21 }
 0xd75   : > { %v3966_v44 = vmul.f32 %v4553_v54, %v3959_v43 }
 0xd77   : > { %v3973_v45 = vadd.f32 %v4554_v20, %v3966_v44 }
 0xd79   : > { %v3974_v46 = vpack.c.bf16 %v3973_v45, %v3973_v45 }
 0xd7b   : > { %4116 = vmatmul.mubr.bf16.vlgmr.msra.gmra.mrb[56].mxu1 %v3974_v46 }
 0xe4e   : > { %v4117_v51 = vpop.f32.mrb[56].mxu1 }
 0xe4f   : > { %v4118_v53 = vadd.f32 %v4117_v51, %v3996_v2  ;;  %v4119_v56 = vpop.f32.mrb[57].mxu1 }
 0xe50   : > { %v4120_v55 = vadd.f32 %v4119_v56, %v4000_v1  ;;  %v4121_v57 = vpop.f32.mrb[58].mxu1 }
 0xe51   : > { %v4124_v58 = vmax.f32 %v4118_v53, 0.0  ;;  %v4122_v59 = vpop.f32.mrb[59].mxu1 }
 0xe52   : > { %v4125_v60 = vmax.f32 %v4120_v55, 0.0 }
 0xe53   : > { %v4126_v62 = vpack.c.bf16 %v4124_v58, %v4124_v58 }
 0xe54   : > { %v4127_v61 = vpack.c.bf16 %v4125_v60, %v4125_v60 }
 0xe56   : > { %4295 = vmatprep.mubr.bf16.mxu0 %v4127_v61 }
 0xe57   : > { %4296 = vmatmul.mubr.bf16.vlgmr.msra.gmra.mrb[32].mxu0 %v4126_v62 }
 0xf2a   : > { %v4679_v0 = vpop.f32.mrb[32].mxu0 }
 0xf2b   : > { %v4680_v29 = vpop.f32.mrb[33].mxu0 }
 0xf2c   : > { %v4681_v25 = vadd.f32 %v4680_v29, %v4679_v0  ;;  %v4682_v27 = vpop.f32.mrb[34].mxu0 }
 0xf2d   : > { %v4683_v4 = vpop.f32.mrb[35].mxu0 }
 0xf2e   : > { %v4298_v5 = vadd.f32 %v4681_v25, %v4571_v3 }
 0xf30   : > { %v4305_v42 = vadd.f32 %v4298_v5, %v3973_v45 }
 0xf32   : > { %4306 = vadd.xlane.f32.xlu0 %v4305_v42  ;;  %v4309_v6 = vmul.f32 %v4305_v42, %v4305_v42 }
 0xf36   : > { %4310 = vadd.xlane.f32.xlu0 %v4309_v6 }
 0xfbf   : > { %v4307_v7 = vpop.xlane.xlu0 %4306 }
 0xfc0   : > { %v4308_v10 = vmul.f32 0.0078125, %v4307_v7 }
 0xfc2   : > { %v4313_v11 = vmul.f32 %v4308_v10, %v4308_v10  ;;  %v4316_v17 = vsub.f32 %v4305_v42, %v4308_v10 }
 0xfc3   : > { %v4311_v9 = vpop.xlane.xlu0 %4310 }
 0xfc4   : > { %v4312_v12 = vmul.f32 0.0078125, %v4311_v9 }
 0xfc6   : > { %v4314_v13 = vsub.f32 %v4312_v12, %v4313_v11 }
 0xfc8   : > { %v4315_v14 = vmax.f32 %v4314_v13, 0.0 }
 0xfca   : > { %v4317_v15 = vadd.f32 1e-05, %v4315_v14 }
 0xfcc   : > { %5064 = vrsqrt.f32 %v4317_v15 }
 0xfd6   : > { %v5065_v28 = vpop.eup %5064 }
 0xfd7   : > { %v4319_v19 = vmul.f32 %v5065_v28, %v4316_v17 }
 0xfd9   : > { %v4326_v23 = vmul.f32 %v4588_v8, %v4319_v19 }
 0xfdb   : > { %v4333_v26 = vadd.f32 %v4589_v22, %v4326_v23 }
 0xfdd   : > { %4334 = vst [vmem:[%s792_s5] sm:$0xff] %v4333_v26 }
 0xfde   : > { %5080 = shalt.err (!%p5077_p3)
}
 0xfdf   : > { %s5081_s28 = scalar_lea.hbm %s6098_s11, 128  ;;  %s5085_s26 = scalar_lea.hbm %s6225_s10, 256 }
 0xfe0   : > { %p5082_p4 = scmp.ne.s32.totalorder %s6098_s11, %s5081_s28  ;;  %p5086_p9 = scmp.lt.u32.totalorder %s6098_s11, %s6225_s10 }
 0xfe1   : > { %p5087_p10 = scmp.lt.u32.totalorder %s5085_s26, %s5081_s28  ;;  %p5089_p12 = scmp.lt.u32.totalorder %s5081_s28, %s6098_s11 }
 0xfe2   : > { %p5083_p7 = pnand %p5082_p4, %p5308_p5 }
 0xfe3   : > { %p5088_p11 = por %p5087_p10, %p5086_p9 }
 0xfe4   : > { %p5084_p8 = pneg %p5083_p7 }
 0xfe5   : > { %p5090_p13 = por %p5089_p12, %p5088_p11 }
 0xfe7   : > { %p5091_p0 = pnand %p5090_p13, %p5084_p8 }
 0xfe9   : > { %5094 = shalt.err (!%p5091_p0)
}
 0xfea   : > { %4861 = dma.vmem_to_hbm [thread:$0]  (%p5308_p5), %s6100_s1, 128, %s6098_s11, %s4336_s27  }
 0xfeb PF: > { %s6226_s0 = sld [smem:[#allocation7_spill]]  ;;  %s6227_s19 = sld [smem:[#allocation5_spill]] }
 0xff1   : > { %p4867_p1 = scmp.ge.s32.totalorder %s6226_s0, 2  ;;  %s4361_s9 = sand.u32 1, %s6227_s19  }
 0xff2   : > { %s4362_s7 = scalar_lea.sflag [#allocation3], %s4361_s9 }
 0xff3   : > { %p4864_p2 = pnand %p4867_p1, %p5312_p6 }
 0xff5   : > { %5112 = dma.done.wait (!%p4864_p2), %s4362_s7, 128  }
 0xff6   : > { %5114 = vsyncadd (!%p4864_p2), %s4362_s7, 4294967168  ;;  %s6229_s30 = sld [smem:[#allocation8_spill]]  ;;  %s6230_s8 = sld [smem:[#allocation6_spill]] }
 0xff7   : > { %s6231_s6 = sld [smem:[#allocation9_spill]]  ;;  %s6232_s29 = smov %s5121_s2 }
 0xffc   : > { %p35_p3 = scmp.ge.s32.totalorder %s6229_s30, 4   ;;  %s6233_s2 = smov %s6230_s8 }
 0xffe   :  { %37 = sbr.rel (!%p35_p3) target bundleno = 19 (0x13), region = 164 }
0x1005   :  { %4367 = vsyncpa [#allocation3], 1 }
0x1006   :  { %4369 = vsyncpa [#allocation3 + $0x1], 1 }

// kernel: decoder_layer_forward.1
= control target key start
LH: loop header
LB: loop body
LE: loop exit
PB: predicated region body
PF: predicated region fallthrough
CT: control target
= control target key end

     0   :  { %s6140_s0 = inlined_call_operand.vmem [shape: f32[2,8,128], index: 0, kind: input, shape index: {}]   ;;  %s6141_s1 = inlined_call_operand.vmem [shape: f32[2,16,128], index: 1, kind: input, shape index: {}]   ;;  %s6142_s2 = inlined_call_operand.vmem [shape: f32[8,8], index: 2, kind: input, shape index: {}]   ;;  %s6143_s3 = inlined_call_operand.vmem [shape: f32[2,1,8], index: 3, kind: input, shape index: {}]   ;;  %s6144_s4 = inlined_call_operand.vmem [shape: f32[2,1,16], index: 4, kind: input, shape index: {}]   ;;  %s6145_s5 = inlined_call_operand.vmem [shape: bf16[128,384], index: 5, kind: input, shape index: {}]   ;;  %s6146_s6 = inlined_call_operand.vmem [shape: f32[1,384], index: 6, kind: input, shape index: {}]   ;;  %s6147_s7 = inlined_call_operand.vmem [shape: bf16[128,128], index: 7, kind: input, shape index: {}]   ;;  %s6148_s8 = inlined_call_operand.vmem [shape: f32[1,128], index: 8, kind: input, shape index: {}]   ;;  %s6149_s9 = inlined_call_operand.vmem [shape: bf16[128,128], index: 9, kind: input, shape index: {}]   ;;  %s6150_s10 = inlined_call_operand.vmem [shape: f32[1,128], index: 10, kind: input, shape index: {}]   ;;  %s6151_s11 = inlined_call_operand.vmem [shape: bf16[128,256], index: 11, kind: input, shape index: {}]   ;;  %s6152_s12 = inlined_call_operand.vmem [shape: f32[1,256], index: 12, kind: input, shape index: {}]   ;;  %s6153_s13 = inlined_call_operand.vmem [shape: bf16[128,128], index: 13, kind: input, shape index: {}]   ;;  %s6154_s14 = inlined_call_operand.vmem [shape: f32[1,128], index: 14, kind: input, shape index: {}]   ;;  %s6155_s15 = inlined_call_operand.vmem [shape: f32[1,128], index: 15, kind: input, shape index: {}]   ;;  %s6156_s16 = inlined_call_operand.vmem [shape: f32[1,128], index: 16, kind: input, shape index: {}]   ;;  %s6157_s17 = inlined_call_operand.vmem [shape: f32[1,128], index: 17, kind: input, shape index: {}]   ;;  %s6158_s18 = inlined_call_operand.vmem [shape: f32[1,128], index: 18, kind: input, shape index: {}]   ;;  %s6159_s19 = inlined_call_operand.vmem [shape: f32[1,128], index: 19, kind: input, shape index: {}]   ;;  %s6160_s20 = inlined_call_operand.vmem [shape: f32[1,128], index: 20, kind: input, shape index: {}]   ;;  %s6161_s21 = inlined_call_operand.vmem [shape: bf16[128,256], index: 21, kind: input, shape index: {}]   ;;  %s6162_s22 = inlined_call_operand.vmem [shape: f32[1,256], index: 22, kind: input, shape index: {}]   ;;  %s6163_s23 = inlined_call_operand.vmem [shape: bf16[256,128], index: 23, kind: input, shape index: {}]   ;;  %s6164_s24 = inlined_call_operand.vmem [shape: f32[1,128], index: 24, kind: input, shape index: {}]   ;;  %s6165_s25 = inlined_call_operand.hbm [shape: f32[2,8,128], index: 25, kind: output, shape index: {}]  }
   0x1   :  { %6184 = sst [smem:[#allocation11_spill]] %s6140_s0 }
   0x2   :  { %6185 = sst [smem:[#allocation12_spill]] %s6141_s1 }
   0x3   :  { %6186 = sst [smem:[#allocation13_spill]] %s6142_s2 }
   0x4   :  { %6187 = sst [smem:[#allocation14_spill]] %s6143_s3 }
   0x5   :  { %6188 = sst [smem:[#allocation15_spill]] %s6144_s4 }
   0x6   :  { %6189 = sst [smem:[#allocation16_spill]] %s6145_s5 }
   0x7   :  { %6190 = sst [smem:[#allocation17_spill]] %s6146_s6 }
   0x8   :  { %6191 = sst [smem:[#allocation18_spill]] %s6147_s7 }
   0x9   :  { %6192 = sst [smem:[#allocation19_spill]] %s6148_s8 }
   0xa   :  { %6193 = sst [smem:[#allocation20_spill]] %s6149_s9 }
   0xb   :  { %6194 = sst [smem:[#allocation21_spill]] %s6150_s10 }
   0xc   :  { %6195 = sst [smem:[#allocation22_spill]] %s6151_s11 }
   0xd   :  { %6196 = sst [smem:[#allocation23_spill]] %s6159_s19 }
   0xe   :  { %6197 = sst [smem:[#allocation24_spill]] %s6160_s20 }
   0xf   :  { %6198 = sst [smem:[#allocation25_spill]] %s6165_s25 }
  0x10   :  { %30 = vsyncpa [#allocation3], 0 }
  0x11   :  { %32 = vsyncpa [#allocation3 + $0x1], 0  ;;  %s5270_s29 = smov 0   ;;  %s5272_s2 = smov 0  }
  0x12   :  { %s5274_s6 = smov 0   ;;  %s5276_s30 = smov 0  }
  0x13 LB: > { %6199 = sst [smem:[#allocation5_spill]] %s5117_s29  ;;  %s5291_s7 = sadd.s32 4294967295, %s5129_s30   ;;  %s5129_s30 = sphi %s5276_s30, %s6229_s30   ;;  %s5125_s6 = sphi %s5274_s6, %s6231_s6   ;;  %s5121_s2 = sphi %s5272_s2, %s6233_s2   ;;  %s5117_s29 = sphi %s5270_s29, %s6232_s29  }
  0x14   : > { %6200 = sst [smem:[#allocation6_spill]] %s5125_s6  ;;  %s4438_s3 = sadd.s32 4294967294, %s5129_s30  }
  0x15   : > { %6201 = sst [smem:[#allocation7_spill]] %s5129_s30  ;;  %s5295_s26 = sadd.s32 1, %s5129_s30  }
  0x16   : > { %6202 = sst [smem:[#allocation8_spill]] %s5295_s26  ;;  %s590_s1 = sadd.s32 1, %s5125_s6 }
  0x17   : > { %s587_s8 = ssub.s32 %s5129_s30, %s5295_s26  ;;  %p600_p0 = scmp.ne.s32.totalorder %s5125_s6, %s5121_s2 }
  0x18   : > { %p588_p1 = scmp.eq.s32.totalorder %s587_s8, 0  ;;  %p601_p2 = scmp.eq.s32.totalorder %s5291_s7, 1 }
  0x19   : > { %p606_p3 = scmp.ne.s32.totalorder %s5121_s2, %s5117_s29  ;;  %p607_p4 = scmp.eq.s32.totalorder %s4438_s3, 1 }
  0x1a   : > { %s5306_s27 = scalar_select %p588_p1, %s5125_s6, %s590_s1  }
  0x1b   : > { %p5308_p5 = por %p601_p2, %p600_p0  ;;  %p5312_p6 = por %p607_p4, %p606_p3 }
  0x1c   : > { %6203 = sst [smem:[#allocation9_spill]] %s5306_s27  ;;  %p4441_p7 = scmp.ge.s32.totalorder %s5129_s30, 1 }
  0x1d   : > { %s6205_s28 = scalar_select %p5312_p6, 1, 0 }
  0x1e   : > { %p715_p8 = scmp.lt.s32.totalorder %s5129_s30, 3 }
  0x1f   : > { %6206 = sst [smem:[#allocation10_spill]] %s6205_s28 }
  0x20   : > { %p716_p9 = pnand %p4441_p7, %p715_p8 }
  0x21   : > { %s6207_s0 = sld [smem:[#allocation16_spill]] (!%p716_p9)  ;;  %v5131_v2 = vmov (!%p716_p9), 0   ;;  %p793_p10 = scmp.lt.s32.totalorder (!%p716_p9), %s5291_s7, 1  ;;  %v5132_v20 = vmov (!%p716_p9), 0.0   ;;  %v847_v23 = vlaneseq (!%p716_p9)  ;;  %vm5136_vm0 = vmmov (!%p716_p9), 0  }
  0x22   : > { %719 = sbr.rel (%p716_p9) target bundleno = 4075 (0xfeb), region = 120  ;;  %1022 = vmatprep.mubr.bf16.mxu0 (!%p716_p9), %v5131_v2  ;;  %s6208_s20 = sld [smem:[#allocation11_spill]] (!%p716_p9)  ;;  %4685 = vmatprep.subr.bf16.mxu1 (!%p716_p9), %v5132_v20  ;;  %v5137_v41 = vmov (!%p716_p9), 1983009808   ;;  %v5138_v43 = vmov (!%p716_p9), 1934713408  }
  0x23   : > { %v5395_v25 = vshrl.u32 (!%p716_p9), %v847_v23, 7  ;;  %s6209_s6 = sld [smem:[#allocation17_spill]] (!%p716_p9)  ;;  %s6176_s5 = smov (!%p716_p9), 32   ;;  %4701 = vmatprep.mubr.msk.bf16.mxu1 (!%p716_p9), %vm5136_vm0, %v5132_v20  ;;  %v1110_v42 = vunpack.c.l.s4 (!%p716_p9), %v5137_v41  ;;  %v1142_v44 = vunpack.c.l.s4 (!%p716_p9), %v5138_v43  ;;  %vm1547_vm1 = vcmask (!%p716_p9), 261120  }
  0x24   : > { %s6180_s25 = smov (!%p716_p9), 96   ;;  %s6178_s1 = smov (!%p716_p9), 64   ;;  %vm1740_vm2 = vcmask (!%p716_p9), 64512   ;;  %vm1792_vm3 = vcmask (!%p716_p9), 1043456   ;;  %vm2123_vm4 = vcmask (!%p716_p9), 523264   ;;  %vm2125_vm5 = vcmask (!%p716_p9), 785408  }
  0x25   : > { %v5402_v27 = vsub.s32 (!%p716_p9), 1, %v5395_v25  ;;  %v5411_v29 = vsub.s32 (!%p716_p9), 0, %v5395_v25  ;;  %v1111_v45 = vunpack.c.0.s8 (!%p716_p9), %v1110_v42  ;;  %v1143_v48 = vunpack.c.0.s8 (!%p716_p9), %v1142_v44  ;;  %s6211_s9 = sld [smem:[#allocation13_spill]] (!%p716_p9)  ;;  %s6212_s27 = sld [smem:[#allocation18_spill]] (!%p716_p9) }
  0x26   : > { %s6213_s11 = sld [smem:[#allocation22_spill]] (!%p716_p9)  ;;  %s6217_s28 = smov (!%p716_p9), 96   ;;  %vm3476_vm6 = vcmask (!%p716_p9), 130048  }
  0x27   : > { %v4908_v0 = vld [vmem:[%s6207_s0 + $0x4] ss:$12 sps:$4 sm:$0xff] (!%p716_p9)   ;;  %v4910_v1 = vld [vmem:[%s6207_s0] ss:$12 sps:$4 sm:$0xff] (!%p716_p9)   ;;  %v4911_v3 = vld [vmem:[%s6207_s0 + $0x1c] ss:$12 sps:$4 sm:$0xff] (!%p716_p9)   ;;  %v5442_v49 = vsub.s32 (!%p716_p9), %v1111_v45, %v5395_v25  ;;  %v5445_v56 = vsub.s32 (!%p716_p9), %v1143_v48, %v5395_v25 }
  0x28   : > { %990 = vmatprep.subr.bf16.mxu0 (!%p716_p9), %v4908_v0  ;;  %v4913_v4 = vld [vmem:[%s6207_s0 + $0x18] ss:$12 sps:$4 sm:$0xff] (!%p716_p9)   ;;  %v4914_v5 = vld [vmem:[%s6207_s0 + $0x34] ss:$12 sps:$4 sm:$0xff] (!%p716_p9)   ;;  %v4916_v6 = vld [vmem:[%s6207_s0 + $0x30] ss:$12 sps:$4 sm:$0xff] (!%p716_p9)  }
  0x29   : > { %991 = vmatpush1.bf16.msra.mxu0 %v4910_v1  ;;  %s5336_s3 = scalar_select %p793_p10, %s5291_s7, 1  ;;  %v4917_v7 = vld [vmem:[%s6207_s0 + $0x4c] ss:$12 sps:$4 sm:$0xff]   ;;  %v4919_v8 = vld [vmem:[%s6207_s0 + $0x48] ss:$12 sps:$4 sm:$0xff]  }
  0x2a   : > { %992 = vmatprep.subr.bf16.mxu0 %v4911_v3  ;;  %v4920_v9 = vld [vmem:[%s6207_s0 + $0x64] ss:$12 sps:$4 sm:$0xff]   ;;  %v4922_v10 = vld [vmem:[%s6207_s0 + $0x60] ss:$12 sps:$4 sm:$0xff]   ;;  %v4923_v11 = vld [vmem:[%s6207_s0 + $0x7c] ss:$12 sps:$4 sm:$0xff]  }
  0x2b   : > { %s4443_s29 = sshll.u32 %s5336_s3, 3  ;;  %v4925_v12 = vld [vmem:[%s6207_s0 + $0x78] ss:$12 sps:$4 sm:$0xff]   ;;  %v4926_v13 = vld [vmem:[%s6207_s0 + $0x94] ss:$12 sps:$4 sm:$0xff]   ;;  %s6219_s8 = smov 32  }
  0x2c   : > { %v4928_v14 = vld [vmem:[%s6207_s0 + $0x90] ss:$12 sps:$4 sm:$0xff]   ;;  %v4929_v15 = vld [vmem:[%s6207_s0 + $0xac] ss:$12 sps:$4 sm:$0xff]   ;;  %s5372_s19 = scalar_lea.vmem %s6208_s20, %s4443_s29  ;;  %v4931_v16 = vld [vmem:[%s6207_s0 + $0xa8] ss:$12 sps:$4 sm:$0xff]  }
  0x2d   : > { %993 = vmatpush1.bf16.msra.mxu0 %v4913_v4  ;;  %v809_v17 = vld [vmem:[%s5372_s19] sm:$0xff]  ;;  %v4932_v19 = vld [vmem:[%s6207_s0 + $0x8] ss:$12 sps:$4 sm:$0xff]   ;;  %v4935_v24 = vld [vmem:[%s6207_s0 + $0x50] ss:$12 sps:$4 sm:$0xff]   ;;  %s4594_s29 = sshll.u32 %s5336_s3, 4 }
  0x2e   : > { %994 = vmatprep.subr.bf16.mxu0 %v4914_v5  ;;  %v812_v18 = vpack.c.bf16 %v809_v17, %v809_v17  ;;  %4686 = vmatpush3.bf16.msra.mxu1 %v4932_v19  ;;  %v4933_v21 = vld [vmem:[%s6207_s0 + $0x20] ss:$12 sps:$4 sm:$0xff]   ;;  %v4934_v22 = vld [vmem:[%s6207_s0 + $0x38] ss:$12 sps:$4 sm:$0xff]   ;;  %v4936_v26 = vld [vmem:[%s6207_s0 + $0x68] ss:$12 sps:$4 sm:$0xff]  }
  0x2f   : > { %4687 = vmatprep.subr.bf16.mxu1 %v5132_v20  ;;  %v5407_v28 = vld [vmem:[%s6209_s6] sm:$0x7]  ;;  %v4938_v37 = vld [vmem:[%s6207_s0 + $0x98] ss:$12 sps:$4 sm:$0xff]   ;;  %v4939_v40 = vld [vmem:[%s6207_s0 + $0xb0] ss:$12 sps:$4 sm:$0xff]  }
  0x30   : > { %v854_v30 = vrot.slane %v5407_v28, %v5402_v27  ;;  %v4937_v31 = vld [vmem:[%s6207_s0 + $0x80] ss:$12 sps:$4 sm:$0xff]   ;;  %v850_v34 = vrot.slane %v5407_v28, %v5411_v29  ;;  %s6210_s6 = sld [smem:[#allocation14_spill]]  ;;  %s6220_s10 = sld [smem:[#allocation21_spill]] }
  0x31   : > { %995 = vmatpush1.bf16.msra.mxu0 %v4916_v6 }
  0x32   : > { %996 = vmatprep.subr.bf16.mxu0 %v4917_v7  ;;  %4688 = vmatpush3.bf16.msra.mxu1 %v4933_v21 }
  0x33   : > { %4689 = vmatprep.subr.bf16.mxu1 %v5132_v20 }
  0x35   : > { %997 = vmatpush1.bf16.msra.mxu0 %v4919_v8 }
  0x36   : > { %998 = vmatprep.subr.bf16.mxu0 %v4920_v9  ;;  %4690 = vmatpush3.bf16.msra.mxu1 %v4934_v22  ;;  %s804_s26 = scalar_lea.vmem %s6210_s6, %s5336_s3 }
  0x37   : > { %4691 = vmatprep.subr.bf16.mxu1 %v5132_v20 }
  0x39   : > { %999 = vmatpush1.bf16.msra.mxu0 %v4922_v10 }
  0x3a   : > { %1000 = vmatprep.subr.bf16.mxu0 %v4923_v11  ;;  %4692 = vmatpush3.bf16.msra.mxu1 %v4935_v24 }
  0x3b   : > { %4693 = vmatprep.subr.bf16.mxu1 %v5132_v20 }
  0x3d   : > { %1001 = vmatpush1.bf16.msra.mxu0 %v4925_v12 }
  0x3e   : > { %1002 = vmatprep.subr.bf16.mxu0 %v4926_v13  ;;  %4694 = vmatpush3.bf16.msra.mxu1 %v4936_v26 }
  0x3f   : > { %4695 = vmatprep.subr.bf16.mxu1 %v5132_v20 }
  0x41   : > { %1003 = vmatpush1.bf16.msra.mxu0 %v4928_v14 }
  0x42   : > { %1004 = vmatprep.subr.bf16.mxu0 %v4929_v15  ;;  %4696 = vmatpush3.bf16.msra.mxu1 %v4937_v31 }
  0x43   : > { %4697 = vmatprep.subr.bf16.mxu1 %v5132_v20 }
  0x45   : > { %1005 = vmatpush1.bf16.msra.mxu0 %v4931_v16 }
  0x46   : > { %4729 = vmatprep.subr.bf16.mxu0 %v5132_v20  ;;  %4698 = vmatpush3.bf16.msra.mxu1 %v4938_v37 }
  0x47   : > { %4699 = vmatprep.subr.bf16.mxu1 %v5132_v20 }
  0x48   : > { %1023 = vmatmul.mubr.bf16.vlgmr.msra.gmra.mrb[0].mxu0 %v812_v18 }
  0x49   : > { %4731 = vmatprep.mubr.msk.bf16.mxu0 %vm5136_vm0, %v5132_v20 }
  0x4a   : > { %4700 = vmatpush3.bf16.msra.mxu1 %v4939_v40 }
  0x4b   : > { %4705 = vmatprep.subr.bf16.mxu1 %v5132_v20 }
  0x4d   : > { %4702 = vmatmul.mubr.bf16.vlgmr.msra.gmra.mrb[0].mxu1 %v812_v18 }
  0x4e   : > { %4707 = vmatprep.mubr.msk.bf16.mxu1 %vm5136_vm0, %v5132_v20 }
 0x11b   : > { %v1024_v32 = vpop.f32.mrb[0].mxu0 }
 0x11c   : > { %v1026_v33 = vpop.f32.mrb[1].mxu0  ;;  %v1025_v39 = vadd.f32 %v1024_v32, %v850_v34 }
 0x11d   : > { %v1027_v35 = vadd.f32 %v1026_v33, %v854_v30  ;;  %v1028_v36 = vpop.f32.mrb[2].mxu0 }
 0x11e   : > { %v1029_v38 = vpop.f32.mrb[3].mxu0 }
 0x11f   : > { %1254 = vrot.lane.b32.xlu1 %v1027_v35, %s6176_s5  ;;  %1248 = vrot.lane.b32.xlu0 %v1027_v35, %s6180_s25 }
 0x123   : > { %1251 = vrot.lane.b32.xlu0 %v1027_v35, %s6178_s1  ;;  %1098 = vrot.lane.b32.xlu1 %v1025_v39, %s6180_s25 }
 0x127   : > { %1101 = vrot.lane.b32.xlu0 %v1025_v39, %s6178_s1  ;;  %1104 = vrot.lane.b32.xlu1 %v1025_v39, %s6176_s5 }
 0x191   : > { %v1255_v46 = vpop.permute.xlu1 %1254  ;;  %v1249_v47 = vpop.permute.xlu0 %1248 }
 0x192   : > { %v1273_v50 = vcombine.low %v1249_v47, %v1255_v46  ;;  %v1274_v51 = vcombine.high %v1249_v47, %v1255_v46 }
 0x194   : > { %v1281_v57 = vrot.slane %v1273_v50, %v5442_v49  ;;  %v1288_v58 = vrot.slane %v1274_v51, %v5442_v49 }
 0x195   : > { %v1252_v52 = vpop.permute.xlu0 %1251  ;;  %v1099_v53 = vpop.permute.xlu1 %1098 }
 0x196   : > { %v1257_v54 = vcombine.low %v1027_v35, %v1252_v52  ;;  %v1258_v55 = vcombine.high %v1027_v35, %v1252_v52 }
 0x198   : > { %v1265_v59 = vrot.slane %v1257_v54, %v5442_v49  ;;  %v1272_v60 = vrot.slane %v1258_v55, %v5442_v49 }
 0x199   : > { %v1102_v61 = vpop.permute.xlu0 %1101  ;;  %v1105_v62 = vpop.permute.xlu1 %1104 }
 0x19a   : > { %v1289_v63 = vcombine.low %v1265_v59, %v1281_v57  ;;  %v1290_v0 = vcombine.high %v1265_v59, %v1281_v57  ;;  %v1305_v1 = vcombine.low %v1272_v60, %v1288_v58  ;;  %v1306_v3 = vcombine.high %v1272_v60, %v1288_v58 }
 0x19b   : > { %v1107_v4 = vcombine.low %v1025_v39, %v1102_v61  ;;  %v1108_v5 = vcombine.high %v1025_v39, %v1102_v61  ;;  %v1123_v6 = vcombine.low %v1099_v53, %v1105_v62  ;;  %v1124_v7 = vcombine.high %v1099_v53, %v1105_v62 }
 0x19c   : > { %v1297_v8 = vrot.slane %v1289_v63, %v5445_v56  ;;  %v1304_v9 = vrot.slane %v1290_v0, %v5445_v56  ;;  %v1313_v10 = vrot.slane %v1305_v1, %v5445_v56  ;;  %v1320_v11 = vrot.slane %v1306_v3, %v5445_v56 }
 0x19d   : > { %v1115_v12 = vrot.slane %v1107_v4, %v5442_v49  ;;  %v1122_v13 = vrot.slane %v1108_v5, %v5442_v49  ;;  %v1131_v14 = vrot.slane %v1123_v6, %v5442_v49  ;;  %v1138_v15 = vrot.slane %v1124_v7, %v5442_v49 }
 0x19e   : > { %v1325_v16 = vcombine.low %v1297_v8, %v1304_v9  ;;  %v4473_v17 = vcombine.high %v1297_v8, %v1304_v9  ;;  %v1341_v18 = vcombine.low %v1313_v10, %v1320_v11  ;;  %v4474_v19 = vcombine.high %v1313_v10, %v1320_v11 }
 0x19f   : > { %v1139_v21 = vcombine.low %v1115_v12, %v1131_v14  ;;  %v1140_v22 = vcombine.high %v1115_v12, %v1131_v14  ;;  %v1155_v23 = vcombine.low %v1122_v13, %v1138_v15  ;;  %v1156_v24 = vcombine.high %v1122_v13, %v1138_v15 }
 0x1a0   : > { %v1332_v26 = vrot.slane %v1325_v16, %v5442_v49  ;;  %v1340_v30 = vrot.slane %v4473_v17, %v5442_v49  ;;  %v1348_v31 = vrot.slane %v1341_v18, %v5442_v49  ;;  %v1356_v32 = vrot.slane %v4474_v19, %v5442_v49 }
 0x1a1   : > { %v1147_v33 = vrot.slane %v1139_v21, %v5445_v56  ;;  %v1154_v34 = vrot.slane %v1140_v22, %v5445_v56  ;;  %v1163_v35 = vrot.slane %v1155_v23, %v5445_v56  ;;  %v1170_v36 = vrot.slane %v1156_v24, %v5445_v56  ;;  %v1065_v21 = vpop.f32.mrb[0].mxu1 }
 0x1a2   : > { %v1357_v37 = vcombine.low %v1332_v26, %v1340_v30  ;;  %v1373_v38 = vcombine.low %v1348_v31, %v1356_v32  ;;  %v1358_v59 = vcombine.high %v1332_v26, %v1340_v30  ;;  %v1374_v60 = vcombine.high %v1348_v31, %v1356_v32  ;;  %v4703_v22 = vpop.f32.mrb[1].mxu1  ;;  %v1071_v26 = vld [vmem:[%s6211_s9] sm:$0xff]  ;;  %s6221_s9 = sld [smem:[#allocation15_spill]] }
 0x1a3   : > { %v1175_v39 = vcombine.low %v1147_v33, %v1154_v34  ;;  %v4471_v40 = vcombine.high %v1147_v33, %v1154_v34  ;;  %v1191_v41 = vcombine.low %v1163_v35, %v1170_v36  ;;  %v4472_v42 = vcombine.high %v1163_v35, %v1170_v36  ;;  %v1068_v23 = vpop.f32.mrb[2].mxu1  ;;  %v4470_v30 = vld [vmem:[%s804_s26] ss:$0 sm:$0xff]  ;;  %s6215_s26 = sld [smem:[#allocation12_spill]] }
 0x1a4   : > { %v1365_v43 = vrot.slane %v1357_v37, %v5445_v56  ;;  %v1381_v44 = vrot.slane %v1373_v38, %v5445_v56  ;;  %v1372_v63 = vrot.slane %v1358_v59, %v5445_v56  ;;  %v1388_v0 = vrot.slane %v1374_v60, %v5445_v56  ;;  %v4704_v24 = vpop.f32.mrb[3].mxu1 }
 0x1a5   : > { %v1182_v45 = vrot.slane %v1175_v39, %v5442_v49  ;;  %v1190_v46 = vrot.slane %v4471_v40, %v5442_v49  ;;  %v1198_v47 = vrot.slane %v1191_v41, %v5442_v49  ;;  %v1206_v48 = vrot.slane %v4472_v42, %v5442_v49 }
 0x1a6   : > { %v1389_v50 = vcombine.low %v1365_v43, %v1381_v44  ;;  %v1390_v58 = vcombine.high %v1365_v43, %v1381_v44  ;;  %v1391_v4 = vcombine.low %v1372_v63, %v1388_v0  ;;  %v1392_v13 = vcombine.high %v1372_v63, %v1388_v0 }
 0x1a7   : > { %v1207_v51 = vcombine.low %v1182_v45, %v1190_v46  ;;  %v1223_v52 = vcombine.low %v1198_v47, %v1206_v48  ;;  %v1208_v5 = vcombine.high %v1182_v45, %v1190_v46  ;;  %v1224_v6 = vcombine.high %v1198_v47, %v1206_v48 }
 0x1a8   : > { %v1393_v53 = vpack.c.bf16 %v1389_v50, %v1389_v50  ;;  %v1394_v62 = vpack.c.bf16 %v1390_v58, %v1390_v58  ;;  %v1395_v8 = vpack.c.bf16 %v1391_v4, %v1391_v4  ;;  %v1396_v15 = vpack.c.bf16 %v1392_v13, %v1392_v13  ;;  %s807_s30 = scalar_lea.vmem %s6221_s9, %s5336_s3 }
 0x1a9   : > { %v1215_v54 = vrot.slane %v1207_v51, %v5445_v56  ;;  %v1231_v55 = vrot.slane %v1223_v52, %v5445_v56  ;;  %v1222_v10 = vrot.slane %v1208_v5, %v5445_v56  ;;  %v1238_v11 = vrot.slane %v1224_v6, %v5445_v56  ;;  %s801_s20 = scalar_lea.vmem %s6215_s26, %s4594_s29  ;;  %s6216_s29 = sld [smem:[#allocation19_spill]] }
 0x1aa   : > { %v1552_v57 = vsel %vm1547_vm1, %v1393_v53, 0  ;;  %v1598_v3 = vsel %vm1547_vm1, %v1394_v62, 0  ;;  %v1644_v12 = vsel %vm1547_vm1, %v1395_v8, 0  ;;  %v1690_v17 = vsel %vm1547_vm1, %v1396_v15, 0  ;;  %s6223_s26 = sld [smem:[#allocation24_spill]] }
 0x1ab   : > { %4706 = vmatpush3.bf16.xpose.msra.mxu1 %v1552_v57  ;;  %v1239_v61 = vcombine.low %v1215_v54, %v1231_v55  ;;  %v1240_v7 = vcombine.high %v1215_v54, %v1231_v55  ;;  %v1241_v14 = vcombine.low %v1222_v10, %v1238_v11  ;;  %v1242_v18 = vcombine.high %v1222_v10, %v1238_v11 }
 0x1ac   : > { %4711 = vmatprep.subr.bf16.mxu1 %v5132_v20  ;;  %v1079_v31 = vadd.f32 %v4470_v30, %v1071_v26  ;;  %v857_v53 = vsub.s32 2, %v5395_v25 }
 0x1ad   : > { %v1243_v1 = vpack.c.bf16 %v1239_v61, %v1239_v61  ;;  %v1244_v9 = vpack.c.bf16 %v1240_v7, %v1240_v7  ;;  %v1245_v16 = vpack.c.bf16 %v1241_v14, %v1241_v14  ;;  %v1246_v19 = vpack.c.bf16 %v1242_v18, %v1242_v18 }
 0x1ae   : > { %v858_v57 = vrot.slane %v5407_v28, %v857_v53 }
 0x1b0   : > { %v1066_v63 = vadd.f32 %v1065_v21, %v858_v57 }
 0x1b2   : > { %4708 = vmatmul.mubr.msk.bf16.vlgmr.msra.gmra.mrb[4].mxu1 %vm1547_vm1, %v1243_v1 }
 0x1b3   : > { %4712 = vmatpush3.bf16.xpose.msra.mxu1 %v1598_v3  ;;  %4713 = vmatprep.mubr.msk.bf16.mxu1 %vm5136_vm0, %v5132_v20 }
 0x1b4   : > { %4717 = vmatprep.subr.bf16.mxu1 %v5132_v20 }
 0x1ba   : > { %4714 = vmatmul.mubr.msk.bf16.vlgmr.msra.gmra.mrb[8].mxu1 %vm1547_vm1, %v1244_v9 }
 0x1bb   : > { %4718 = vmatpush3.bf16.xpose.msra.mxu1 %v1644_v12  ;;  %4719 = vmatprep.mubr.msk.bf16.mxu1 %vm5136_vm0, %v5132_v20 }
 0x1bc   : > { %4723 = vmatprep.subr.bf16.mxu1 %v5132_v20 }
 0x1c2   : > { %4720 = vmatmul.mubr.msk.bf16.vlgmr.msra.gmra.mrb[12].mxu1 %vm1547_vm1, %v1245_v16 }
 0x1c3   : > { %4724 = vmatpush3.bf16.xpose.msra.mxu1 %v1690_v17  ;;  %4725 = vmatprep.mubr.msk.bf16.mxu1 %vm5136_vm0, %v5132_v20 }
 0x1c4   : > { %4735 = vmatprep.subr.bf16.mxu1 %v5132_v20 }
 0x1ca   : > { %4726 = vmatmul.mubr.msk.bf16.vlgmr.msra.gmra.mrb[16].mxu1 %vm1547_vm1, %v1246_v19 }
 0x1cb   : > { %4737 = vmatprep.mubr.msk.bf16.mxu1 %vm5136_vm0, %v5132_v20 }
 0x285   : > { %v1588_v32 = vpop.f32.mrb[4].mxu1 }
 0x286   : > { %v1732_v33 = vmul.f32 0.17677669, %v1588_v32  ;;  %v4709_v34 = vpop.f32.mrb[5].mxu1 }
 0x287   : > { %v1591_v35 = vpop.f32.mrb[6].mxu1 }
 0x288   : > { %v4710_v36 = vpop.f32.mrb[7].mxu1  ;;  %v1736_v37 = vadd.f32 %v1732_v33, %v1079_v31 }
 0x28a   : > { %v1741_v38 = vsel %vm1740_vm2, %v1736_v37, -inf }
 0x28b   : > { %1742 = vmax.xlane.f32.xlu0 %v1741_v38 }
 0x28d   : > { %v1634_v39 = vpop.f32.mrb[8].mxu1 }
 0x28e   : > { %v1733_v40 = vmul.f32 0.17677669, %v1634_v39  ;;  %v4715_v41 = vpop.f32.mrb[9].mxu1 }
 0x28f   : > { %v1637_v42 = vpop.f32.mrb[10].mxu1 }
 0x290   : > { %v4716_v43 = vpop.f32.mrb[11].mxu1  ;;  %v1737_v44 = vadd.f32 %v1733_v40, %v1079_v31 }
 0x292   : > { %v1744_v45 = vsel %vm1740_vm2, %v1737_v44, -inf }
 0x293   : > { %1745 = vmax.xlane.f32.xlu1 %v1744_v45 }
 0x295   : > { %v1680_v46 = vpop.f32.mrb[12].mxu1 }
 0x296   : > { %v1734_v47 = vmul.f32 0.17677669, %v1680_v46  ;;  %v4721_v48 = vpop.f32.mrb[13].mxu1 }
 0x297   : > { %v1683_v50 = vpop.f32.mrb[14].mxu1 }
 0x298   : > { %v4722_v51 = vpop.f32.mrb[15].mxu1  ;;  %v1738_v52 = vadd.f32 %v1734_v47, %v1079_v31 }
 0x29a   : > { %v1747_v54 = vsel %vm1740_vm2, %v1738_v52, -inf }
 0x29b   : > { %1748 = vmax.xlane.f32.xlu0 %v1747_v54 }
 0x29d   : > { %v1726_v55 = vpop.f32.mrb[16].mxu1 }
 0x29e   : > { %v1735_v58 = vmul.f32 0.17677669, %v1726_v55  ;;  %v4727_v59 = vpop.f32.mrb[17].mxu1 }
 0x29f   : > { %v1729_v60 = vpop.f32.mrb[18].mxu1 }
 0x2a0   : > { %v4728_v61 = vpop.f32.mrb[19].mxu1  ;;  %v1739_v62 = vadd.f32 %v1735_v58, %v1079_v31 }
 0x2a2   : > { %v1750_v0 = vsel %vm1740_vm2, %v1739_v62, -inf }
 0x2a3   : > { %1751 = vmax.xlane.f32.xlu0 %v1750_v0 }
 0x2a4   : > { %1398 = vrot.lane.b32.xlu1 %v1066_v63, %s6180_s25 }
 0x318   : > { %v1743_v1 = vpop.xlane.xlu0 %1742 }
 0x319   : > { %v1753_v3 = vsub.f32 %v1736_v37, %v1743_v1 }
 0x31b   : > { %v1757_v25 = vmul.f32 1.442695, %v1753_v3 }
 0x31d   : > { %5028 = vpow2.f32 %v1757_v25 }
 0x320   : > { %v1746_v4 = vpop.xlane.xlu1 %1745 }
 0x321   : > { %v1754_v5 = vsub.f32 %v1737_v44, %v1746_v4 }
 0x323   : > { %v1759_v6 = vmul.f32 1.442695, %v1754_v5 }
 0x324   : > { %v1399_v21 = vpop.permute.xlu1 %1398 }
 0x325   : > { %5030 = vpow2.f32 %v1759_v6 }
 0x327   : > { %v5513_v28 = vpop.eup %5028 }
 0x328   : > { %v1765_v7 = vsel %vm1740_vm2, %v5513_v28, 0.0  ;;  %v1749_v10 = vpop.xlane.xlu0 %1748 }
 0x329   : > { %1766 = vadd.xlane.f32.xlu1 %v1765_v7  ;;  %v1755_v11 = vsub.f32 %v1738_v52, %v1749_v10 }
 0x32b   : > { %v1761_v12 = vmul.f32 1.442695, %v1755_v11 }
 0x32d   : > { %5032 = vpow2.f32 %v1761_v12 }
 0x32f   : > { %v5517_v8 = vpop.eup %5030 }
 0x330   : > { %v1768_v9 = vsel %vm1740_vm2, %v5517_v8, 0.0  ;;  %v1752_v13 = vpop.xlane.xlu0 %1751 }
 0x331   : > { %1769 = vadd.xlane.f32.xlu0 %v1768_v9  ;;  %v1756_v14 = vsub.f32 %v1739_v62, %v1752_v13 }
 0x333   : > { %v1763_v15 = vmul.f32 1.442695, %v1756_v14 }
 0x335   : > { %5034 = vpow2.f32 %v1763_v15 }
 0x337   : > { %v5523_v16 = vpop.eup %5032 }
 0x338   : > { %v1771_v17 = vsel %vm1740_vm2, %v5523_v16, 0.0 }
 0x33a   : > { %1404 = vrot.lane.b32.xlu1 %v1066_v63, %s6176_s5 }
 0x33f   : > { %v5527_v18 = vpop.eup %5034 }
 0x340   : > { %v1774_v19 = vsel %vm1740_vm2, %v5527_v18, 0.0 }
 0x347   : > { %1401 = vrot.lane.b32.xlu0 %v1066_v63, %s6178_s1 }
 0x35e   : > { %1772 = vadd.xlane.f32.xlu1 %v1771_v17 }
 0x366   : > { %1775 = vadd.xlane.f32.xlu0 %v1774_v19 }
 0x3b6   : > { %v1767_v22 = vpop.xlane.xlu1 %1766 }
 0x3b7   : > { %5036 = vrcp.f32 %v1767_v22 }
 0x3ba   : > { %v1405_v23 = vpop.permute.xlu1 %1404 }
 0x3bb   : > { %v1423_v26 = vcombine.low %v1399_v21, %v1405_v23  ;;  %v1424_v30 = vcombine.high %v1399_v21, %v1405_v23 }
 0x3bd   : > { %v1431_v34 = vrot.slane %v1423_v26, %v5442_v49  ;;  %v1438_v35 = vrot.slane %v1424_v30, %v5442_v49 }
 0x3be   : > { %v1770_v24 = vpop.xlane.xlu0 %1769 }
 0x3bf   : > { %5038 = vrcp.f32 %v1770_v24 }
 0x3c1   : > { %v5037_v60 = vpop.eup %5036 }
 0x3c2   : > { %v1402_v31 = vpop.permute.xlu0 %1401  ;;  %v1781_v6 = vmul.f32 %v5037_v60, %v5513_v28 }
 0x3c3   : > { %v1407_v32 = vcombine.low %v1066_v63, %v1402_v31  ;;  %v1408_v33 = vcombine.high %v1066_v63, %v1402_v31 }
 0x3c4   : > { %v1785_v15 = vpack.c.bf16 %v1781_v6, %v1781_v6 }
 0x3c5   : > { %v1415_v36 = vrot.slane %v1407_v32, %v5442_v49  ;;  %v1422_v37 = vrot.slane %v1408_v33, %v5442_v49  ;;  %v4940_v32 = vld [vmem:[%s6212_s27] sm:$0xff]   ;;  %v4943_v33 = vld [vmem:[%s6212_s27 + $0x18] sm:$0xff]  }
 0x3c7   : > { %v1439_v38 = vcombine.low %v1415_v36, %v1431_v34  ;;  %v1440_v39 = vcombine.high %v1415_v36, %v1431_v34  ;;  %v1455_v40 = vcombine.low %v1422_v37, %v1438_v35  ;;  %v1456_v41 = vcombine.high %v1422_v37, %v1438_v35  ;;  %v4944_v34 = vld [vmem:[%s6212_s27 + $0x20] sm:$0xff]   ;;  %v4945_v35 = vld [vmem:[%s6212_s27 + $0x28] sm:$0xff]  }
 0x3c9   : > { %v1447_v42 = vrot.slane %v1439_v38, %v5445_v56  ;;  %v1454_v43 = vrot.slane %v1440_v39, %v5445_v56  ;;  %v1463_v44 = vrot.slane %v1455_v40, %v5445_v56  ;;  %v1470_v45 = vrot.slane %v1456_v41, %v5445_v56  ;;  %v5039_v1 = vpop.eup %5038 }
 0x3ca   : > { %v1782_v7 = vmul.f32 %v5039_v1, %v5517_v8 }
 0x3cb   : > { %v1475_v46 = vcombine.low %v1447_v42, %v1454_v43  ;;  %v4475_v47 = vcombine.high %v1447_v42, %v1454_v43  ;;  %v1491_v48 = vcombine.low %v1463_v44, %v1470_v45  ;;  %v4476_v50 = vcombine.high %v1463_v44, %v1470_v45 }
 0x3cc   : > { %v1786_v17 = vpack.c.bf16 %v1782_v7, %v1782_v7 }
 0x3cd   : > { %v1482_v51 = vrot.slane %v1475_v46, %v5442_v49  ;;  %v1490_v52 = vrot.slane %v4475_v47, %v5442_v49  ;;  %v1498_v53 = vrot.slane %v1491_v48, %v5442_v49  ;;  %v1506_v54 = vrot.slane %v4476_v50, %v5442_v49 }
 0x3cf   : > { %v1507_v55 = vcombine.low %v1482_v51, %v1490_v52  ;;  %v1523_v57 = vcombine.low %v1498_v53, %v1506_v54  ;;  %v1508_v58 = vcombine.high %v1482_v51, %v1490_v52  ;;  %v1524_v59 = vcombine.high %v1498_v53, %v1506_v54 }
 0x3d1   : > { %v1515_v61 = vrot.slane %v1507_v55, %v5445_v56  ;;  %v1531_v62 = vrot.slane %v1523_v57, %v5445_v56  ;;  %v1522_v63 = vrot.slane %v1508_v58, %v5445_v56  ;;  %v1538_v0 = vrot.slane %v1524_v59, %v5445_v56 }
 0x3d3   : > { %v1539_v3 = vcombine.low %v1515_v61, %v1531_v62  ;;  %v1540_v25 = vcombine.high %v1515_v61, %v1531_v62  ;;  %v1541_v4 = vcombine.low %v1522_v63, %v1538_v0  ;;  %v1542_v5 = vcombine.high %v1522_v63, %v1538_v0 }
 0x3d5   : > { %v1543_v9 = vpack.c.bf16 %v1539_v3, %v1539_v3  ;;  %v1544_v10 = vpack.c.bf16 %v1540_v25, %v1540_v25  ;;  %v1545_v13 = vpack.c.bf16 %v1541_v4, %v1541_v4  ;;  %v1546_v14 = vpack.c.bf16 %v1542_v5, %v1542_v5  ;;  %v4946_v3 = vld [vmem:[%s6212_s27 + $0x30] sm:$0xff]  }
 0x3d7   : > { %v1794_v11 = vsel %vm1792_vm3, %v1543_v9, 0  ;;  %v1840_v12 = vsel %vm1792_vm3, %v1544_v10, 0  ;;  %v1886_v28 = vsel %vm1792_vm3, %v1545_v13, 0  ;;  %v1932_v8 = vsel %vm1792_vm3, %v1546_v14, 0 }
 0x3d8   : > { %4730 = vmatpush3.bf16.msra.mxu0 %v1794_v11  ;;  %4736 = vmatpush3.bf16.msra.mxu1 %v1840_v12  ;;  %v4947_v12 = vld [vmem:[%s6212_s27 + $0x38] sm:$0xff]  }
 0x3d9   : > { %4741 = vmatprep.subr.bf16.mxu0 %v5132_v20  ;;  %4747 = vmatprep.subr.bf16.mxu1 %v5132_v20 }
 0x3db   : > { %4732 = vmatmul.mubr.msk.bf16.vlgmr.msra.gmra.mrb[4].mxu0 %vm1740_vm2, %v1785_v15  ;;  %4738 = vmatmul.mubr.msk.bf16.vlgmr.msra.gmra.mrb[20].mxu1 %vm1740_vm2, %v1786_v17 }
 0x3dc   : > { %4742 = vmatpush3.bf16.msra.mxu0 %v1886_v28  ;;  %4748 = vmatpush3.bf16.msra.mxu1 %v1932_v8 }
 0x3dd   : > { %4743 = vmatprep.mubr.msk.bf16.mxu0 %vm5136_vm0, %v5132_v20  ;;  %4749 = vmatprep.mubr.msk.bf16.mxu1 %vm5136_vm0, %v5132_v20 }
 0x3de   : > { %4753 = vmatprep.subr.bf16.mxu0 %v5132_v20  ;;  %4773 = vmatprep.subr.bf16.mxu1 %v5132_v20 }
 0x3eb   : > { %v1773_v19 = vpop.xlane.xlu1 %1772 }
 0x3ec   : > { %5040 = vrcp.f32 %v1773_v19 }
 0x3f3   : > { %v1776_v21 = vpop.xlane.xlu0 %1775 }
 0x3f4   : > { %5042 = vrcp.f32 %v1776_v21 }
 0x3f6   : > { %v5041_v22 = vpop.eup %5040 }
 0x3f7   : > { %v1783_v23 = vmul.f32 %v5041_v22, %v5523_v16  ;;  %v4941_v16 = vld [vmem:[%s6212_s27 + $0x8] sm:$0xff]  }
 0x3f9   : > { %v1787_v24 = vpack.c.bf16 %v1783_v23, %v1783_v23 }
 0x3fb   : > { %4744 = vmatmul.mubr.msk.bf16.vlgmr.msra.gmra.mrb[8].mxu0 %vm1740_vm2, %v1787_v24 }
 0x3fc   : > { %4769 = vmatprep.mubr.msk.bf16.mxu0 %vm5136_vm0, %v5132_v20  ;;  %4754 = vmatpush3.bf16.msra.mxu0 %v4940_v32 }
 0x3fd   : > { %4755 = vmatprep.subr.bf16.mxu0 %v5132_v20 }
 0x3fe   : > { %v5043_v26 = vpop.eup %5042 }
 0x3ff   : > { %v1784_v30 = vmul.f32 %v5043_v26, %v5527_v18  ;;  %v4942_v18 = vld [vmem:[%s6212_s27 + $0x10] sm:$0xff]  }
 0x400   : > { %4756 = vmatpush3.bf16.msra.mxu0 %v4941_v16 }
 0x401   : > { %v1788_v31 = vpack.c.bf16 %v1784_v30, %v1784_v30  ;;  %4757 = vmatprep.subr.bf16.mxu0 %v5132_v20 }
 0x403   : > { %4750 = vmatmul.mubr.msk.bf16.vlgmr.msra.gmra.mrb[24].mxu1 %vm1740_vm2, %v1788_v31 }
 0x404   : > { %4789 = vmatprep.mubr.msk.bf16.mxu1 %vm5136_vm0, %v5132_v20  ;;  %4758 = vmatpush3.bf16.msra.mxu0 %v4942_v18 }
 0x405   : > { %4759 = vmatprep.subr.bf16.mxu0 %v5132_v20 }
 0x408   : > { %4760 = vmatpush3.bf16.msra.mxu0 %v4943_v33 }
 0x409   : > { %4761 = vmatprep.subr.bf16.mxu0 %v5132_v20 }
 0x40c   : > { %4762 = vmatpush3.bf16.msra.mxu0 %v4944_v34 }
 0x40d   : > { %4763 = vmatprep.subr.bf16.mxu0 %v5132_v20 }
 0x410   : > { %4764 = vmatpush3.bf16.msra.mxu0 %v4945_v35 }
 0x411   : > { %4765 = vmatprep.subr.bf16.mxu0 %v5132_v20 }
 0x414   : > { %4766 = vmatpush3.bf16.msra.mxu0 %v4946_v3  ;;  %v5066_v3 = vld [vmem:[%s5372_s19] sm:$0xff]  ;;  %s6218_s19 = smov 64  }
 0x415   : > { %4767 = vmatprep.subr.bf16.mxu0 %v5132_v20 }
 0x418   : > { %4768 = vmatpush3.bf16.msra.mxu0 %v4947_v12 }
 0x4ae   : > { %v1830_v36 = vpop.f32.mrb[4].mxu0  ;;  %v1876_v37 = vpop.f32.mrb[20].mxu1 }
 0x4af   : > { %v4733_v38 = vpop.f32.mrb[5].mxu0  ;;  %v4739_v39 = vpop.f32.mrb[21].mxu1 }
 0x4b0   : > { %v1833_v40 = vpop.f32.mrb[6].mxu0  ;;  %v1879_v41 = vpop.f32.mrb[22].mxu1  ;;  %v4948_v39 = vld [vmem:[%s6213_s11] ss:$8 sps:$4 sm:$0xff]  }
 0x4b1   : > { %v4734_v42 = vpop.f32.mrb[7].mxu0  ;;  %v4740_v43 = vpop.f32.mrb[23].mxu1  ;;  %v4950_v40 = vld [vmem:[%s6213_s11 + $0x4] ss:$8 sps:$4 sm:$0xff]   ;;  %v4951_v41 = vld [vmem:[%s6213_s11 + $0x10] ss:$8 sps:$4 sm:$0xff]  }
 0x4b2   : > { %2475 = vmatprep.subr.bf16.mxu0 %v4950_v40  ;;  %v4953_v42 = vld [vmem:[%s6213_s11 + $0x14] ss:$8 sps:$4 sm:$0xff]   ;;  %v4956_v43 = vld [vmem:[%s6213_s11 + $0x24] ss:$8 sps:$4 sm:$0xff]   ;;  %v4497_v40 = vld [vmem:[%s6156_s16] ss:$0 sm:$0xff] }
 0x4ce   : > { %v1922_v44 = vpop.f32.mrb[8].mxu0 }
 0x4cf   : > { %v1974_v45 = vcombine.low %v1830_v36, %v1922_v44  ;;  %v1975_v46 = vcombine.high %v1830_v36, %v1922_v44  ;;  %v4745_v47 = vpop.f32.mrb[9].mxu0  ;;  %v4954_v44 = vld [vmem:[%s6213_s11 + $0x20] ss:$8 sps:$4 sm:$0xff]  }
 0x4d0   : > { %v1925_v48 = vpop.f32.mrb[10].mxu0  ;;  %v4957_v47 = vld [vmem:[%s6213_s11 + $0x30] ss:$8 sps:$4 sm:$0xff]  }
 0x4d1   : > { %v4746_v50 = vpop.f32.mrb[11].mxu0  ;;  %v1982_v57 = vrot.slane %v1974_v45, %v5442_v49  ;;  %v1989_v58 = vrot.slane %v1975_v46, %v5442_v49  ;;  %v4959_v45 = vld [vmem:[%s6213_s11 + $0x34] ss:$8 sps:$4 sm:$0xff]   ;;  %v4962_v48 = vld [vmem:[%s6213_s11 + $0x44] ss:$8 sps:$4 sm:$0xff]  }
 0x4d2   : > { %v4960_v50 = vld [vmem:[%s6213_s11 + $0x40] ss:$8 sps:$4 sm:$0xff]  }
 0x4d6   : > { %v1968_v51 = vpop.f32.mrb[24].mxu1 }
 0x4d7   : > { %v1990_v52 = vcombine.low %v1876_v37, %v1968_v51  ;;  %v1991_v53 = vcombine.high %v1876_v37, %v1968_v51  ;;  %v4751_v54 = vpop.f32.mrb[25].mxu1  ;;  %v4965_v51 = vld [vmem:[%s6213_s11 + $0x54] ss:$8 sps:$4 sm:$0xff]  }
 0x4d8   : > { %v1971_v55 = vpop.f32.mrb[26].mxu1  ;;  %v4966_v54 = vld [vmem:[%s6213_s11 + $0x60] ss:$8 sps:$4 sm:$0xff]  }
 0x4d9   : > { %v1998_v59 = vrot.slane %v1990_v52, %v5442_v49  ;;  %v2005_v60 = vrot.slane %v1991_v53, %v5442_v49  ;;  %v4752_v61 = vpop.f32.mrb[27].mxu1  ;;  %v4963_v52 = vld [vmem:[%s6213_s11 + $0x50] ss:$8 sps:$4 sm:$0xff]   ;;  %v4968_v53 = vld [vmem:[%s6213_s11 + $0x64] ss:$8 sps:$4 sm:$0xff]  }
 0x4da   : > { %v4971_v55 = vld [vmem:[%s6213_s11 + $0x74] ss:$8 sps:$4 sm:$0xff]   ;;  %v4487_v61 = vld [vmem:[%s6216_s29] ss:$0 sm:$0xff]  ;;  %s6224_s29 = sld [smem:[#allocation25_spill]] }
 0x4db   : > { %v2006_v62 = vcombine.low %v1982_v57, %v1998_v59  ;;  %v2007_v63 = vcombine.high %v1982_v57, %v1998_v59  ;;  %v2022_v0 = vcombine.low %v1989_v58, %v2005_v60  ;;  %v2023_v1 = vcombine.high %v1989_v58, %v2005_v60  ;;  %v4969_v57 = vld [vmem:[%s6213_s11 + $0x70] ss:$8 sps:$4 sm:$0xff]   ;;  %v810_v58 = vld [vmem:[%s801_s20] sm:$0xff]  ;;  %v811_v59 = vld [vmem:[%s801_s20 + $0x8] sm:$0xff]  ;;  %s4591_s20 = sshll.u32 %s5291_s7, 7  ;;  %s5139_s7 = smov [#allocation2]  }
 0x4dc   : > { %v2366_v60 = vpack.c.bf16 %v811_v59, %v810_v58 }
 0x4dd   : > { %v2014_v25 = vrot.slane %v2006_v62, %v5445_v56  ;;  %v2021_v4 = vrot.slane %v2007_v63, %v5445_v56  ;;  %v2030_v5 = vrot.slane %v2022_v0, %v5445_v56  ;;  %v2037_v6 = vrot.slane %v2023_v1, %v5445_v56 }
 0x4df   : > { %v2042_v7 = vcombine.low %v2014_v25, %v2021_v4  ;;  %v4485_v9 = vcombine.high %v2014_v25, %v2021_v4  ;;  %v2058_v10 = vcombine.low %v2030_v5, %v2037_v6  ;;  %v4486_v11 = vcombine.high %v2030_v5, %v2037_v6 }
 0x4e0   : > { %s6098_s11 = scalar_lea.hbm %s6224_s29, %s4591_s20 }
 0x4e1   : > { %v2049_v13 = vrot.slane %v2042_v7, %v5442_v49  ;;  %v2057_v14 = vrot.slane %v4485_v9, %v5442_v49  ;;  %v2065_v15 = vrot.slane %v2058_v10, %v5442_v49  ;;  %v2073_v17 = vrot.slane %v4486_v11, %v5442_v49 }
 0x4e3   : > { %v2075_v28 = vcombine.high %v2049_v13, %v2057_v14  ;;  %v2091_v8 = vcombine.high %v2065_v15, %v2073_v17  ;;  %v2074_v19 = vcombine.low %v2049_v13, %v2057_v14  ;;  %v2090_v21 = vcombine.low %v2065_v15, %v2073_v17  ;;  %v2383_v14 = vld [vmem:[%s6152_s12] sm:$0x3] }
 0x4e4   : > { %v2388_v15 = vrot.slane %v2383_v14, %v5411_v29  ;;  %v2392_v17 = vrot.slane %v2383_v14, %v5402_v27 }
 0x4e5   : > { %v2089_v22 = vrot.slane %v2075_v28, %v5445_v56  ;;  %v2105_v23 = vrot.slane %v2091_v8, %v5445_v56  ;;  %v2082_v24 = vrot.slane %v2074_v19, %v5445_v56  ;;  %v2098_v26 = vrot.slane %v2090_v21, %v5445_v56 }
 0x4e7   : > { %v2108_v30 = vcombine.low %v2089_v22, %v2105_v23  ;;  %v2107_v31 = vcombine.high %v2082_v24, %v2098_v26  ;;  %v2109_v32 = vcombine.high %v2089_v22, %v2105_v23  ;;  %v2106_v16 = vcombine.low %v2082_v24, %v2098_v26 }
 0x4e9   : > { %2115 = vrot.lane.b32.xlu1 %v2108_v30, %s6178_s1  ;;  %2111 = vrot.lane.b32.xlu0 %v2107_v31, %s6176_s5 }
 0x4ed   : > { %2119 = vrot.lane.b32.xlu1 %v2109_v32, %s6180_s25  ;;  %s6214_s25 = sld [smem:[#allocation20_spill]] }
 0x4f3   : > { %v4972_v46 = vld [vmem:[%s6214_s25] sm:$0xff]   ;;  %v4973_v6 = vld [vmem:[%s6214_s25 + $0x8] sm:$0xff]   ;;  %v4974_v7 = vld [vmem:[%s6214_s25 + $0x10] sm:$0xff]  }
 0x4f4   : > { %4774 = vmatpush3.bf16.msra.mxu1 %v4972_v46  ;;  %v4975_v9 = vld [vmem:[%s6214_s25 + $0x18] sm:$0xff]   ;;  %v4976_v10 = vld [vmem:[%s6214_s25 + $0x20] sm:$0xff]   ;;  %v4977_v11 = vld [vmem:[%s6214_s25 + $0x28] sm:$0xff]  }
 0x4f5   : > { %4775 = vmatprep.subr.bf16.mxu1 %v5132_v20  ;;  %v4978_v12 = vld [vmem:[%s6214_s25 + $0x30] sm:$0xff]   ;;  %v4979_v13 = vld [vmem:[%s6214_s25 + $0x38] sm:$0xff]  }
 0x4f8   : > { %4776 = vmatpush3.bf16.msra.mxu1 %v4973_v6 }
 0x4f9   : > { %4777 = vmatprep.subr.bf16.mxu1 %v5132_v20 }
 0x4fc   : > { %4778 = vmatpush3.bf16.msra.mxu1 %v4974_v7 }
 0x4fd   : > { %4779 = vmatprep.subr.bf16.mxu1 %v5132_v20 }
 0x500   : > { %4780 = vmatpush3.bf16.msra.mxu1 %v4975_v9 }
 0x501   : > { %4781 = vmatprep.subr.bf16.mxu1 %v5132_v20 }
 0x504   : > { %4782 = vmatpush3.bf16.msra.mxu1 %v4976_v10 }
 0x505   : > { %4783 = vmatprep.subr.bf16.mxu1 %v5132_v20 }
 0x508   : > { %4784 = vmatpush3.bf16.msra.mxu1 %v4977_v11 }
 0x509   : > { %4785 = vmatprep.subr.bf16.mxu1 %v5132_v20 }
 0x50c   : > { %4786 = vmatpush3.bf16.msra.mxu1 %v4978_v12 }
 0x50d   : > { %4787 = vmatprep.subr.bf16.mxu1 %v5132_v20 }
 0x510   : > { %4788 = vmatpush3.bf16.msra.mxu1 %v4979_v13 }
 0x511   : > { %4793 = vmatprep.subr.bf16.mxu1 %v5132_v20 }
 0x55b   : > { %v2116_v18 = vpop.permute.xlu1 %2115  ;;  %v2112_v33 = vpop.permute.xlu0 %2111 }
 0x55c   : > { %v2122_v34 = vsel %vm1547_vm1, %v2106_v16, %v2112_v33 }
 0x55d   : > { %v2124_v36 = vsel %vm2123_vm4, %v2122_v34, %v2116_v18 }
 0x55f   : > { %v2120_v35 = vpop.permute.xlu1 %2119 }
 0x560   : > { %v2126_v37 = vsel %vm2125_vm5, %v2124_v36, %v2120_v35 }
 0x561   : > { %v2127_v38 = vpack.c.bf16 %v2126_v37, %v2126_v37 }
 0x563   : > { %4770 = vmatmul.mubr.bf16.vlgmr.msra.gmra.mrb[12].mxu0 %v2127_v38  ;;  %v4496_v38 = vld [vmem:[%s6155_s15] ss:$0 sm:$0xff] }
 0x564   : > { %2507 = vmatprep.mubr.bf16.mxu0 %v5131_v2  ;;  %2476 = vmatpush1.bf16.msra.mxu0 %v4948_v39 }
 0x565   : > { %2477 = vmatprep.subr.bf16.mxu0 %v4953_v42 }
 0x568   : > { %2478 = vmatpush1.bf16.msra.mxu0 %v4951_v41 }
 0x569   : > { %2479 = vmatprep.subr.bf16.mxu0 %v4956_v43 }
 0x56c   : > { %2480 = vmatpush1.bf16.msra.mxu0 %v4954_v44 }
 0x56d   : > { %2481 = vmatprep.subr.bf16.mxu0 %v4959_v45 }
 0x570   : > { %2482 = vmatpush1.bf16.msra.mxu0 %v4957_v47 }
 0x571   : > { %2483 = vmatprep.subr.bf16.mxu0 %v4962_v48 }
 0x574   : > { %2484 = vmatpush1.bf16.msra.mxu0 %v4960_v50 }
 0x575   : > { %2485 = vmatprep.subr.bf16.mxu0 %v4965_v51 }
 0x578   : > { %2486 = vmatpush1.bf16.msra.mxu0 %v4963_v52 }
 0x579   : > { %2487 = vmatprep.subr.bf16.mxu0 %v4968_v53 }
 0x57c   : > { %2488 = vmatpush1.bf16.msra.mxu0 %v4966_v54 }
 0x57d   : > { %2489 = vmatprep.subr.bf16.mxu0 %v4971_v55 }
 0x580   : > { %2490 = vmatpush1.bf16.msra.mxu0 %v4969_v57 }
 0x581   : > { %4817 = vmatprep.subr.bf16.mxu0 %v5132_v20 }
 0x583   : > { %2508 = vmatmul.mubr.bf16.vlgmr.msra.gmra.mrb[16].mxu0 %v2366_v60 }
 0x584   : > { %4819 = vmatprep.mubr.msk.bf16.mxu0 %vm5136_vm0, %v5132_v20 }
 0x636   : > { %v2216_v62 = vpop.f32.mrb[12].mxu0 }
 0x637   : > { %v2217_v63 = vadd.f32 %v4487_v61, %v2216_v62  ;;  %v4771_v0 = vpop.f32.mrb[13].mxu0 }
 0x638   : > { %v2219_v1 = vpop.f32.mrb[14].mxu0 }
 0x639   : > { %v2224_v25 = vadd.f32 %v5066_v3, %v2217_v63  ;;  %v4772_v4 = vpop.f32.mrb[15].mxu0 }
 0x63b   : > { %2225 = vadd.xlane.f32.xlu0 %v2224_v25  ;;  %v2229_v5 = vmul.f32 %v2224_v25, %v2224_v25 }
 0x63d   : > { %2230 = vadd.xlane.f32.xlu1 %v2229_v5 }
 0x656   : > { %v2509_v28 = vpop.f32.mrb[16].mxu0 }
 0x657   : > { %v2510_v8 = vadd.f32 %v2509_v28, %v2388_v15  ;;  %v2511_v19 = vpop.f32.mrb[17].mxu0 }
 0x658   : > { %v5721_v21 = vadd.f32 %v2511_v19, %v2392_v17  ;;  %v2513_v22 = vpop.f32.mrb[18].mxu0 }
 0x659   : > { %v2514_v23 = vadd.f32 %v2513_v22, %v2388_v15  ;;  %2688 = vrot.lane.b32.xlu0 %v2510_v8, %s6217_s28  ;;  %v2515_v24 = vpop.f32.mrb[19].mxu0 }
 0x65a   : > { %v5724_v26 = vadd.f32 %v2515_v24, %v2392_v17 }
 0x65b   : > { %2690 = vrot.lane.b32.xlu1 %v2514_v23, %s6217_s28 }
 0x65d   : > { %2694 = vrot.lane.b32.xlu0 %v2510_v8, %s6218_s19 }
 0x65f   : > { %2696 = vrot.lane.b32.xlu1 %v2514_v23, %s6218_s19 }
 0x661   : > { %2700 = vrot.lane.b32.xlu0 %v2510_v8, %s6219_s8 }
 0x663   : > { %2702 = vrot.lane.b32.xlu1 %v2514_v23, %s6219_s8 }
 0x6c8   : > { %v2226_v30 = vpop.xlane.xlu0 %2225 }
 0x6c9   : > { %v2228_v31 = vmul.f32 0.0078125, %v2226_v30 }
 0x6ca   : > { %v2231_v32 = vpop.xlane.xlu1 %2230 }
 0x6cb   : > { %v2233_v16 = vmul.f32 %v2228_v31, %v2228_v31  ;;  %v2232_v18 = vmul.f32 0.0078125, %v2231_v32  ;;  %v2236_v36 = vsub.f32 %v2224_v25, %v2228_v31 }
 0x6cc   : > { %v2689_v44 = vpop.permute.xlu0 %2688 }
 0x6cd   : > { %v2234_v33 = vsub.f32 %v2232_v18, %v2233_v16 }
 0x6ce   : > { %v2691_v45 = vpop.permute.xlu1 %2690 }
 0x6cf   : > { %v2235_v34 = vmax.f32 %v2234_v33, 0.0 }
 0x6d0   : > { %v2695_v46 = vpop.permute.xlu0 %2694 }
 0x6d1   : > { %v2237_v35 = vadd.f32 1e-05, %v2235_v34  ;;  %v2706_v47 = vcombine.low %v2510_v8, %v2695_v46  ;;  %v2707_v50 = vcombine.high %v2510_v8, %v2695_v46 }
 0x6d2   : > { %v2697_v48 = vpop.permute.xlu1 %2696 }
 0x6d3   : > { %5044 = vrsqrt.f32 %v2237_v35  ;;  %v2774_v51 = vcombine.low %v2514_v23, %v2697_v48  ;;  %v2775_v52 = vcombine.high %v2514_v23, %v2697_v48  ;;  %v2714_v54 = vrot.slane %v2706_v47, %v5442_v49 }
 0x6d4   : > { %v2701_v53 = vpop.permute.xlu0 %2700  ;;  %v2721_v60 = vrot.slane %v2707_v50, %v5442_v49 }
 0x6d5   : > { %v2722_v55 = vcombine.low %v2689_v44, %v2701_v53  ;;  %v2723_v57 = vcombine.high %v2689_v44, %v2701_v53  ;;  %v2782_v58 = vrot.slane %v2774_v51, %v5442_v49  ;;  %v2789_v59 = vrot.slane %v2775_v52, %v5442_v49 }
 0x6d6   : > { %v2703_v61 = vpop.permute.xlu1 %2702 }
 0x6d7   : > { %v2790_v62 = vcombine.low %v2691_v45, %v2703_v61  ;;  %v2791_v63 = vcombine.high %v2691_v45, %v2703_v61  ;;  %v2730_v0 = vrot.slane %v2722_v55, %v5442_v49  ;;  %v2737_v1 = vrot.slane %v2723_v57, %v5442_v49 }
 0x6d9   : > { %v2798_v3 = vrot.slane %v2790_v62, %v5442_v49  ;;  %v2805_v25 = vrot.slane %v2791_v63, %v5442_v49  ;;  %v2738_v4 = vcombine.low %v2714_v54, %v2730_v0  ;;  %v2739_v5 = vcombine.high %v2714_v54, %v2730_v0 }
 0x6da   : > { %v2754_v6 = vcombine.low %v2721_v60, %v2737_v1  ;;  %v2755_v7 = vcombine.high %v2721_v60, %v2737_v1 }
 0x6db   : > { %v2806_v9 = vcombine.low %v2782_v58, %v2798_v3  ;;  %v2807_v10 = vcombine.high %v2782_v58, %v2798_v3  ;;  %v2822_v11 = vcombine.low %v2789_v59, %v2805_v25  ;;  %v2823_v12 = vcombine.high %v2789_v59, %v2805_v25 }
 0x6dc   : > { %v2746_v13 = vrot.slane %v2738_v4, %v5445_v56  ;;  %v2753_v14 = vrot.slane %v2739_v5, %v5445_v56  ;;  %v2762_v15 = vrot.slane %v2754_v6, %v5445_v56  ;;  %v2769_v17 = vrot.slane %v2755_v7, %v5445_v56 }
 0x6dd   : > { %v5045_v37 = vpop.eup %5044  ;;  %v2814_v28 = vrot.slane %v2806_v9, %v5445_v56  ;;  %v2821_v8 = vrot.slane %v2807_v10, %v5445_v56  ;;  %v2830_v19 = vrot.slane %v2822_v11, %v5445_v56  ;;  %v2837_v22 = vrot.slane %v2823_v12, %v5445_v56  ;;  %v4498_v11 = vld [vmem:[%s6220_s10] ss:$0 sm:$0xff]  ;;  %s6225_s10 = smov %s6224_s29 }
 0x6de   : > { %v2239_v39 = vmul.f32 %v5045_v37, %v2236_v36  ;;  %v2842_v23 = vcombine.low %v2746_v13, %v2753_v14  ;;  %v4525_v24 = vcombine.high %v2746_v13, %v2753_v14  ;;  %v2858_v30 = vcombine.low %v2762_v15, %v2769_v17 }
 0x6df   : > { %v4526_v31 = vcombine.high %v2762_v15, %v2769_v17  ;;  %v2910_v32 = vcombine.low %v2814_v28, %v2821_v8  ;;  %v4527_v16 = vcombine.high %v2814_v28, %v2821_v8  ;;  %v2926_v18 = vcombine.low %v2830_v19, %v2837_v22 }
 0x6e0   : > { %v2246_v41 = vmul.f32 %v4496_v38, %v2239_v39  ;;  %v4528_v33 = vcombine.high %v2830_v19, %v2837_v22  ;;  %v2849_v34 = vrot.slane %v2842_v23, %v5442_v49  ;;  %v2857_v35 = vrot.slane %v4525_v24, %v5442_v49 }
 0x6e1   : > { %v2865_v36 = vrot.slane %v2858_v30, %v5442_v49  ;;  %v2873_v37 = vrot.slane %v4526_v31, %v5442_v49  ;;  %v2917_v38 = vrot.slane %v2910_v32, %v5442_v49  ;;  %v2925_v39 = vrot.slane %v4527_v16, %v5442_v49 }
 0x6e2   : > { %v5737_v42 = vadd.f32 %v4497_v40, %v2246_v41  ;;  %v2933_v40 = vrot.slane %v2926_v18, %v5442_v49  ;;  %v2941_v41 = vrot.slane %v4528_v33, %v5442_v49  ;;  %v2875_v47 = vcombine.high %v2849_v34, %v2857_v35 }
 0x6e3   : > { %v2890_v44 = vcombine.low %v2865_v36, %v2873_v37  ;;  %v2942_v45 = vcombine.low %v2917_v38, %v2925_v39  ;;  %v2891_v48 = vcombine.high %v2865_v36, %v2873_v37  ;;  %v2943_v50 = vcombine.high %v2917_v38, %v2925_v39 }
 0x6e4   : > { %v2254_v43 = vpack.c.bf16 %v5737_v42, %v5737_v42  ;;  %v2958_v46 = vcombine.low %v2933_v40, %v2941_v41  ;;  %v2959_v51 = vcombine.high %v2933_v40, %v2941_v41  ;;  %v2889_v57 = vrot.slane %v2875_v47, %v5445_v56 }
 0x6e5   : > { %v2898_v53 = vrot.slane %v2890_v44, %v5445_v56  ;;  %v2950_v54 = vrot.slane %v2942_v45, %v5445_v56  ;;  %v2905_v58 = vrot.slane %v2891_v48, %v5445_v56  ;;  %v2957_v59 = vrot.slane %v2943_v50, %v5445_v56 }
 0x6e6   : > { %4790 = vmatmul.mubr.bf16.vlgmr.msra.gmra.mrb[28].mxu1 %v2254_v43  ;;  %v2874_v43 = vcombine.low %v2849_v34, %v2857_v35  ;;  %v2966_v55 = vrot.slane %v2958_v46, %v5445_v56  ;;  %v2973_v60 = vrot.slane %v2959_v51, %v5445_v56 }
 0x6e7   : > { %4795 = vmatprep.mubr.msk.bf16.mxu1 %vm5136_vm0, %v5132_v20  ;;  %v2908_v1 = vcombine.low %v2889_v57, %v2905_v58  ;;  %v2909_v25 = vcombine.high %v2889_v57, %v2905_v58 }
 0x6e8   : > { %v2882_v52 = vrot.slane %v2874_v43, %v5445_v56  ;;  %v2974_v62 = vcombine.low %v2950_v54, %v2966_v55  ;;  %v2975_v0 = vcombine.high %v2950_v54, %v2966_v55  ;;  %v2976_v3 = vcombine.low %v2957_v59, %v2973_v60 }
 0x6e9   : > { %v2977_v4 = vcombine.high %v2957_v59, %v2973_v60 }
 0x6ea   : > { %v2906_v61 = vcombine.low %v2882_v52, %v2898_v53  ;;  %v2907_v63 = vcombine.high %v2882_v52, %v2898_v53  ;;  %v2980_v7 = vpack.c.bf16 %v2976_v3, %v2908_v1 }
 0x6eb   : > { %v5775_v9 = vpack.c.bf16 %v2977_v4, %v2909_v25 }
 0x6ec   : > { %v2978_v5 = vpack.c.bf16 %v2974_v62, %v2906_v61  ;;  %v2979_v6 = vpack.c.bf16 %v2975_v0, %v2907_v63  ;;  %v3374_v1 = vsel %vm1547_vm1, %v2980_v7, 0 }
 0x6ed   : > { %v3420_v4 = vsel %vm1547_vm1, %v5775_v9, 0 }
 0x6ee   : > { %v3282_v10 = vsel %vm1547_vm1, %v2978_v5, 0  ;;  %v3328_v58 = vsel %vm1547_vm1, %v2979_v6, 0 }
 0x6ef   : > { %4794 = vmatpush3.bf16.xpose.msra.mxu1 %v3282_v10  ;;  %v4537_v10 = vld [vmem:[%s807_s30] ss:$0 sm:$0xff]  ;;  %s6222_s30 = sld [smem:[#allocation23_spill]] }
 0x6f0   : > { %4799 = vmatprep.subr.bf16.mxu1 %v5132_v20 }
 0x7b9   : > { %v2360_v12 = vpop.f32.mrb[28].mxu1 }
 0x7ba   : > { %v2361_v13 = vadd.f32 %v4498_v11, %v2360_v12  ;;  %v4791_v14 = vpop.f32.mrb[29].mxu1 }
 0x7bb   : > { %v2363_v15 = vpop.f32.mrb[30].mxu1 }
 0x7bc   : > { %2540 = vrot.lane.b32.xlu1 %v2361_v13, %s6218_s19  ;;  %2537 = vrot.lane.b32.xlu0 %v2361_v13, %s6217_s28  ;;  %v4792_v17 = vpop.f32.mrb[31].mxu1 }
 0x7c0   : > { %2986 = vrot.lane.b32.xlu1 %v5724_v26, %s6217_s28  ;;  %2543 = vrot.lane.b32.xlu0 %v2361_v13, %s6219_s8 }
 0x7c4   : > { %2984 = vrot.lane.b32.xlu0 %v5721_v21, %s6217_s28 }
 0x82e   : > { %v2541_v28 = vpop.permute.xlu1 %2540  ;;  %v2538_v8 = vpop.permute.xlu0 %2537 }
 0x82f   : > { %v2546_v19 = vcombine.low %v2361_v13, %v2541_v28  ;;  %v2547_v22 = vcombine.high %v2361_v13, %v2541_v28 }
 0x831   : > { %v2554_v31 = vrot.slane %v2546_v19, %v5442_v49  ;;  %v2561_v32 = vrot.slane %v2547_v22, %v5442_v49 }
 0x832   : > { %v2544_v23 = vpop.permute.xlu0 %2543 }
 0x833   : > { %v2562_v24 = vcombine.low %v2538_v8, %v2544_v23  ;;  %v2563_v30 = vcombine.high %v2538_v8, %v2544_v23 }
 0x835   : > { %v2570_v16 = vrot.slane %v2562_v24, %v5442_v49  ;;  %v2577_v18 = vrot.slane %v2563_v30, %v5442_v49 }
 0x837   : > { %v2578_v33 = vcombine.low %v2554_v31, %v2570_v16  ;;  %v2579_v34 = vcombine.high %v2554_v31, %v2570_v16  ;;  %v2594_v35 = vcombine.low %v2561_v32, %v2577_v18  ;;  %v2595_v36 = vcombine.high %v2561_v32, %v2577_v18 }
 0x839   : > { %v2586_v37 = vrot.slane %v2578_v33, %v5445_v56  ;;  %v2593_v38 = vrot.slane %v2579_v34, %v5445_v56  ;;  %v2602_v39 = vrot.slane %v2594_v35, %v5445_v56  ;;  %v2609_v40 = vrot.slane %v2595_v36, %v5445_v56 }
 0x83b   : > { %v2614_v41 = vcombine.low %v2586_v37, %v2593_v38  ;;  %v4523_v43 = vcombine.high %v2586_v37, %v2593_v38  ;;  %v2630_v44 = vcombine.low %v2602_v39, %v2609_v40  ;;  %v4524_v45 = vcombine.high %v2602_v39, %v2609_v40 }
 0x83d   : > { %v2621_v46 = vrot.slane %v2614_v41, %v5442_v49  ;;  %v2629_v47 = vrot.slane %v4523_v43, %v5442_v49  ;;  %v2637_v48 = vrot.slane %v2630_v44, %v5442_v49  ;;  %v2645_v50 = vrot.slane %v4524_v45, %v5442_v49  ;;  %v2987_v43 = vpop.permute.xlu1 %2986 }
 0x83f   : > { %v2646_v51 = vcombine.low %v2621_v46, %v2629_v47  ;;  %v2662_v52 = vcombine.low %v2637_v48, %v2645_v50  ;;  %v2647_v59 = vcombine.high %v2621_v46, %v2629_v47  ;;  %v2663_v60 = vcombine.high %v2637_v48, %v2645_v50  ;;  %v5836_v47 = vpop.permute.xlu0 %2984 }
 0x841   : > { %v2654_v53 = vrot.slane %v2646_v51, %v5445_v56  ;;  %v2670_v54 = vrot.slane %v2662_v52, %v5445_v56  ;;  %v2661_v63 = vrot.slane %v2647_v59, %v5445_v56  ;;  %v2677_v0 = vrot.slane %v2663_v60, %v5445_v56 }
 0x843   : > { %v2678_v55 = vcombine.low %v2654_v53, %v2670_v54  ;;  %v2679_v61 = vcombine.high %v2654_v53, %v2670_v54  ;;  %v2680_v3 = vcombine.low %v2661_v63, %v2677_v0  ;;  %v2681_v5 = vcombine.high %v2661_v63, %v2677_v0 }
 0x845   : > { %v2682_v57 = vpack.c.bf16 %v2678_v55, %v2678_v55  ;;  %v2683_v62 = vpack.c.bf16 %v2679_v61, %v2679_v61  ;;  %v2684_v25 = vpack.c.bf16 %v2680_v3, %v2680_v3  ;;  %v2685_v6 = vpack.c.bf16 %v2681_v5, %v2681_v5 }
 0x847   : > { %4796 = vmatmul.mubr.msk.bf16.vlgmr.msra.gmra.mrb[32].mxu1 %vm1547_vm1, %v2682_v57 }
 0x848   : > { %4800 = vmatpush3.bf16.xpose.msra.mxu1 %v3328_v58  ;;  %4801 = vmatprep.mubr.msk.bf16.mxu1 %vm5136_vm0, %v5132_v20 }
 0x849   : > { %4805 = vmatprep.subr.bf16.mxu1 %v5132_v20 }
 0x84f   : > { %4802 = vmatmul.mubr.msk.bf16.vlgmr.msra.gmra.mrb[36].mxu1 %vm1547_vm1, %v2683_v62 }
 0x850   : > { %4806 = vmatpush3.bf16.xpose.msra.mxu1 %v3374_v1  ;;  %4807 = vmatprep.mubr.msk.bf16.mxu1 %vm5136_vm0, %v5132_v20 }
 0x851   : > { %4811 = vmatprep.subr.bf16.mxu1 %v5132_v20 }
 0x857   : > { %4808 = vmatmul.mubr.msk.bf16.vlgmr.msra.gmra.mrb[40].mxu1 %vm1547_vm1, %v2684_v25 }
 0x858   : > { %4812 = vmatpush3.bf16.xpose.msra.mxu1 %v3420_v4  ;;  %4813 = vmatprep.mubr.msk.bf16.mxu1 %vm5136_vm0, %v5132_v20 }
 0x859   : > { %4823 = vmatprep.subr.bf16.mxu1 %v5132_v20 }
 0x85f   : > { %4814 = vmatmul.mubr.msk.bf16.vlgmr.msra.gmra.mrb[44].mxu1 %vm1547_vm1, %v2685_v6 }
 0x860   : > { %4825 = vmatprep.mubr.msk.bf16.mxu1 %vm5136_vm0, %v5132_v20 }
 0x91a   : > { %v3318_v7 = vpop.f32.mrb[32].mxu1 }
 0x91b   : > { %v3462_v9 = vmul.f32 0.17677669, %v3318_v7  ;;  %v4797_v11 = vpop.f32.mrb[33].mxu1 }
 0x91c   : > { %v3321_v12 = vpop.f32.mrb[34].mxu1 }
 0x91d   : > { %v4798_v13 = vpop.f32.mrb[35].mxu1  ;;  %v3472_v14 = vadd.f32 %v4537_v10, %v3462_v9 }
 0x91f   : > { %v3477_v15 = vsel %vm3476_vm6, %v3472_v14, -inf }
 0x920   : > { %3478 = vmax.xlane.f32.xlu1 %v3477_v15 }
 0x922   : > { %v3364_v17 = vpop.f32.mrb[36].mxu1 }
 0x923   : > { %v3463_v28 = vmul.f32 0.17677669, %v3364_v17  ;;  %v4803_v8 = vpop.f32.mrb[37].mxu1 }
 0x924   : > { %v3367_v19 = vpop.f32.mrb[38].mxu1 }
 0x925   : > { %v4804_v22 = vpop.f32.mrb[39].mxu1  ;;  %v3473_v23 = vadd.f32 %v4537_v10, %v3463_v28 }
 0x927   : > { %v3480_v24 = vsel %vm3476_vm6, %v3473_v23, -inf }
 0x928   : > { %3481 = vmax.xlane.f32.xlu0 %v3480_v24 }
 0x92a   : > { %v3410_v30 = vpop.f32.mrb[40].mxu1 }
 0x92b   : > { %v3464_v31 = vmul.f32 0.17677669, %v3410_v30  ;;  %v4809_v32 = vpop.f32.mrb[41].mxu1 }
 0x92c   : > { %v3413_v16 = vpop.f32.mrb[42].mxu1 }
 0x92d   : > { %v4810_v18 = vpop.f32.mrb[43].mxu1  ;;  %v3474_v33 = vadd.f32 %v4537_v10, %v3464_v31 }
 0x92f   : > { %v3483_v34 = vsel %vm3476_vm6, %v3474_v33, -inf }
 0x930   : > { %3484 = vmax.xlane.f32.xlu0 %v3483_v34 }
 0x932   : > { %v3456_v35 = vpop.f32.mrb[44].mxu1 }
 0x933   : > { %v3465_v36 = vmul.f32 0.17677669, %v3456_v35  ;;  %v4815_v37 = vpop.f32.mrb[45].mxu1 }
 0x934   : > { %v3459_v38 = vpop.f32.mrb[46].mxu1 }
 0x935   : > { %v4816_v39 = vpop.f32.mrb[47].mxu1  ;;  %v3475_v40 = vadd.f32 %v4537_v10, %v3465_v36 }
 0x937   : > { %v3486_v41 = vsel %vm3476_vm6, %v3475_v40, -inf }
 0x938   : > { %3487 = vmax.xlane.f32.xlu1 %v3486_v41 }
 0x946   : > { %2992 = vrot.lane.b32.xlu0 %v5724_v26, %s6218_s19 }
 0x949   : > { %2990 = vrot.lane.b32.xlu1 %v5721_v21, %s6218_s19 }
 0x9ad   : > { %v3479_v44 = vpop.xlane.xlu1 %3478 }
 0x9ae   : > { %v3489_v45 = vsub.f32 %v3472_v14, %v3479_v44 }
 0x9b0   : > { %v3493_v46 = vmul.f32 1.442695, %v3489_v45 }
 0x9b2   : > { %5046 = vpow2.f32 %v3493_v46 }
 0x9b5   : > { %v3482_v48 = vpop.xlane.xlu0 %3481 }
 0x9b6   : > { %v3490_v50 = vsub.f32 %v3473_v23, %v3482_v48 }
 0x9b8   : > { %v3495_v51 = vmul.f32 1.442695, %v3490_v50 }
 0x9ba   : > { %5048 = vpow2.f32 %v3495_v51 }
 0x9bc   : > { %v5838_v52 = vpop.eup %5046 }
 0x9bd   : > { %v3501_v53 = vsel %vm3476_vm6, %v5838_v52, 0.0  ;;  %v3485_v60 = vpop.xlane.xlu0 %3484 }
 0x9be   : > { %3502 = vadd.xlane.f32.xlu0 %v3501_v53  ;;  %v3491_v61 = vsub.f32 %v3474_v33, %v3485_v60 }
 0x9c0   : > { %v3497_v62 = vmul.f32 1.442695, %v3491_v61 }
 0x9c1   : > { %v2993_v25 = vpop.permute.xlu0 %2992 }
 0x9c2   : > { %v3070_v5 = vcombine.low %v5724_v26, %v2993_v25  ;;  %v3071_v6 = vcombine.high %v5724_v26, %v2993_v25 }
 0x9c4   : > { %v5842_v54 = vpop.eup %5048  ;;  %v3078_v12 = vrot.slane %v3070_v5, %v5442_v49  ;;  %v3085_v13 = vrot.slane %v3071_v6, %v5442_v49 }
 0x9c5   : > { %v3504_v55 = vsel %vm3476_vm6, %v5842_v54, 0.0  ;;  %v3488_v57 = vpop.xlane.xlu1 %3487 }
 0x9c6   : > { %3505 = vadd.xlane.f32.xlu1 %v3504_v55  ;;  %v3492_v58 = vsub.f32 %v3475_v40, %v3488_v57 }
 0x9c8   : > { %v3499_v59 = vmul.f32 1.442695, %v3492_v58 }
 0x9c9   : > { %v2991_v7 = vpop.permute.xlu1 %2990 }
 0x9ca   : > { %5050 = vpow2.f32 %v3499_v59  ;;  %v3002_v23 = vcombine.low %v5721_v21, %v2991_v7  ;;  %v3003_v32 = vcombine.high %v5721_v21, %v2991_v7 }
 0x9cb   : > { %5052 = vpow2.f32 %v3497_v62 }
 0x9cc   : > { %v3010_v38 = vrot.slane %v3002_v23, %v5442_v49  ;;  %v3017_v39 = vrot.slane %v3003_v32, %v5442_v49 }
 0x9d4   : > { %2998 = vrot.lane.b32.xlu0 %v5724_v26, %s6219_s8  ;;  %v5850_v63 = vpop.eup %5050 }
 0x9d5   : > { %v3510_v0 = vsel %vm3476_vm6, %v5850_v63, 0.0  ;;  %v5854_v1 = vpop.eup %5052 }
 0x9d6   : > { %v3507_v3 = vsel %vm3476_vm6, %v5854_v1, 0.0 }
 0x9d7   : > { %2996 = vrot.lane.b32.xlu1 %v5721_v21, %s6219_s8 }
 0x9f3   : > { %3511 = vadd.xlane.f32.xlu0 %v3510_v0 }
 0x9fb   : > { %3508 = vadd.xlane.f32.xlu1 %v3507_v3 }
 0xa4b   : > { %v3503_v4 = vpop.xlane.xlu0 %3502 }
 0xa4c   : > { %5054 = vrcp.f32 %v3503_v4 }
 0xa4f   : > { %v2999_v10 = vpop.permute.xlu0 %2998 }
 0xa50   : > { %v3086_v9 = vcombine.low %v2987_v43, %v2999_v10  ;;  %v3087_v11 = vcombine.high %v2987_v43, %v2999_v10 }
 0xa52   : > { %v3094_v14 = vrot.slane %v3086_v9, %v5442_v49  ;;  %v3101_v15 = vrot.slane %v3087_v11, %v5442_v49 }
 0xa53   : > { %v3506_v17 = vpop.xlane.xlu1 %3505 }
 0xa54   : > { %v3102_v28 = vcombine.low %v3078_v12, %v3094_v14  ;;  %v3103_v8 = vcombine.high %v3078_v12, %v3094_v14  ;;  %v3118_v19 = vcombine.low %v3085_v13, %v3101_v15  ;;  %v3119_v22 = vcombine.high %v3085_v13, %v3101_v15 }
 0xa55   : > { %5056 = vrcp.f32 %v3506_v17 }
 0xa56   : > { %v3110_v26 = vrot.slane %v3102_v28, %v5445_v56  ;;  %v3117_v24 = vrot.slane %v3103_v8, %v5445_v56  ;;  %v3126_v30 = vrot.slane %v3118_v19, %v5445_v56  ;;  %v3133_v31 = vrot.slane %v3119_v22, %v5445_v56  ;;  %v5055_v6 = vpop.eup %5054 }
 0xa57   : > { %v2997_v16 = vpop.permute.xlu1 %2996 }
 0xa58   : > { %v3206_v18 = vcombine.low %v3110_v26, %v3117_v24  ;;  %v4531_v33 = vcombine.high %v3110_v26, %v3117_v24  ;;  %v3222_v34 = vcombine.low %v3126_v30, %v3133_v31  ;;  %v4532_v35 = vcombine.high %v3126_v30, %v3133_v31 }
 0xa59   : > { %v3018_v36 = vcombine.low %v5836_v47, %v2997_v16  ;;  %v3019_v37 = vcombine.high %v5836_v47, %v2997_v16  ;;  %v3517_v16 = vmul.f32 %v5055_v6, %v5838_v52 }
 0xa5a   : > { %v3213_v21 = vrot.slane %v3206_v18, %v5442_v49  ;;  %v3221_v43 = vrot.slane %v4531_v33, %v5442_v49  ;;  %v3229_v44 = vrot.slane %v3222_v34, %v5442_v49  ;;  %v3237_v45 = vrot.slane %v4532_v35, %v5442_v49 }
 0xa5b   : > { %v3026_v40 = vrot.slane %v3018_v36, %v5442_v49  ;;  %v3033_v41 = vrot.slane %v3019_v37, %v5442_v49 }
 0xa5c   : > { %v3238_v58 = vcombine.low %v3213_v21, %v3221_v43  ;;  %v3254_v59 = vcombine.low %v3229_v44, %v3237_v45  ;;  %v3239_v9 = vcombine.high %v3213_v21, %v3221_v43  ;;  %v3255_v11 = vcombine.high %v3229_v44, %v3237_v45 }
 0xa5d   : > { %v3034_v46 = vcombine.low %v3010_v38, %v3026_v40  ;;  %v3035_v47 = vcombine.high %v3010_v38, %v3026_v40  ;;  %v3050_v48 = vcombine.low %v3017_v39, %v3033_v41  ;;  %v3051_v50 = vcombine.high %v3017_v39, %v3033_v41 }
 0xa5e   : > { %v3246_v7 = vrot.slane %v3238_v58, %v5445_v56  ;;  %v3262_v10 = vrot.slane %v3254_v59, %v5445_v56  ;;  %v3253_v23 = vrot.slane %v3239_v9, %v5445_v56  ;;  %v3269_v26 = vrot.slane %v3255_v11, %v5445_v56 }
 0xa5f   : > { %v3042_v51 = vrot.slane %v3034_v46, %v5445_v56  ;;  %v3049_v53 = vrot.slane %v3035_v47, %v5445_v56  ;;  %v3058_v55 = vrot.slane %v3050_v48, %v5445_v56  ;;  %v3065_v57 = vrot.slane %v3051_v50, %v5445_v56  ;;  %v5057_v12 = vpop.eup %5056  ;;  %v4980_v50 = vld [vmem:[%s6153_s13] sm:$0xff]  }
 0xa60   : > { %v3270_v30 = vcombine.low %v3246_v7, %v3262_v10  ;;  %v3271_v32 = vcombine.high %v3246_v7, %v3262_v10  ;;  %v3518_v18 = vmul.f32 %v5057_v12, %v5842_v54  ;;  %v3272_v37 = vcombine.low %v3253_v23, %v3269_v26 }
 0xa61   : > { %v3138_v60 = vcombine.low %v3042_v51, %v3049_v53  ;;  %v4529_v61 = vcombine.high %v3042_v51, %v3049_v53  ;;  %v3154_v62 = vcombine.low %v3058_v55, %v3065_v57  ;;  %v4530_v0 = vcombine.high %v3058_v55, %v3065_v57  ;;  %v4984_v51 = vld [vmem:[%s6153_s13 + $0x20] sm:$0xff]   ;;  %v4985_v53 = vld [vmem:[%s6153_s13 + $0x28] sm:$0xff]  }
 0xa62   : > { %v3273_v38 = vcombine.high %v3253_v23, %v3269_v26  ;;  %v3521_v39 = vpack.c.bf16 %v3517_v16, %v3517_v16  ;;  %v3522_v40 = vpack.c.bf16 %v3518_v18, %v3518_v18 }
 0xa63   : > { %v3145_v3 = vrot.slane %v3138_v60, %v5442_v49  ;;  %v3153_v25 = vrot.slane %v4529_v61, %v5442_v49  ;;  %v3161_v4 = vrot.slane %v3154_v62, %v5442_v49  ;;  %v3169_v5 = vrot.slane %v4530_v0, %v5442_v49 }
 0xa65   : > { %v3170_v13 = vcombine.low %v3145_v3, %v3153_v25  ;;  %v3186_v14 = vcombine.low %v3161_v4, %v3169_v5  ;;  %v3171_v15 = vcombine.high %v3145_v3, %v3153_v25  ;;  %v3187_v17 = vcombine.high %v3161_v4, %v3169_v5 }
 0xa67   : > { %v3178_v28 = vrot.slane %v3170_v13, %v5445_v56  ;;  %v3194_v8 = vrot.slane %v3186_v14, %v5445_v56  ;;  %v3185_v19 = vrot.slane %v3171_v15, %v5445_v56  ;;  %v3201_v22 = vrot.slane %v3187_v17, %v5445_v56 }
 0xa69   : > { %v3202_v24 = vcombine.low %v3178_v28, %v3194_v8  ;;  %v3203_v31 = vcombine.high %v3178_v28, %v3194_v8  ;;  %v3204_v35 = vcombine.low %v3185_v19, %v3201_v22  ;;  %v3205_v36 = vcombine.high %v3185_v19, %v3201_v22 }
 0xa6b   : > { %v3274_v33 = vpack.c.bf16 %v3270_v30, %v3202_v24  ;;  %v3275_v34 = vpack.c.bf16 %v3271_v32, %v3203_v31  ;;  %v3276_v41 = vpack.c.bf16 %v3272_v37, %v3204_v35  ;;  %v3277_v21 = vpack.c.bf16 %v3273_v38, %v3205_v36  ;;  %v4986_v24 = vld [vmem:[%s6153_s13 + $0x30] sm:$0xff]   ;;  %v4987_v36 = vld [vmem:[%s6153_s13 + $0x38] sm:$0xff]  }
 0xa6d   : > { %4818 = vmatpush3.bf16.msra.mxu0 %v3274_v33  ;;  %4824 = vmatpush3.bf16.msra.mxu1 %v3275_v34 }
 0xa6e   : > { %4829 = vmatprep.subr.bf16.mxu0 %v5132_v20  ;;  %4835 = vmatprep.subr.bf16.mxu1 %v5132_v20 }
 0xa70   : > { %4820 = vmatmul.mubr.msk.bf16.vlgmr.msra.gmra.mrb[20].mxu0 %vm3476_vm6, %v3521_v39  ;;  %4826 = vmatmul.mubr.msk.bf16.vlgmr.msra.gmra.mrb[48].mxu1 %vm3476_vm6, %v3522_v40 }
 0xa71   : > { %4830 = vmatpush3.bf16.msra.mxu0 %v3276_v41  ;;  %4836 = vmatpush3.bf16.msra.mxu1 %v3277_v21 }
 0xa72   : > { %4837 = vmatprep.mubr.msk.bf16.mxu1 %vm5136_vm0, %v5132_v20  ;;  %4831 = vmatprep.mubr.msk.bf16.mxu0 %vm5136_vm0, %v5132_v20 }
 0xa73   : > { %4841 = vmatprep.subr.bf16.mxu0 %v5132_v20 }
 0xa80   : > { %v3512_v52 = vpop.xlane.xlu0 %3511 }
 0xa81   : > { %5058 = vrcp.f32 %v3512_v52 }
 0xa88   : > { %v3509_v54 = vpop.xlane.xlu1 %3508 }
 0xa89   : > { %5060 = vrcp.f32 %v3509_v54 }
 0xa8b   : > { %v5059_v43 = vpop.eup %5058 }
 0xa8c   : > { %v3520_v44 = vmul.f32 %v5059_v43, %v5850_v63  ;;  %v4981_v63 = vld [vmem:[%s6153_s13 + $0x8] sm:$0xff]  }
 0xa8e   : > { %v3524_v45 = vpack.c.bf16 %v3520_v44, %v3520_v44 }
 0xa90   : > { %4838 = vmatmul.mubr.msk.bf16.vlgmr.msra.gmra.mrb[52].mxu1 %vm3476_vm6, %v3524_v45 }
 0xa91   : > { %4115 = vmatprep.mubr.bf16.mxu1 %v5131_v2  ;;  %v4982_v2 = vld [vmem:[%s6153_s13 + $0x10] sm:$0xff]  }
 0xa93   : > { %v5061_v46 = vpop.eup %5060 }
 0xa94   : > { %v3519_v47 = vmul.f32 %v5061_v46, %v5854_v1  ;;  %v4983_v1 = vld [vmem:[%s6153_s13 + $0x18] sm:$0xff]  }
 0xa96   : > { %v3523_v48 = vpack.c.bf16 %v3519_v47, %v3519_v47 }
 0xa98   : > { %4832 = vmatmul.mubr.msk.bf16.vlgmr.msra.gmra.mrb[24].mxu0 %vm3476_vm6, %v3523_v48 }
 0xa99   : > { %4857 = vmatprep.mubr.msk.bf16.mxu0 %vm5136_vm0, %v5132_v20  ;;  %4842 = vmatpush3.bf16.msra.mxu0 %v4980_v50 }
 0xa9a   : > { %4843 = vmatprep.subr.bf16.mxu0 %v5132_v20 }
 0xa9d   : > { %4844 = vmatpush3.bf16.msra.mxu0 %v4981_v63 }
 0xa9e   : > { %4845 = vmatprep.subr.bf16.mxu0 %v5132_v20 }
 0xaa1   : > { %4846 = vmatpush3.bf16.msra.mxu0 %v4982_v2 }
 0xaa2   : > { %4847 = vmatprep.subr.bf16.mxu0 %v5132_v20 }
 0xaa5   : > { %4848 = vmatpush3.bf16.msra.mxu0 %v4983_v1 }
 0xaa6   : > { %4849 = vmatprep.subr.bf16.mxu0 %v5132_v20 }
 0xaa9   : > { %4850 = vmatpush3.bf16.msra.mxu0 %v4984_v51 }
 0xaaa   : > { %4851 = vmatprep.subr.bf16.mxu0 %v5132_v20 }
 0xaad   : > { %4852 = vmatpush3.bf16.msra.mxu0 %v4985_v53 }
 0xaae   : > { %4853 = vmatprep.subr.bf16.mxu0 %v5132_v20 }
 0xab1   : > { %4854 = vmatpush3.bf16.msra.mxu0 %v4986_v24  ;;  %v5017_v24 = vld [vmem:[%s6163_s23 + $0x10] sm:$0xff]  }
 0xab2   : > { %4855 = vmatprep.subr.bf16.mxu0 %v5132_v20 }
 0xab5   : > { %4856 = vmatpush3.bf16.msra.mxu0 %v4987_v36 }
 0xb43   : > { %v3562_v55 = vpop.f32.mrb[20].mxu0  ;;  %v3605_v57 = vpop.f32.mrb[48].mxu1 }
 0xb44   : > { %v4821_v58 = vpop.f32.mrb[21].mxu0  ;;  %v4827_v59 = vpop.f32.mrb[49].mxu1 }
 0xb45   : > { %v3565_v60 = vpop.f32.mrb[22].mxu0  ;;  %v3608_v61 = vpop.f32.mrb[50].mxu1  ;;  %v4544_v58 = vld [vmem:[%s6154_s14] ss:$0 sm:$0xff] }
 0xb46   : > { %v4822_v62 = vpop.f32.mrb[23].mxu0  ;;  %v4828_v0 = vpop.f32.mrb[51].mxu1 }
 0xb63   : > { %v3691_v3 = vpop.f32.mrb[52].mxu1 }
 0xb64   : > { %v3713_v25 = vcombine.low %v3605_v57, %v3691_v3  ;;  %v3714_v4 = vcombine.high %v3605_v57, %v3691_v3  ;;  %v4839_v5 = vpop.f32.mrb[53].mxu1  ;;  %v4990_v57 = vld [vmem:[%s6161_s21 + $0x4] ss:$8 sps:$4 sm:$0xff]  }
 0xb65   : > { %v3694_v6 = vpop.f32.mrb[54].mxu1  ;;  %4083 = vmatprep.subr.bf16.mxu1 %v4990_v57  ;;  %v4991_v5 = vld [vmem:[%s6161_s21 + $0x10] ss:$8 sps:$4 sm:$0xff]  }
 0xb66   : > { %v4840_v7 = vpop.f32.mrb[55].mxu1  ;;  %v3721_v14 = vrot.slane %v3713_v25, %v5442_v49  ;;  %v3728_v15 = vrot.slane %v3714_v4, %v5442_v49  ;;  %v4993_v4 = vld [vmem:[%s6161_s21 + $0x14] ss:$8 sps:$4 sm:$0xff]   ;;  %v4994_v6 = vld [vmem:[%s6161_s21 + $0x20] ss:$8 sps:$4 sm:$0xff]  }
 0xb67   : > { %v4999_v7 = vld [vmem:[%s6161_s21 + $0x34] ss:$8 sps:$4 sm:$0xff]  }
 0xb6b   : > { %v3648_v10 = vpop.f32.mrb[24].mxu0 }
 0xb6c   : > { %v3697_v9 = vcombine.low %v3562_v55, %v3648_v10  ;;  %v3698_v11 = vcombine.high %v3562_v55, %v3648_v10  ;;  %v4833_v12 = vpop.f32.mrb[25].mxu0  ;;  %v4988_v55 = vld [vmem:[%s6161_s21] ss:$8 sps:$4 sm:$0xff]   ;;  %v4997_v10 = vld [vmem:[%s6161_s21 + $0x30] ss:$8 sps:$4 sm:$0xff]  }
 0xb6d   : > { %v3651_v13 = vpop.f32.mrb[26].mxu0  ;;  %4084 = vmatpush1.bf16.msra.mxu1 %v4988_v55  ;;  %v5005_v12 = vld [vmem:[%s6161_s21 + $0x54] ss:$8 sps:$4 sm:$0xff]  }
 0xb6e   : > { %v3705_v17 = vrot.slane %v3697_v9, %v5442_v49  ;;  %v3712_v28 = vrot.slane %v3698_v11, %v5442_v49  ;;  %v4834_v8 = vpop.f32.mrb[27].mxu0  ;;  %4085 = vmatprep.subr.bf16.mxu1 %v4993_v4  ;;  %v5002_v9 = vld [vmem:[%s6161_s21 + $0x44] ss:$8 sps:$4 sm:$0xff]   ;;  %v5000_v11 = vld [vmem:[%s6161_s21 + $0x40] ss:$8 sps:$4 sm:$0xff]  }
 0xb6f   : > { %v5003_v13 = vld [vmem:[%s6161_s21 + $0x50] ss:$8 sps:$4 sm:$0xff]   ;;  %v5012_v8 = vld [vmem:[%s6163_s23 + $0x40] sm:$0xff]  }
 0xb70   : > { %v3729_v19 = vcombine.low %v3705_v17, %v3721_v14  ;;  %v3730_v22 = vcombine.high %v3705_v17, %v3721_v14  ;;  %v3745_v23 = vcombine.low %v3712_v28, %v3728_v15  ;;  %v3746_v26 = vcombine.high %v3712_v28, %v3728_v15  ;;  %v5008_v14 = vld [vmem:[%s6161_s21 + $0x64] ss:$8 sps:$4 sm:$0xff]   ;;  %v5006_v15 = vld [vmem:[%s6161_s21 + $0x60] ss:$8 sps:$4 sm:$0xff]   ;;  %v5011_v17 = vld [vmem:[%s6161_s21 + $0x74] ss:$8 sps:$4 sm:$0xff]   ;;  %4663 = vmatprep.subr.bf16.mxu0 %v5012_v8 }
 0xb71   : > { %4086 = vmatpush1.bf16.msra.mxu1 %v4991_v5  ;;  %v5009_v28 = vld [vmem:[%s6161_s21 + $0x70] ss:$8 sps:$4 sm:$0xff]   ;;  %v4588_v8 = vld [vmem:[%s6222_s30] ss:$0 sm:$0xff] }
 0xb72   : > { %v3737_v30 = vrot.slane %v3729_v19, %v5445_v56  ;;  %v3744_v31 = vrot.slane %v3730_v22, %v5445_v56  ;;  %v3753_v32 = vrot.slane %v3745_v23, %v5445_v56  ;;  %v3760_v16 = vrot.slane %v3746_v26, %v5445_v56  ;;  %v5013_v19 = vld [vmem:[%s6163_s23] sm:$0xff]   ;;  %v5014_v22 = vld [vmem:[%s6163_s23 + $0x48] sm:$0xff]   ;;  %v5016_v26 = vld [vmem:[%s6163_s23 + $0x50] sm:$0xff]  }
 0xb73   : > { %v5015_v23 = vld [vmem:[%s6163_s23 + $0x8] sm:$0xff]  }
 0xb74   : > { %v3765_v18 = vcombine.low %v3737_v30, %v3744_v31  ;;  %v4542_v33 = vcombine.high %v3737_v30, %v3744_v31  ;;  %v3781_v34 = vcombine.low %v3753_v32, %v3760_v16  ;;  %v4543_v35 = vcombine.high %v3753_v32, %v3760_v16  ;;  %v5018_v30 = vld [vmem:[%s6163_s23 + $0x58] sm:$0xff]   ;;  %v5020_v32 = vld [vmem:[%s6163_s23 + $0x60] sm:$0xff]  }
 0xb75   : > { %v5019_v31 = vld [vmem:[%s6163_s23 + $0x18] sm:$0xff]   ;;  %v5021_v16 = vld [vmem:[%s6163_s23 + $0x20] sm:$0xff]  }
 0xb76   : > { %v3772_v37 = vrot.slane %v3765_v18, %v5442_v49  ;;  %v3780_v38 = vrot.slane %v4542_v33, %v5442_v49  ;;  %v3788_v39 = vrot.slane %v3781_v34, %v5442_v49  ;;  %v3796_v40 = vrot.slane %v4543_v35, %v5442_v49  ;;  %v5022_v18 = vld [vmem:[%s6163_s23 + $0x68] sm:$0xff]  }
 0xb77   : > { %v5023_v33 = vld [vmem:[%s6163_s23 + $0x28] sm:$0xff]  }
 0xb78   : > { %v3798_v41 = vcombine.high %v3772_v37, %v3780_v38  ;;  %v3814_v21 = vcombine.high %v3788_v39, %v3796_v40  ;;  %v3797_v52 = vcombine.low %v3772_v37, %v3780_v38  ;;  %v3813_v54 = vcombine.low %v3788_v39, %v3796_v40 }
 0xb7a   : > { %v3812_v43 = vrot.slane %v3798_v41, %v5445_v56  ;;  %v3828_v20 = vrot.slane %v3814_v21, %v5445_v56  ;;  %v3805_v44 = vrot.slane %v3797_v52, %v5445_v56  ;;  %v3821_v45 = vrot.slane %v3813_v54, %v5445_v56  ;;  %v4553_v54 = vld [vmem:[%s6157_s17] ss:$0 sm:$0xff] }
 0xb7c   : > { %v3831_v46 = vcombine.low %v3812_v43, %v3828_v20  ;;  %v3830_v47 = vcombine.high %v3805_v44, %v3821_v45  ;;  %v3832_v48 = vcombine.high %v3812_v43, %v3828_v20  ;;  %v3829_v50 = vcombine.low %v3805_v44, %v3821_v45  ;;  %v4554_v20 = vld [vmem:[%s6158_s18] ss:$0 sm:$0xff] }
 0xb7e   : > { %3838 = vrot.lane.b32.xlu1 %v3831_v46, %s6218_s19  ;;  %3834 = vrot.lane.b32.xlu0 %v3830_v47, %s6219_s8  ;;  %v5024_v47 = vld [vmem:[%s6163_s23 + $0x70] sm:$0xff]  }
 0xb82   : > { %3842 = vrot.lane.b32.xlu1 %v3832_v48, %s6217_s28  ;;  %v5025_v48 = vld [vmem:[%s6163_s23 + $0x30] sm:$0xff]   ;;  %s790_s28 = sand.u32 1, %s5121_s2  }
 0xb83   : > { %s4442_s8 = sshll.u32 %s790_s28, 3  ;;  %s4336_s27 = scalar_lea.sflag [#allocation3], %s790_s28 }
 0xb84   : > { %s792_s5 = scalar_lea.vmem [#allocation2], %s4442_s8  ;;  %s5071_s8 = sshll.u32 %s5139_s7, 4  ;;  %s5072_s8 = int_to_ptr.vmem [resolvable:$false] %s5071_s8 }
 0xb85   : > { %s4349_s1 = sshll.u32 %s792_s5, 4  ;;  %s5073_s30 = scalar_lea.vmem %s5072_s8, 256  ;;  %s6100_s1 = int_to_ptr.vmem [resolvable:$true] %s4349_s1 }
 0xb86   : > { %s5067_s9 = scalar_lea.vmem %s6100_s1, 128  ;;  %p5074_p0 = scmp.lt.s32.totalorder %s6100_s1, %s5072_s8 }
 0xb87   : > { %p5068_p11 = scmp.ne.s32.totalorder %s6100_s1, %s5067_s9  ;;  %p5075_p1 = scmp.lt.s32.totalorder %s5073_s30, %s5067_s9 }
 0xb89   : > { %p5069_p12 = pnand %p5068_p11, %p5308_p5  ;;  %p5076_p2 = por %p5075_p1, %p5074_p0 }
 0xb8b   : > { %p5070_p13 = pneg %p5069_p12 }
 0xb8d   : > { %p5077_p3 = pnand %p5076_p2, %p5070_p13 }
 0xbf0   : > { %v3839_v49 = vpop.permute.xlu1 %3838  ;;  %v3835_v63 = vpop.permute.xlu0 %3834 }
 0xbf1   : > { %v3845_v2 = vsel %vm1547_vm1, %v3829_v50, %v3835_v63  ;;  %v5026_v50 = vld [vmem:[%s6163_s23 + $0x78] sm:$0xff]   ;;  %v3991_v63 = vld [vmem:[%s6162_s22] sm:$0x3] }
 0xbf2   : > { %v3846_v51 = vsel %vm2123_vm4, %v3845_v2, %v3839_v49  ;;  %v5027_v49 = vld [vmem:[%s6163_s23 + $0x38] sm:$0xff]   ;;  %v3996_v2 = vrot.slane %v3991_v63, %v5411_v29 }
 0xbf4   : > { %v3843_v1 = vpop.permute.xlu1 %3842 }
 0xbf5   : > { %v3847_v53 = vsel %vm2125_vm5, %v3846_v51, %v3843_v1  ;;  %v4000_v1 = vrot.slane %v3991_v63, %v5402_v27 }
 0xbf6   : > { %v3848_v56 = vpack.c.bf16 %v3847_v53, %v3847_v53 }
 0xbf8   : > { %4858 = vmatmul.mubr.bf16.vlgmr.msra.gmra.mrb[28].mxu0 %v3848_v56 }
 0xbf9   : > { %4664 = vmatpush3.bf16.msra.mxu0 %v5013_v19 }
 0xbfa   : > { %4665 = vmatprep.subr.bf16.mxu0 %v5014_v22  ;;  %v4589_v22 = vld [vmem:[%s6223_s26] ss:$0 sm:$0xff] }
 0xbfd   : > { %4666 = vmatpush3.bf16.msra.mxu0 %v5015_v23 }
 0xbfe   : > { %4667 = vmatprep.subr.bf16.mxu0 %v5016_v26 }
 0xc01   : > { %4668 = vmatpush3.bf16.msra.mxu0 %v5017_v24 }
 0xc02   : > { %4669 = vmatprep.subr.bf16.mxu0 %v5018_v30 }
 0xc05   : > { %4670 = vmatpush3.bf16.msra.mxu0 %v5019_v31 }
 0xc06   : > { %4671 = vmatprep.subr.bf16.mxu0 %v5020_v32 }
 0xc09   : > { %4672 = vmatpush3.bf16.msra.mxu0 %v5021_v16 }
 0xc0a   : > { %4673 = vmatprep.subr.bf16.mxu0 %v5022_v18 }
 0xc0d   : > { %4674 = vmatpush3.bf16.msra.mxu0 %v5023_v33 }
 0xc0e   : > { %4675 = vmatprep.subr.bf16.mxu0 %v5024_v47 }
 0xc11   : > { %4676 = vmatpush3.bf16.msra.mxu0 %v5025_v48 }
 0xc12   : > { %4677 = vmatprep.subr.bf16.mxu0 %v5026_v50 }
 0xc15   : > { %4678 = vmatpush3.bf16.msra.mxu0 %v5027_v49 }
 0xccb   : > { %v3937_v59 = vpop.f32.mrb[28].mxu0 }
 0xccc   : > { %v3938_v60 = vadd.f32 %v4544_v58, %v3937_v59  ;;  %v4859_v61 = vpop.f32.mrb[29].mxu0 }
 0xccd   : > { %v3940_v62 = vpop.f32.mrb[30].mxu0 }
 0xcce   : > { %v5977_v0 = vadd.f32 %v3938_v60, %v5737_v42  ;;  %v4860_v3 = vpop.f32.mrb[31].mxu0  ;;  %v4996_v42 = vld [vmem:[%s6161_s21 + $0x24] ss:$8 sps:$4 sm:$0xff]  }
 0xccf   : > { %4087 = vmatprep.subr.bf16.mxu1 %v4996_v42  ;;  %v4571_v3 = vld [vmem:[%s6164_s24] ss:$0 sm:$0xff] }
 0xcd0   : > { %3946 = vadd.xlane.f32.xlu0 %v5977_v0  ;;  %v3949_v25 = vmul.f32 %v5977_v0, %v5977_v0  ;;  %4088 = vmatpush1.bf16.msra.mxu1 %v4994_v6 }
 0xcd1   : > { %4089 = vmatprep.subr.bf16.mxu1 %v4999_v7 }
 0xcd2   : > { %3950 = vadd.xlane.f32.xlu1 %v3949_v25 }
 0xcd4   : > { %4090 = vmatpush1.bf16.msra.mxu1 %v4997_v10 }
 0xcd5   : > { %4091 = vmatprep.subr.bf16.mxu1 %v5002_v9 }
 0xcd8   : > { %4092 = vmatpush1.bf16.msra.mxu1 %v5000_v11 }
 0xcd9   : > { %4093 = vmatprep.subr.bf16.mxu1 %v5005_v12 }
 0xcdc   : > { %4094 = vmatpush1.bf16.msra.mxu1 %v5003_v13 }
 0xcdd   : > { %4095 = vmatprep.subr.bf16.mxu1 %v5008_v14 }
 0xce0   : > { %4096 = vmatpush1.bf16.msra.mxu1 %v5006_v15 }
 0xce1   : > { %4097 = vmatprep.subr.bf16.mxu1 %v5011_v17 }
 0xce4   : > { %4098 = vmatpush1.bf16.msra.mxu1 %v5009_v28 }
 0xd5d   : > { %v3947_v34 = vpop.xlane.xlu0 %3946 }
 0xd5e   : > { %v3948_v35 = vmul.f32 0.0078125, %v3947_v34 }
 0xd5f   : > { %v3951_v36 = vpop.xlane.xlu1 %3950 }
 0xd60   : > { %v3953_v37 = vmul.f32 %v3948_v35, %v3948_v35  ;;  %v3952_v38 = vmul.f32 0.0078125, %v3951_v36  ;;  %v3956_v21 = vsub.f32 %v5977_v0, %v3948_v35 }
 0xd62   : > { %v3954_v39 = vsub.f32 %v3952_v38, %v3953_v37 }
 0xd64   : > { %v3955_v40 = vmax.f32 %v3954_v39, 0.0 }
 0xd66   : > { %v3957_v41 = vadd.f32 1e-05, %v3955_v40 }
 0xd68   : > { %5062 = vrsqrt.f32 %v3957_v41 }
 0xd72   : > { %v5063_v52 = vpop.eup %5062 }
 0xd73   : > { %v3959_v43 = vmul.f32 %v5063_v52, %v3956_v21 }
 0xd75   : > { %v3966_v44 = vmul.f32 %v4553_v54, %v3959_v43 }
 0xd77   : > { %v3973_v45 = vadd.f32 %v4554_v20, %v3966_v44 }
 0xd79   : > { %v3974_v46 = vpack.c.bf16 %v3973_v45, %v3973_v45 }
 0xd7b   : > { %4116 = vmatmul.mubr.bf16.vlgmr.msra.gmra.mrb[56].mxu1 %v3974_v46 }
 0xe4e   : > { %v4117_v51 = vpop.f32.mrb[56].mxu1 }
 0xe4f   : > { %v4118_v53 = vadd.f32 %v4117_v51, %v3996_v2  ;;  %v4119_v56 = vpop.f32.mrb[57].mxu1 }
 0xe50   : > { %v4120_v55 = vadd.f32 %v4119_v56, %v4000_v1  ;;  %v4121_v57 = vpop.f32.mrb[58].mxu1 }
 0xe51   : > { %v4124_v58 = vmax.f32 %v4118_v53, 0.0  ;;  %v4122_v59 = vpop.f32.mrb[59].mxu1 }
 0xe52   : > { %v4125_v60 = vmax.f32 %v4120_v55, 0.0 }
 0xe53   : > { %v4126_v62 = vpack.c.bf16 %v4124_v58, %v4124_v58 }
 0xe54   : > { %v4127_v61 = vpack.c.bf16 %v4125_v60, %v4125_v60 }
 0xe56   : > { %4295 = vmatprep.mubr.bf16.mxu0 %v4127_v61 }
 0xe57   : > { %4296 = vmatmul.mubr.bf16.vlgmr.msra.gmra.mrb[32].mxu0 %v4126_v62 }
 0xf2a   : > { %v4679_v0 = vpop.f32.mrb[32].mxu0 }
 0xf2b   : > { %v4680_v29 = vpop.f32.mrb[33].mxu0 }
 0xf2c   : > { %v4681_v25 = vadd.f32 %v4680_v29, %v4679_v0  ;;  %v4682_v27 = vpop.f32.mrb[34].mxu0 }
 0xf2d   : > { %v4683_v4 = vpop.f32.mrb[35].mxu0 }
 0xf2e   : > { %v4298_v5 = vadd.f32 %v4681_v25, %v4571_v3 }
 0xf30   : > { %v4305_v42 = vadd.f32 %v4298_v5, %v3973_v45 }
 0xf32   : > { %4306 = vadd.xlane.f32.xlu0 %v4305_v42  ;;  %v4309_v6 = vmul.f32 %v4305_v42, %v4305_v42 }
 0xf36   : > { %4310 = vadd.xlane.f32.xlu0 %v4309_v6 }
 0xfbf   : > { %v4307_v7 = vpop.xlane.xlu0 %4306 }
 0xfc0   : > { %v4308_v10 = vmul.f32 0.0078125, %v4307_v7 }
 0xfc2   : > { %v4313_v11 = vmul.f32 %v4308_v10, %v4308_v10  ;;  %v4316_v17 = vsub.f32 %v4305_v42, %v4308_v10 }
 0xfc3   : > { %v4311_v9 = vpop.xlane.xlu0 %4310 }
 0xfc4   : > { %v4312_v12 = vmul.f32 0.0078125, %v4311_v9 }
 0xfc6   : > { %v4314_v13 = vsub.f32 %v4312_v12, %v4313_v11 }
 0xfc8   : > { %v4315_v14 = vmax.f32 %v4314_v13, 0.0 }
 0xfca   : > { %v4317_v15 = vadd.f32 1e-05, %v4315_v14 }
 0xfcc   : > { %5064 = vrsqrt.f32 %v4317_v15 }
 0xfd6   : > { %v5065_v28 = vpop.eup %5064 }
 0xfd7   : > { %v4319_v19 = vmul.f32 %v5065_v28, %v4316_v17 }
 0xfd9   : > { %v4326_v23 = vmul.f32 %v4588_v8, %v4319_v19 }
 0xfdb   : > { %v4333_v26 = vadd.f32 %v4589_v22, %v4326_v23 }
 0xfdd   : > { %4334 = vst [vmem:[%s792_s5] sm:$0xff] %v4333_v26 }
 0xfde   : > { %5080 = shalt.err (!%p5077_p3)
}
 0xfdf   : > { %s5081_s28 = scalar_lea.hbm %s6098_s11, 128  ;;  %s5085_s26 = scalar_lea.hbm %s6225_s10, 256 }
 0xfe0   : > { %p5082_p4 = scmp.ne.s32.totalorder %s6098_s11, %s5081_s28  ;;  %p5086_p9 = scmp.lt.u32.totalorder %s6098_s11, %s6225_s10 }
 0xfe1   : > { %p5087_p10 = scmp.lt.u32.totalorder %s5085_s26, %s5081_s28  ;;  %p5089_p12 = scmp.lt.u32.totalorder %s5081_s28, %s6098_s11 }
 0xfe2   : > { %p5083_p7 = pnand %p5082_p4, %p5308_p5 }
 0xfe3   : > { %p5088_p11 = por %p5087_p10, %p5086_p9 }
 0xfe4   : > { %p5084_p8 = pneg %p5083_p7 }
 0xfe5   : > { %p5090_p13 = por %p5089_p12, %p5088_p11 }
 0xfe7   : > { %p5091_p0 = pnand %p5090_p13, %p5084_p8 }
 0xfe9   : > { %5094 = shalt.err (!%p5091_p0)
}
 0xfea   : > { %4861 = dma.vmem_to_hbm [thread:$0]  (%p5308_p5), %s6100_s1, 128, %s6098_s11, %s4336_s27  }
 0xfeb PF: > { %s6226_s0 = sld [smem:[#allocation7_spill]]  ;;  %s6227_s19 = sld [smem:[#allocation5_spill]] }
 0xff1   : > { %p4867_p1 = scmp.ge.s32.totalorder %s6226_s0, 2  ;;  %s4361_s9 = sand.u32 1, %s6227_s19  }
 0xff2   : > { %s4362_s7 = scalar_lea.sflag [#allocation3], %s4361_s9 }
 0xff3   : > { %p4864_p2 = pnand %p4867_p1, %p5312_p6 }
 0xff5   : > { %5112 = dma.done.wait (!%p4864_p2), %s4362_s7, 128  }
 0xff6   : > { %5114 = vsyncadd (!%p4864_p2), %s4362_s7, 4294967168  ;;  %s6229_s30 = sld [smem:[#allocation8_spill]]  ;;  %s6230_s8 = sld [smem:[#allocation6_spill]] }
 0xff7   : > { %s6231_s6 = sld [smem:[#allocation9_spill]]  ;;  %s6232_s29 = smov %s5121_s2 }
 0xffc   : > { %p35_p3 = scmp.ge.s32.totalorder %s6229_s30, 4   ;;  %s6233_s2 = smov %s6230_s8 }
 0xffe   :  { %37 = sbr.rel (!%p35_p3) target bundleno = 19 (0x13), region = 164 }
0x1005   :  { %4367 = vsyncpa [#allocation3], 1 }
0x1006   :  { %4369 = vsyncpa [#allocation3 + $0x1], 1 }

</bundles_post_ra>
